<compile_context>
chip_gen: v7x
topology: tpu7x:2x2x1
jax: 0.10.0
libtpu: 0.0.40
codegen_flags: <defaults>
</compile_context>

<pallas_src>
import functools

import jax
import jax.numpy as jnp
from jax import lax
from jax.experimental import pallas as pl
from jax.experimental.pallas import tpu as pltpu

HALO = 128          # per-side halo in the activation scratch (lane aligned)
NEG_SLOPE = 0.2


def _pwg_fused_kernel(x_ref, w0_ref, b0_ref, wmid_ref, bmid_ref, w9_ref,
                      b9_ref, o_ref, xpad_ref, act_ref, *,
                      T, C, dilations, neg_slope):
    """One batch element: full 10-layer discriminator stack.

    x_ref   : (1, 1, T)        f32 input block
    w0_ref  : (C, 3)           f32 layer-0 weights (per-tap columns)
    b0_ref  : (C, 1)           f32
    wmid_ref: (L, 3, C, C)     bf16 mid-layer per-tap (C_out, C_in) matrices
    bmid_ref: (L, C, 1)        f32
    w9_ref  : (C, 3)           f32 last-layer weights (per-tap columns)
    b9_ref  : (1, 1)           f32
    o_ref   : (1, 1, T)        f32 output block
    xpad_ref: (1, T + 2*HALO)  f32 scratch (zero-padded input row)
    act_ref : (C, T + 2*HALO)  bf16 scratch (resident activation, zero halo)
    """
    H = HALO

    def leaky(v):
        # neg_slope in (0, 1)  =>  max(v, s*v) == LeakyReLU(v)
        return jnp.maximum(v, neg_slope * v)

    # ---- halo-only zeroing (every step; megacore-safe, cheap) --------------
    xpad_ref[:, :H] = jnp.zeros((1, H), xpad_ref.dtype)
    xpad_ref[:, H + T:] = jnp.zeros((1, H), xpad_ref.dtype)
    act_ref[:, :H] = jnp.zeros((C, H), act_ref.dtype)
    act_ref[:, H + T:] = jnp.zeros((C, H), act_ref.dtype)

    # ---- layer 0: Conv1d(1 -> C, k=3, d=1) + LeakyReLU (VPU path) ----------
    xpad_ref[:, H:H + T] = x_ref[0]                       # (1, T), aligned store
    xl = xpad_ref[:, H - 1:H - 1 + T]                     # x[t-1]
    xc = xpad_ref[:, H:H + T]                             # x[t]
    xr = xpad_ref[:, H + 1:H + 1 + T]                     # x[t+1]
    w0 = w0_ref[...]                                      # (C, 3)
    acc = (w0[:, 0:1] * xl + w0[:, 1:2] * xc + w0[:, 2:3] * xr
           + b0_ref[...])                                 # (C, T) f32
    acc = leaky(acc)
    act_ref[:, H:H + T] = acc.astype(act_ref.dtype)       # aligned bf16 store

    # ---- layers 1..8: Conv1d(C -> C, k=3, dilation=d) + LeakyReLU ----------
    # Three accumulated (C,C)x(C,T) bf16 MXU matmuls per layer (f32 acc);
    # no im2col slab, no extra full-slab stores.
    for li, d in enumerate(dilations):                    # static unroll
        w_l = wmid_ref[li]                                # (3, C, C) bf16
        a_l = act_ref[:, H - d:H - d + T]                 # (C, T) bf16
        a_c = act_ref[:, H:H + T]
        a_r = act_ref[:, H + d:H + d + T]
        acc = jnp.dot(w_l[0], a_l, preferred_element_type=jnp.float32)
        acc += jnp.dot(w_l[1], a_c, preferred_element_type=jnp.float32)
        acc += jnp.dot(w_l[2], a_r, preferred_element_type=jnp.float32)
        acc = leaky(acc + bmid_ref[li])                   # (C, T) f32
        act_ref[:, H:H + T] = acc.astype(act_ref.dtype)   # aligned bf16 store
        # TODO(synk): tile this dot+bias+LeakyReLU along T (512-2048 lanes,
        # unrolled fori_loop) for long-audio T to bound the f32 temporary.

    # ---- last layer: Conv1d(C -> 1, k=3, d=1), no activation (VPU + XLU) ---
    a_l = act_ref[:, H - 1:H - 1 + T].astype(jnp.float32)
    a_c = act_ref[:, H:H + T].astype(jnp.float32)
    a_r = act_ref[:, H + 1:H + 1 + T].astype(jnp.float32)
    w9 = w9_ref[...]                                      # (C, 3)
    z = w9[:, 0:1] * a_l + w9[:, 1:2] * a_c + w9[:, 2:3] * a_r   # (C, T)
    y = jnp.sum(z, axis=0, keepdims=True) + b9_ref[...]          # (1, T)
    o_ref[0] = y.astype(o_ref.dtype)


def _vmem_estimate_bytes(C, T, L, K):
    """Rough per-core VMEM usage: scratch + double-buffered I/O + weights."""
    act = C * (T + 2 * HALO) * 2                     # bf16 resident activation
    xpad = (T + 2 * HALO) * 4                        # f32 padded input row
    io = 2 * 2 * (T * 4)                             # in/out blocks, 2-deep
    weights = 2 * (2 * C * K * 4 + C * 4 + 4         # w0/b0/w9/b9 (buffered)
                   + L * (K * C * C * 2 + C * 4))    # mid weights/biases
    return act + xpad + io + weights


def _vmem_capacity_bytes():
    try:
        return int(pltpu.get_tpu_info().vmem_capacity_bytes)
    except Exception:
        return 64 * 1024 * 1024                      # v7x lower bound


def pwg_discriminator_forward(x, params):
    """Fused Pallas forward: x (B, 1, T) f32 -> (B, 1, T) f32.

    params: list of (w, b, dilation, apply_act) with PyTorch Conv1d weight
    layout w: (C_out, C_in, K), b: (C_out,).
    """
    B, c_in, T = x.shape
    assert c_in == 1, "discriminator expects a single input channel"
    assert T % 128 == 0, "time axis must be a multiple of 128 (lane width)"
    assert len(params) >= 3

    w0, b0, d0, a0 = params[0]
    w9, b9, d9, a9 = params[-1]
    mids = params[1:-1]

    C, _, K = w0.shape
    assert K == 3 and int(d0) == 1 and int(d9) == 1 and a0 and not a9
    assert all(w.shape == (C, C, K) for (w, _, _, _) in mids)
    assert max(int(d) for (_, _, d, _) in mids) < HALO

    # Layer 0: (C, 1, K) -> (C, K) f32 columns per tap.
    w0_p = jnp.asarray(w0[:, 0, :], jnp.float32)
    b0_p = jnp.asarray(b0, jnp.float32).reshape(C, 1)
    # Mid layers: (C, C, K) -> (K, C, C) per-tap matrices, bf16 for the MXU.
    wm_p = jnp.stack([jnp.transpose(w, (2, 0, 1)) for (w, _, _, _) in mids]
                     ).astype(jnp.bfloat16)                 # (L, K, C, C)
    bm_p = jnp.stack([b for (_, b, _, _) in mids]
                     ).astype(jnp.float32).reshape(len(mids), C, 1)
    dils = tuple(int(d) for (_, _, d, _) in mids)
    # Last layer: (1, C, K) -> (C, K) f32 columns per tap.
    w9_p = jnp.asarray(w9[0], jnp.float32)
    b9_p = jnp.asarray(b9, jnp.float32).reshape(1, 1)

    L = len(mids)
    est = _vmem_estimate_bytes(C, T, L, K)
    cap = _vmem_capacity_bytes()
    budget = int(0.75 * cap)                         # leave headroom on-chip
    assert 2 * est <= budget, (
        f"untiled scratch (~{est} B x2 headroom) exceeds VMEM budget "
        f"{budget} B; need the time-tiled grid (see TODO)")
    vmem_limit = max(32 * 1024 * 1024, min(2 * est, budget))

    kernel = functools.partial(_pwg_fused_kernel, T=T, C=C,
                               dilations=dils, neg_slope=NEG_SLOPE)

    return pl.pallas_call(
        kernel,
        out_shape=jax.ShapeDtypeStruct((B, 1, T), x.dtype),
        grid_spec=pltpu.PrefetchScalarGridSpec(
            num_scalar_prefetch=0,
            grid=(B,),
            in_specs=[
                pl.BlockSpec((1, 1, T), lambda b: (b, 0, 0)),       # x
                pl.BlockSpec((C, K), lambda b: (0, 0)),             # w0
                pl.BlockSpec((C, 1), lambda b: (0, 0)),             # b0
                pl.BlockSpec((L, K, C, C), lambda b: (0, 0, 0, 0)), # w mid
                pl.BlockSpec((L, C, 1), lambda b: (0, 0, 0)),       # b mid
                pl.BlockSpec((C, K), lambda b: (0, 0)),             # w last
                pl.BlockSpec((1, 1), lambda b: (0, 0)),             # b last
            ],
            out_specs=pl.BlockSpec((1, 1, T), lambda b: (b, 0, 0)),
            scratch_shapes=[
                pltpu.VMEM((1, T + 2 * HALO), jnp.float32),    # padded input
                pltpu.VMEM((C, T + 2 * HALO), jnp.bfloat16),   # resident act
            ],
        ),
        compiler_params=pltpu.CompilerParams(
            dimension_semantics=("parallel",),
            vmem_limit_bytes=vmem_limit),
    )(x, w0_p, b0_p, wm_p, bm_p, w9_p, b9_p)


def init_params(key, in_channels=1, out_channels=1, kernel_size=3, layers=10,
                conv_channels=64):
    """Deterministic params matching the PyTorch module: (w, b, dilation, act)."""
    params = []
    conv_in = in_channels
    for i in range(layers - 1):
        dilation = 1 if i == 0 else i
        if i != 0:
            conv_in = conv_channels
        key, kw, kb = jax.random.split(key, 3)
        w = 0.1 * jax.random.normal(
            kw, (conv_channels, conv_in, kernel_size), jnp.float32)
        b = 0.1 * jax.random.normal(kb, (conv_channels,), jnp.float32)
        params.append((w, b, dilation, True))
    key, kw, kb = jax.random.split(key, 3)
    w = 0.1 * jax.random.normal(
        kw, (out_channels, conv_channels, kernel_size), jnp.float32)
    b = 0.1 * jax.random.normal(kb, (out_channels,), jnp.float32)
    params.append((w, b, 1, False))
    return params


def pwg_discriminator_ref(x, params, neg_slope=NEG_SLOPE):
    """Pure-JAX reference (lax conv) mirroring the kernel's precision choices:
    layer 0 fully f32; middle layers bf16 operands with f32 accumulation;
    last layer f32 weights over bf16-resident activations."""
    n = len(params)
    y = x
    for i, (w, b, d, act) in enumerate(params):
        pad = (w.shape[-1] - 1) // 2 * d
        if i == 0:
            lhs, rhs = y, w
        elif i < n - 1:
            lhs = y.astype(jnp.bfloat16)
            rhs = w.astype(jnp.bfloat16)
        else:                       # last layer reads the bf16 resident act
            lhs = y.astype(jnp.bfloat16).astype(jnp.float32)
            rhs = w
        y = lax.conv_general_dilated(
            lhs, rhs, window_strides=(1,), padding=[(pad, pad)],
            rhs_dilation=(d,), dimension_numbers=("NCH", "OIH", "NCH"),
            preferred_element_type=jnp.float32)
        y = y + b[None, :, None]
        if act:
            y = jnp.where(y >= 0, y, neg_slope * y)
    return y


if __name__ == "__main__":
    key = jax.random.PRNGKey(0)
    key, kx = jax.random.split(key)

    B, T = 2, 256                       # small, lane-aligned time axis
    x = jax.random.normal(kx, (B, 1, T), jnp.float32)

    params = init_params(key)

    out = jax.block_until_ready(pwg_discriminator_forward(x, params))
    ref = pwg_discriminator_ref(x, params)

    assert out.shape == (B, 1, T), out.shape
    max_err = float(jnp.max(jnp.abs(out - ref)))
    assert jnp.allclose(out, ref, rtol=5e-3, atol=5e-3), max_err

    print("KERNEL_OK")
</pallas_src>

<mosaic_0001>
module attributes {stable_mosaic.version = 11 : i64} {
  func.func @_pwg_fused_kernel(%arg0: i32, %arg1: memref<1x1x256xf32, #tpu.memory_space<vmem>>, %arg2: memref<64x3xf32, #tpu.memory_space<vmem>>, %arg3: memref<64x1xf32, #tpu.memory_space<vmem>>, %arg4: memref<8x3x64x64xbf16, #tpu.memory_space<vmem>>, %arg5: memref<8x64x1xf32, #tpu.memory_space<vmem>>, %arg6: memref<64x3xf32, #tpu.memory_space<vmem>>, %arg7: memref<1x1xf32, #tpu.memory_space<vmem>>, %arg8: memref<1x1x256xf32, #tpu.memory_space<vmem>>, %arg9: memref<1x512xf32, #tpu.memory_space<vmem>>, %arg10: memref<64x512xbf16, #tpu.memory_space<vmem>>) attributes {dimension_semantics = [#tpu.dimension_semantics<parallel>], iteration_bounds = array<i64: 2>, scalar_prefetch = 0 : i64, scratch_operands = 2 : i64, tpu.core_type = #tpu.core_type<tc>, window_params = [{transform_indices = @transform_0, window_bounds = array<i64: 1, 1, 256>}, {pipeline_mode = #tpu.pipeline_mode<synchronous>, transform_indices = @transform_1, window_bounds = array<i64: 64, 3>}, {pipeline_mode = #tpu.pipeline_mode<synchronous>, transform_indices = @transform_2, window_bounds = array<i64: 64, 1>}, {pipeline_mode = #tpu.pipeline_mode<synchronous>, transform_indices = @transform_3, window_bounds = array<i64: 8, 3, 64, 64>}, {pipeline_mode = #tpu.pipeline_mode<synchronous>, transform_indices = @transform_4, window_bounds = array<i64: 8, 64, 1>}, {pipeline_mode = #tpu.pipeline_mode<synchronous>, transform_indices = @transform_5, window_bounds = array<i64: 64, 3>}, {pipeline_mode = #tpu.pipeline_mode<synchronous>, transform_indices = @transform_6, window_bounds = array<i64: 1, 1>}, {transform_indices = @transform_7, window_bounds = array<i64: 1, 1, 256>}]} {
    %cst = arith.constant 0.000000e+00 : f32
    %0 = vector.broadcast %cst : f32 to vector<1x128xf32>
    %c0 = arith.constant 0 : index
    %c0_0 = arith.constant 0 : index
    %1 = vector.load %arg9[%c0, %c0_0] : memref<1x512xf32, #tpu.memory_space<vmem>>, vector<1x128xf32>
    tpu.vector_store %arg9[%c0, %c0_0], %0 {strides = array<i32>} : memref<1x512xf32, #tpu.memory_space<vmem>>, vector<1x128xf32>,
    %cst_1 = arith.constant 0.000000e+00 : f32
    %2 = vector.broadcast %cst_1 : f32 to vector<1x128xf32>
    %c0_2 = arith.constant 0 : index
    %c384 = arith.constant 384 : index
    %3 = vector.load %arg9[%c0_2, %c384] : memref<1x512xf32, #tpu.memory_space<vmem>>, vector<1x128xf32>
    tpu.vector_store %arg9[%c0_2, %c384], %2 {strides = array<i32>} : memref<1x512xf32, #tpu.memory_space<vmem>>, vector<1x128xf32>,
    %cst_3 = arith.constant 0.000000e+00 : bf16
    %4 = vector.broadcast %cst_3 : bf16 to vector<64x128xbf16>
    %c0_4 = arith.constant 0 : index
    %c0_5 = arith.constant 0 : index
    %5 = vector.load %arg10[%c0_4, %c0_5] : memref<64x512xbf16, #tpu.memory_space<vmem>>, vector<64x128xbf16>
    tpu.vector_store %arg10[%c0_4, %c0_5], %4 {strides = array<i32>} : memref<64x512xbf16, #tpu.memory_space<vmem>>, vector<64x128xbf16>,
    %cst_6 = arith.constant 0.000000e+00 : bf16
    %6 = vector.broadcast %cst_6 : bf16 to vector<64x128xbf16>
    %c0_7 = arith.constant 0 : index
    %c384_8 = arith.constant 384 : index
    %7 = vector.load %arg10[%c0_7, %c384_8] : memref<64x512xbf16, #tpu.memory_space<vmem>>, vector<64x128xbf16>
    tpu.vector_store %arg10[%c0_7, %c384_8], %6 {strides = array<i32>} : memref<64x512xbf16, #tpu.memory_space<vmem>>, vector<64x128xbf16>,
    %c0_9 = arith.constant 0 : index
    %c0_10 = arith.constant 0 : index
    %c0_11 = arith.constant 0 : index
    %8 = vector.load %arg1[%c0_9, %c0_10, %c0_11] : memref<1x1x256xf32, #tpu.memory_space<vmem>>, vector<1x1x256xf32>
    %9 = vector.shape_cast %8 : vector<1x1x256xf32> to vector<1x256xf32>
    %c0_12 = arith.constant 0 : index
    %c128 = arith.constant 128 : index
    %10 = vector.load %arg9[%c0_12, %c128] : memref<1x512xf32, #tpu.memory_space<vmem>>, vector<1x256xf32>
    tpu.vector_store %arg9[%c0_12, %c128], %9 {strides = array<i32>} : memref<1x512xf32, #tpu.memory_space<vmem>>, vector<1x256xf32>,
    %c0_13 = arith.constant 0 : index
    %c127 = arith.constant 127 : index
    %11 = vector.load %arg9[%c0_13, %c127] : memref<1x512xf32, #tpu.memory_space<vmem>>, vector<1x256xf32>
    %c0_14 = arith.constant 0 : index
    %c128_15 = arith.constant 128 : index
    %12 = vector.load %arg9[%c0_14, %c128_15] : memref<1x512xf32, #tpu.memory_space<vmem>>, vector<1x256xf32>
    %c0_16 = arith.constant 0 : index
    %c129 = arith.constant 129 : index
    %13 = vector.load %arg9[%c0_16, %c129] : memref<1x512xf32, #tpu.memory_space<vmem>>, vector<1x256xf32>
    %c0_17 = arith.constant 0 : index
    %c0_18 = arith.constant 0 : index
    %14 = vector.load %arg2[%c0_17, %c0_18] : memref<64x3xf32, #tpu.memory_space<vmem>>, vector<64x3xf32>
    %15 = vector.extract_strided_slice %14 {offsets = [0, 0], sizes = [64, 1], strides = [1, 1]} : vector<64x3xf32> to vector<64x1xf32>
    %16 = vector.broadcast %15 : vector<64x1xf32> to vector<64x256xf32>
    %17 = vector.broadcast %11 : vector<1x256xf32> to vector<64x256xf32>
    %18 = arith.mulf %16, %17 : vector<64x256xf32>
    %19 = vector.extract_strided_slice %14 {offsets = [0, 1], sizes = [64, 1], strides = [1, 1]} : vector<64x3xf32> to vector<64x1xf32>
    %20 = vector.broadcast %19 : vector<64x1xf32> to vector<64x256xf32>
    %21 = vector.broadcast %12 : vector<1x256xf32> to vector<64x256xf32>
    %22 = arith.mulf %20, %21 : vector<64x256xf32>
    %23 = arith.addf %18, %22 : vector<64x256xf32>
    %24 = vector.extract_strided_slice %14 {offsets = [0, 2], sizes = [64, 1], strides = [1, 1]} : vector<64x3xf32> to vector<64x1xf32>
    %25 = vector.broadcast %24 : vector<64x1xf32> to vector<64x256xf32>
    %26 = vector.broadcast %13 : vector<1x256xf32> to vector<64x256xf32>
    %27 = arith.mulf %25, %26 : vector<64x256xf32>
    %28 = arith.addf %23, %27 : vector<64x256xf32>
    %c0_19 = arith.constant 0 : index
    %c0_20 = arith.constant 0 : index
    %29 = vector.load %arg3[%c0_19, %c0_20] : memref<64x1xf32, #tpu.memory_space<vmem>>, vector<64x1xf32>
    %30 = vector.broadcast %29 : vector<64x1xf32> to vector<64x256xf32>
    %31 = arith.addf %28, %30 : vector<64x256xf32>
    %cst_21 = arith.constant 2.000000e-01 : f32
    %32 = vector.broadcast %cst_21 : f32 to vector<64x256xf32>
    %33 = arith.mulf %32, %31 : vector<64x256xf32>
    %34 = arith.maximumf %31, %33 : vector<64x256xf32>
    %35 = arith.truncf %34 : vector<64x256xf32> to vector<64x256xbf16>
    %c0_22 = arith.constant 0 : index
    %c128_23 = arith.constant 128 : index
    %36 = vector.load %arg10[%c0_22, %c128_23] : memref<64x512xbf16, #tpu.memory_space<vmem>>, vector<64x256xbf16>
    tpu.vector_store %arg10[%c0_22, %c128_23], %35 {strides = array<i32>} : memref<64x512xbf16, #tpu.memory_space<vmem>>, vector<64x256xbf16>,
    %c0_24 = arith.constant 0 : index
    %c0_25 = arith.constant 0 : index
    %c0_26 = arith.constant 0 : index
    %c0_27 = arith.constant 0 : index
    %37 = vector.load %arg4[%c0_24, %c0_25, %c0_26, %c0_27] : memref<8x3x64x64xbf16, #tpu.memory_space<vmem>>, vector<1x3x64x64xbf16>
    %38 = vector.shape_cast %37 : vector<1x3x64x64xbf16> to vector<3x64x64xbf16>
    %c0_28 = arith.constant 0 : index
    %c127_29 = arith.constant 127 : index
    %39 = vector.load %arg10[%c0_28, %c127_29] : memref<64x512xbf16, #tpu.memory_space<vmem>>, vector<64x256xbf16>
    %c0_30 = arith.constant 0 : index
    %c128_31 = arith.constant 128 : index
    %40 = vector.load %arg10[%c0_30, %c128_31] : memref<64x512xbf16, #tpu.memory_space<vmem>>, vector<64x256xbf16>
    %c0_32 = arith.constant 0 : index
    %c129_33 = arith.constant 129 : index
    %41 = vector.load %arg10[%c0_32, %c129_33] : memref<64x512xbf16, #tpu.memory_space<vmem>>, vector<64x256xbf16>
    %42 = vector.extract_strided_slice %38 {offsets = [0, 0, 0], sizes = [1, 64, 64], strides = [1, 1, 1]} : vector<3x64x64xbf16> to vector<1x64x64xbf16>
    %43 = vector.shape_cast %42 : vector<1x64x64xbf16> to vector<64x64xbf16>
    %cst_34 = arith.constant dense<0.000000e+00> : vector<64x256xf32>
    %44 = tpu.matmul %43, %39, %cst_34 {dimension_numbers = #tpu.dot_dimension_numbers<[1], [0], [0], [1], [0, 0, 1, 1], [], []>} : vector<64x64xbf16>, vector<64x256xbf16>, vector<64x256xf32> -> vector<64x256xf32>
    %45 = vector.extract_strided_slice %38 {offsets = [1, 0, 0], sizes = [1, 64, 64], strides = [1, 1, 1]} : vector<3x64x64xbf16> to vector<1x64x64xbf16>
    %46 = vector.shape_cast %45 : vector<1x64x64xbf16> to vector<64x64xbf16>
    %cst_35 = arith.constant dense<0.000000e+00> : vector<64x256xf32>
    %47 = tpu.matmul %46, %40, %cst_35 {dimension_numbers = #tpu.dot_dimension_numbers<[1], [0], [0], [1], [0, 0, 1, 1], [], []>} : vector<64x64xbf16>, vector<64x256xbf16>, vector<64x256xf32> -> vector<64x256xf32>
    %48 = arith.addf %44, %47 : vector<64x256xf32>
    %49 = vector.extract_strided_slice %38 {offsets = [2, 0, 0], sizes = [1, 64, 64], strides = [1, 1, 1]} : vector<3x64x64xbf16> to vector<1x64x64xbf16>
    %50 = vector.shape_cast %49 : vector<1x64x64xbf16> to vector<64x64xbf16>
    %cst_36 = arith.constant dense<0.000000e+00> : vector<64x256xf32>
    %51 = tpu.matmul %50, %41, %cst_36 {dimension_numbers = #tpu.dot_dimension_numbers<[1], [0], [0], [1], [0, 0, 1, 1], [], []>} : vector<64x64xbf16>, vector<64x256xbf16>, vector<64x256xf32> -> vector<64x256xf32>
    %52 = arith.addf %48, %51 : vector<64x256xf32>
    %c0_37 = arith.constant 0 : index
    %c0_38 = arith.constant 0 : index
    %c0_39 = arith.constant 0 : index
    %53 = vector.load %arg5[%c0_37, %c0_38, %c0_39] : memref<8x64x1xf32, #tpu.memory_space<vmem>>, vector<1x64x1xf32>
    %54 = vector.shape_cast %53 : vector<1x64x1xf32> to vector<64x1xf32>
    %55 = vector.broadcast %54 : vector<64x1xf32> to vector<64x256xf32>
    %56 = arith.addf %52, %55 : vector<64x256xf32>
    %cst_40 = arith.constant 2.000000e-01 : f32
    %57 = vector.broadcast %cst_40 : f32 to vector<64x256xf32>
    %58 = arith.mulf %57, %56 : vector<64x256xf32>
    %59 = arith.maximumf %56, %58 : vector<64x256xf32>
    %60 = arith.truncf %59 : vector<64x256xf32> to vector<64x256xbf16>
    %c0_41 = arith.constant 0 : index
    %c128_42 = arith.constant 128 : index
    %61 = vector.load %arg10[%c0_41, %c128_42] : memref<64x512xbf16, #tpu.memory_space<vmem>>, vector<64x256xbf16>
    tpu.vector_store %arg10[%c0_41, %c128_42], %60 {strides = array<i32>} : memref<64x512xbf16, #tpu.memory_space<vmem>>, vector<64x256xbf16>,
    %c1 = arith.constant 1 : index
    %c0_43 = arith.constant 0 : index
    %c0_44 = arith.constant 0 : index
    %c0_45 = arith.constant 0 : index
    %62 = vector.load %arg4[%c1, %c0_43, %c0_44, %c0_45] : memref<8x3x64x64xbf16, #tpu.memory_space<vmem>>, vector<1x3x64x64xbf16>
    %63 = vector.shape_cast %62 : vector<1x3x64x64xbf16> to vector<3x64x64xbf16>
    %c0_46 = arith.constant 0 : index
    %c126 = arith.constant 126 : index
    %64 = vector.load %arg10[%c0_46, %c126] : memref<64x512xbf16, #tpu.memory_space<vmem>>, vector<64x256xbf16>
    %c0_47 = arith.constant 0 : index
    %c128_48 = arith.constant 128 : index
    %65 = vector.load %arg10[%c0_47, %c128_48] : memref<64x512xbf16, #tpu.memory_space<vmem>>, vector<64x256xbf16>
    %c0_49 = arith.constant 0 : index
    %c130 = arith.constant 130 : index
    %66 = vector.load %arg10[%c0_49, %c130] : memref<64x512xbf16, #tpu.memory_space<vmem>>, vector<64x256xbf16>
    %67 = vector.extract_strided_slice %63 {offsets = [0, 0, 0], sizes = [1, 64, 64], strides = [1, 1, 1]} : vector<3x64x64xbf16> to vector<1x64x64xbf16>
    %68 = vector.shape_cast %67 : vector<1x64x64xbf16> to vector<64x64xbf16>
    %cst_50 = arith.constant dense<0.000000e+00> : vector<64x256xf32>
    %69 = tpu.matmul %68, %64, %cst_50 {dimension_numbers = #tpu.dot_dimension_numbers<[1], [0], [0], [1], [0, 0, 1, 1], [], []>} : vector<64x64xbf16>, vector<64x256xbf16>, vector<64x256xf32> -> vector<64x256xf32>
    %70 = vector.extract_strided_slice %63 {offsets = [1, 0, 0], sizes = [1, 64, 64], strides = [1, 1, 1]} : vector<3x64x64xbf16> to vector<1x64x64xbf16>
    %71 = vector.shape_cast %70 : vector<1x64x64xbf16> to vector<64x64xbf16>
    %cst_51 = arith.constant dense<0.000000e+00> : vector<64x256xf32>
    %72 = tpu.matmul %71, %65, %cst_51 {dimension_numbers = #tpu.dot_dimension_numbers<[1], [0], [0], [1], [0, 0, 1, 1], [], []>} : vector<64x64xbf16>, vector<64x256xbf16>, vector<64x256xf32> -> vector<64x256xf32>
    %73 = arith.addf %69, %72 : vector<64x256xf32>
    %74 = vector.extract_strided_slice %63 {offsets = [2, 0, 0], sizes = [1, 64, 64], strides = [1, 1, 1]} : vector<3x64x64xbf16> to vector<1x64x64xbf16>
    %75 = vector.shape_cast %74 : vector<1x64x64xbf16> to vector<64x64xbf16>
    %cst_52 = arith.constant dense<0.000000e+00> : vector<64x256xf32>
    %76 = tpu.matmul %75, %66, %cst_52 {dimension_numbers = #tpu.dot_dimension_numbers<[1], [0], [0], [1], [0, 0, 1, 1], [], []>} : vector<64x64xbf16>, vector<64x256xbf16>, vector<64x256xf32> -> vector<64x256xf32>
    %77 = arith.addf %73, %76 : vector<64x256xf32>
    %c1_53 = arith.constant 1 : index
    %c0_54 = arith.constant 0 : index
    %c0_55 = arith.constant 0 : index
    %78 = vector.load %arg5[%c1_53, %c0_54, %c0_55] : memref<8x64x1xf32, #tpu.memory_space<vmem>>, vector<1x64x1xf32>
    %79 = vector.shape_cast %78 : vector<1x64x1xf32> to vector<64x1xf32>
    %80 = vector.broadcast %79 : vector<64x1xf32> to vector<64x256xf32>
    %81 = arith.addf %77, %80 : vector<64x256xf32>
    %cst_56 = arith.constant 2.000000e-01 : f32
    %82 = vector.broadcast %cst_56 : f32 to vector<64x256xf32>
    %83 = arith.mulf %82, %81 : vector<64x256xf32>
    %84 = arith.maximumf %81, %83 : vector<64x256xf32>
    %85 = arith.truncf %84 : vector<64x256xf32> to vector<64x256xbf16>
    %c0_57 = arith.constant 0 : index
    %c128_58 = arith.constant 128 : index
    %86 = vector.load %arg10[%c0_57, %c128_58] : memref<64x512xbf16, #tpu.memory_space<vmem>>, vector<64x256xbf16>
    tpu.vector_store %arg10[%c0_57, %c128_58], %85 {strides = array<i32>} : memref<64x512xbf16, #tpu.memory_space<vmem>>, vector<64x256xbf16>,
    %c2 = arith.constant 2 : index
    %c0_59 = arith.constant 0 : index
    %c0_60 = arith.constant 0 : index
    %c0_61 = arith.constant 0 : index
    %87 = vector.load %arg4[%c2, %c0_59, %c0_60, %c0_61] : memref<8x3x64x64xbf16, #tpu.memory_space<vmem>>, vector<1x3x64x64xbf16>
    %88 = vector.shape_cast %87 : vector<1x3x64x64xbf16> to vector<3x64x64xbf16>
    %c0_62 = arith.constant 0 : index
    %c125 = arith.constant 125 : index
    %89 = vector.load %arg10[%c0_62, %c125] : memref<64x512xbf16, #tpu.memory_space<vmem>>, vector<64x256xbf16>
    %c0_63 = arith.constant 0 : index
    %c128_64 = arith.constant 128 : index
    %90 = vector.load %arg10[%c0_63, %c128_64] : memref<64x512xbf16, #tpu.memory_space<vmem>>, vector<64x256xbf16>
    %c0_65 = arith.constant 0 : index
    %c131 = arith.constant 131 : index
    %91 = vector.load %arg10[%c0_65, %c131] : memref<64x512xbf16, #tpu.memory_space<vmem>>, vector<64x256xbf16>
    %92 = vector.extract_strided_slice %88 {offsets = [0, 0, 0], sizes = [1, 64, 64], strides = [1, 1, 1]} : vector<3x64x64xbf16> to vector<1x64x64xbf16>
    %93 = vector.shape_cast %92 : vector<1x64x64xbf16> to vector<64x64xbf16>
    %cst_66 = arith.constant dense<0.000000e+00> : vector<64x256xf32>
    %94 = tpu.matmul %93, %89, %cst_66 {dimension_numbers = #tpu.dot_dimension_numbers<[1], [0], [0], [1], [0, 0, 1, 1], [], []>} : vector<64x64xbf16>, vector<64x256xbf16>, vector<64x256xf32> -> vector<64x256xf32>
    %95 = vector.extract_strided_slice %88 {offsets = [1, 0, 0], sizes = [1, 64, 64], strides = [1, 1, 1]} : vector<3x64x64xbf16> to vector<1x64x64xbf16>
    %96 = vector.shape_cast %95 : vector<1x64x64xbf16> to vector<64x64xbf16>
    %cst_67 = arith.constant dense<0.000000e+00> : vector<64x256xf32>
    %97 = tpu.matmul %96, %90, %cst_67 {dimension_numbers = #tpu.dot_dimension_numbers<[1], [0], [0], [1], [0, 0, 1, 1], [], []>} : vector<64x64xbf16>, vector<64x256xbf16>, vector<64x256xf32> -> vector<64x256xf32>
    %98 = arith.addf %94, %97 : vector<64x256xf32>
    %99 = vector.extract_strided_slice %88 {offsets = [2, 0, 0], sizes = [1, 64, 64], strides = [1, 1, 1]} : vector<3x64x64xbf16> to vector<1x64x64xbf16>
    %100 = vector.shape_cast %99 : vector<1x64x64xbf16> to vector<64x64xbf16>
    %cst_68 = arith.constant dense<0.000000e+00> : vector<64x256xf32>
    %101 = tpu.matmul %100, %91, %cst_68 {dimension_numbers = #tpu.dot_dimension_numbers<[1], [0], [0], [1], [0, 0, 1, 1], [], []>} : vector<64x64xbf16>, vector<64x256xbf16>, vector<64x256xf32> -> vector<64x256xf32>
    %102 = arith.addf %98, %101 : vector<64x256xf32>
    %c2_69 = arith.constant 2 : index
    %c0_70 = arith.constant 0 : index
    %c0_71 = arith.constant 0 : index
    %103 = vector.load %arg5[%c2_69, %c0_70, %c0_71] : memref<8x64x1xf32, #tpu.memory_space<vmem>>, vector<1x64x1xf32>
    %104 = vector.shape_cast %103 : vector<1x64x1xf32> to vector<64x1xf32>
    %105 = vector.broadcast %104 : vector<64x1xf32> to vector<64x256xf32>
    %106 = arith.addf %102, %105 : vector<64x256xf32>
    %cst_72 = arith.constant 2.000000e-01 : f32
    %107 = vector.broadcast %cst_72 : f32 to vector<64x256xf32>
    %108 = arith.mulf %107, %106 : vector<64x256xf32>
    %109 = arith.maximumf %106, %108 : vector<64x256xf32>
    %110 = arith.truncf %109 : vector<64x256xf32> to vector<64x256xbf16>
    %c0_73 = arith.constant 0 : index
    %c128_74 = arith.constant 128 : index
    %111 = vector.load %arg10[%c0_73, %c128_74] : memref<64x512xbf16, #tpu.memory_space<vmem>>, vector<64x256xbf16>
    tpu.vector_store %arg10[%c0_73, %c128_74], %110 {strides = array<i32>} : memref<64x512xbf16, #tpu.memory_space<vmem>>, vector<64x256xbf16>,
    %c3 = arith.constant 3 : index
    %c0_75 = arith.constant 0 : index
    %c0_76 = arith.constant 0 : index
    %c0_77 = arith.constant 0 : index
    %112 = vector.load %arg4[%c3, %c0_75, %c0_76, %c0_77] : memref<8x3x64x64xbf16, #tpu.memory_space<vmem>>, vector<1x3x64x64xbf16>
    %113 = vector.shape_cast %112 : vector<1x3x64x64xbf16> to vector<3x64x64xbf16>
    %c0_78 = arith.constant 0 : index
    %c124 = arith.constant 124 : index
    %114 = vector.load %arg10[%c0_78, %c124] : memref<64x512xbf16, #tpu.memory_space<vmem>>, vector<64x256xbf16>
    %c0_79 = arith.constant 0 : index
    %c128_80 = arith.constant 128 : index
    %115 = vector.load %arg10[%c0_79, %c128_80] : memref<64x512xbf16, #tpu.memory_space<vmem>>, vector<64x256xbf16>
    %c0_81 = arith.constant 0 : index
    %c132 = arith.constant 132 : index
    %116 = vector.load %arg10[%c0_81, %c132] : memref<64x512xbf16, #tpu.memory_space<vmem>>, vector<64x256xbf16>
    %117 = vector.extract_strided_slice %113 {offsets = [0, 0, 0], sizes = [1, 64, 64], strides = [1, 1, 1]} : vector<3x64x64xbf16> to vector<1x64x64xbf16>
    %118 = vector.shape_cast %117 : vector<1x64x64xbf16> to vector<64x64xbf16>
    %cst_82 = arith.constant dense<0.000000e+00> : vector<64x256xf32>
    %119 = tpu.matmul %118, %114, %cst_82 {dimension_numbers = #tpu.dot_dimension_numbers<[1], [0], [0], [1], [0, 0, 1, 1], [], []>} : vector<64x64xbf16>, vector<64x256xbf16>, vector<64x256xf32> -> vector<64x256xf32>
    %120 = vector.extract_strided_slice %113 {offsets = [1, 0, 0], sizes = [1, 64, 64], strides = [1, 1, 1]} : vector<3x64x64xbf16> to vector<1x64x64xbf16>
    %121 = vector.shape_cast %120 : vector<1x64x64xbf16> to vector<64x64xbf16>
    %cst_83 = arith.constant dense<0.000000e+00> : vector<64x256xf32>
    %122 = tpu.matmul %121, %115, %cst_83 {dimension_numbers = #tpu.dot_dimension_numbers<[1], [0], [0], [1], [0, 0, 1, 1], [], []>} : vector<64x64xbf16>, vector<64x256xbf16>, vector<64x256xf32> -> vector<64x256xf32>
    %123 = arith.addf %119, %122 : vector<64x256xf32>
    %124 = vector.extract_strided_slice %113 {offsets = [2, 0, 0], sizes = [1, 64, 64], strides = [1, 1, 1]} : vector<3x64x64xbf16> to vector<1x64x64xbf16>
    %125 = vector.shape_cast %124 : vector<1x64x64xbf16> to vector<64x64xbf16>
    %cst_84 = arith.constant dense<0.000000e+00> : vector<64x256xf32>
    %126 = tpu.matmul %125, %116, %cst_84 {dimension_numbers = #tpu.dot_dimension_numbers<[1], [0], [0], [1], [0, 0, 1, 1], [], []>} : vector<64x64xbf16>, vector<64x256xbf16>, vector<64x256xf32> -> vector<64x256xf32>
    %127 = arith.addf %123, %126 : vector<64x256xf32>
    %c3_85 = arith.constant 3 : index
    %c0_86 = arith.constant 0 : index
    %c0_87 = arith.constant 0 : index
    %128 = vector.load %arg5[%c3_85, %c0_86, %c0_87] : memref<8x64x1xf32, #tpu.memory_space<vmem>>, vector<1x64x1xf32>
    %129 = vector.shape_cast %128 : vector<1x64x1xf32> to vector<64x1xf32>
    %130 = vector.broadcast %129 : vector<64x1xf32> to vector<64x256xf32>
    %131 = arith.addf %127, %130 : vector<64x256xf32>
    %cst_88 = arith.constant 2.000000e-01 : f32
    %132 = vector.broadcast %cst_88 : f32 to vector<64x256xf32>
    %133 = arith.mulf %132, %131 : vector<64x256xf32>
    %134 = arith.maximumf %131, %133 : vector<64x256xf32>
    %135 = arith.truncf %134 : vector<64x256xf32> to vector<64x256xbf16>
    %c0_89 = arith.constant 0 : index
    %c128_90 = arith.constant 128 : index
    %136 = vector.load %arg10[%c0_89, %c128_90] : memref<64x512xbf16, #tpu.memory_space<vmem>>, vector<64x256xbf16>
    tpu.vector_store %arg10[%c0_89, %c128_90], %135 {strides = array<i32>} : memref<64x512xbf16, #tpu.memory_space<vmem>>, vector<64x256xbf16>,
    %c4 = arith.constant 4 : index
    %c0_91 = arith.constant 0 : index
    %c0_92 = arith.constant 0 : index
    %c0_93 = arith.constant 0 : index
    %137 = vector.load %arg4[%c4, %c0_91, %c0_92, %c0_93] : memref<8x3x64x64xbf16, #tpu.memory_space<vmem>>, vector<1x3x64x64xbf16>
    %138 = vector.shape_cast %137 : vector<1x3x64x64xbf16> to vector<3x64x64xbf16>
    %c0_94 = arith.constant 0 : index
    %c123 = arith.constant 123 : index
    %139 = vector.load %arg10[%c0_94, %c123] : memref<64x512xbf16, #tpu.memory_space<vmem>>, vector<64x256xbf16>
    %c0_95 = arith.constant 0 : index
    %c128_96 = arith.constant 128 : index
    %140 = vector.load %arg10[%c0_95, %c128_96] : memref<64x512xbf16, #tpu.memory_space<vmem>>, vector<64x256xbf16>
    %c0_97 = arith.constant 0 : index
    %c133 = arith.constant 133 : index
    %141 = vector.load %arg10[%c0_97, %c133] : memref<64x512xbf16, #tpu.memory_space<vmem>>, vector<64x256xbf16>
    %142 = vector.extract_strided_slice %138 {offsets = [0, 0, 0], sizes = [1, 64, 64], strides = [1, 1, 1]} : vector<3x64x64xbf16> to vector<1x64x64xbf16>
    %143 = vector.shape_cast %142 : vector<1x64x64xbf16> to vector<64x64xbf16>
    %cst_98 = arith.constant dense<0.000000e+00> : vector<64x256xf32>
    %144 = tpu.matmul %143, %139, %cst_98 {dimension_numbers = #tpu.dot_dimension_numbers<[1], [0], [0], [1], [0, 0, 1, 1], [], []>} : vector<64x64xbf16>, vector<64x256xbf16>, vector<64x256xf32> -> vector<64x256xf32>
    %145 = vector.extract_strided_slice %138 {offsets = [1, 0, 0], sizes = [1, 64, 64], strides = [1, 1, 1]} : vector<3x64x64xbf16> to vector<1x64x64xbf16>
    %146 = vector.shape_cast %145 : vector<1x64x64xbf16> to vector<64x64xbf16>
    %cst_99 = arith.constant dense<0.000000e+00> : vector<64x256xf32>
    %147 = tpu.matmul %146, %140, %cst_99 {dimension_numbers = #tpu.dot_dimension_numbers<[1], [0], [0], [1], [0, 0, 1, 1], [], []>} : vector<64x64xbf16>, vector<64x256xbf16>, vector<64x256xf32> -> vector<64x256xf32>
    %148 = arith.addf %144, %147 : vector<64x256xf32>
    %149 = vector.extract_strided_slice %138 {offsets = [2, 0, 0], sizes = [1, 64, 64], strides = [1, 1, 1]} : vector<3x64x64xbf16> to vector<1x64x64xbf16>
    %150 = vector.shape_cast %149 : vector<1x64x64xbf16> to vector<64x64xbf16>
    %cst_100 = arith.constant dense<0.000000e+00> : vector<64x256xf32>
    %151 = tpu.matmul %150, %141, %cst_100 {dimension_numbers = #tpu.dot_dimension_numbers<[1], [0], [0], [1], [0, 0, 1, 1], [], []>} : vector<64x64xbf16>, vector<64x256xbf16>, vector<64x256xf32> -> vector<64x256xf32>
    %152 = arith.addf %148, %151 : vector<64x256xf32>
    %c4_101 = arith.constant 4 : index
    %c0_102 = arith.constant 0 : index
    %c0_103 = arith.constant 0 : index
    %153 = vector.load %arg5[%c4_101, %c0_102, %c0_103] : memref<8x64x1xf32, #tpu.memory_space<vmem>>, vector<1x64x1xf32>
    %154 = vector.shape_cast %153 : vector<1x64x1xf32> to vector<64x1xf32>
    %155 = vector.broadcast %154 : vector<64x1xf32> to vector<64x256xf32>
    %156 = arith.addf %152, %155 : vector<64x256xf32>
    %cst_104 = arith.constant 2.000000e-01 : f32
    %157 = vector.broadcast %cst_104 : f32 to vector<64x256xf32>
    %158 = arith.mulf %157, %156 : vector<64x256xf32>
    %159 = arith.maximumf %156, %158 : vector<64x256xf32>
    %160 = arith.truncf %159 : vector<64x256xf32> to vector<64x256xbf16>
    %c0_105 = arith.constant 0 : index
    %c128_106 = arith.constant 128 : index
    %161 = vector.load %arg10[%c0_105, %c128_106] : memref<64x512xbf16, #tpu.memory_space<vmem>>, vector<64x256xbf16>
    tpu.vector_store %arg10[%c0_105, %c128_106], %160 {strides = array<i32>} : memref<64x512xbf16, #tpu.memory_space<vmem>>, vector<64x256xbf16>,
    %c5 = arith.constant 5 : index
    %c0_107 = arith.constant 0 : index
    %c0_108 = arith.constant 0 : index
    %c0_109 = arith.constant 0 : index
    %162 = vector.load %arg4[%c5, %c0_107, %c0_108, %c0_109] : memref<8x3x64x64xbf16, #tpu.memory_space<vmem>>, vector<1x3x64x64xbf16>
    %163 = vector.shape_cast %162 : vector<1x3x64x64xbf16> to vector<3x64x64xbf16>
    %c0_110 = arith.constant 0 : index
    %c122 = arith.constant 122 : index
    %164 = vector.load %arg10[%c0_110, %c122] : memref<64x512xbf16, #tpu.memory_space<vmem>>, vector<64x256xbf16>
    %c0_111 = arith.constant 0 : index
    %c128_112 = arith.constant 128 : index
    %165 = vector.load %arg10[%c0_111, %c128_112] : memref<64x512xbf16, #tpu.memory_space<vmem>>, vector<64x256xbf16>
    %c0_113 = arith.constant 0 : index
    %c134 = arith.constant 134 : index
    %166 = vector.load %arg10[%c0_113, %c134] : memref<64x512xbf16, #tpu.memory_space<vmem>>, vector<64x256xbf16>
    %167 = vector.extract_strided_slice %163 {offsets = [0, 0, 0], sizes = [1, 64, 64], strides = [1, 1, 1]} : vector<3x64x64xbf16> to vector<1x64x64xbf16>
    %168 = vector.shape_cast %167 : vector<1x64x64xbf16> to vector<64x64xbf16>
    %cst_114 = arith.constant dense<0.000000e+00> : vector<64x256xf32>
    %169 = tpu.matmul %168, %164, %cst_114 {dimension_numbers = #tpu.dot_dimension_numbers<[1], [0], [0], [1], [0, 0, 1, 1], [], []>} : vector<64x64xbf16>, vector<64x256xbf16>, vector<64x256xf32> -> vector<64x256xf32>
    %170 = vector.extract_strided_slice %163 {offsets = [1, 0, 0], sizes = [1, 64, 64], strides = [1, 1, 1]} : vector<3x64x64xbf16> to vector<1x64x64xbf16>
    %171 = vector.shape_cast %170 : vector<1x64x64xbf16> to vector<64x64xbf16>
    %cst_115 = arith.constant dense<0.000000e+00> : vector<64x256xf32>
    %172 = tpu.matmul %171, %165, %cst_115 {dimension_numbers = #tpu.dot_dimension_numbers<[1], [0], [0], [1], [0, 0, 1, 1], [], []>} : vector<64x64xbf16>, vector<64x256xbf16>, vector<64x256xf32> -> vector<64x256xf32>
    %173 = arith.addf %169, %172 : vector<64x256xf32>
    %174 = vector.extract_strided_slice %163 {offsets = [2, 0, 0], sizes = [1, 64, 64], strides = [1, 1, 1]} : vector<3x64x64xbf16> to vector<1x64x64xbf16>
    %175 = vector.shape_cast %174 : vector<1x64x64xbf16> to vector<64x64xbf16>
    %cst_116 = arith.constant dense<0.000000e+00> : vector<64x256xf32>
    %176 = tpu.matmul %175, %166, %cst_116 {dimension_numbers = #tpu.dot_dimension_numbers<[1], [0], [0], [1], [0, 0, 1, 1], [], []>} : vector<64x64xbf16>, vector<64x256xbf16>, vector<64x256xf32> -> vector<64x256xf32>
    %177 = arith.addf %173, %176 : vector<64x256xf32>
    %c5_117 = arith.constant 5 : index
    %c0_118 = arith.constant 0 : index
    %c0_119 = arith.constant 0 : index
    %178 = vector.load %arg5[%c5_117, %c0_118, %c0_119] : memref<8x64x1xf32, #tpu.memory_space<vmem>>, vector<1x64x1xf32>
    %179 = vector.shape_cast %178 : vector<1x64x1xf32> to vector<64x1xf32>
    %180 = vector.broadcast %179 : vector<64x1xf32> to vector<64x256xf32>
    %181 = arith.addf %177, %180 : vector<64x256xf32>
    %cst_120 = arith.constant 2.000000e-01 : f32
    %182 = vector.broadcast %cst_120 : f32 to vector<64x256xf32>
    %183 = arith.mulf %182, %181 : vector<64x256xf32>
    %184 = arith.maximumf %181, %183 : vector<64x256xf32>
    %185 = arith.truncf %184 : vector<64x256xf32> to vector<64x256xbf16>
    %c0_121 = arith.constant 0 : index
    %c128_122 = arith.constant 128 : index
    %186 = vector.load %arg10[%c0_121, %c128_122] : memref<64x512xbf16, #tpu.memory_space<vmem>>, vector<64x256xbf16>
    tpu.vector_store %arg10[%c0_121, %c128_122], %185 {strides = array<i32>} : memref<64x512xbf16, #tpu.memory_space<vmem>>, vector<64x256xbf16>,
    %c6 = arith.constant 6 : index
    %c0_123 = arith.constant 0 : index
    %c0_124 = arith.constant 0 : index
    %c0_125 = arith.constant 0 : index
    %187 = vector.load %arg4[%c6, %c0_123, %c0_124, %c0_125] : memref<8x3x64x64xbf16, #tpu.memory_space<vmem>>, vector<1x3x64x64xbf16>
    %188 = vector.shape_cast %187 : vector<1x3x64x64xbf16> to vector<3x64x64xbf16>
    %c0_126 = arith.constant 0 : index
    %c121 = arith.constant 121 : index
    %189 = vector.load %arg10[%c0_126, %c121] : memref<64x512xbf16, #tpu.memory_space<vmem>>, vector<64x256xbf16>
    %c0_127 = arith.constant 0 : index
    %c128_128 = arith.constant 128 : index
    %190 = vector.load %arg10[%c0_127, %c128_128] : memref<64x512xbf16, #tpu.memory_space<vmem>>, vector<64x256xbf16>
    %c0_129 = arith.constant 0 : index
    %c135 = arith.constant 135 : index
    %191 = vector.load %arg10[%c0_129, %c135] : memref<64x512xbf16, #tpu.memory_space<vmem>>, vector<64x256xbf16>
    %192 = vector.extract_strided_slice %188 {offsets = [0, 0, 0], sizes = [1, 64, 64], strides = [1, 1, 1]} : vector<3x64x64xbf16> to vector<1x64x64xbf16>
    %193 = vector.shape_cast %192 : vector<1x64x64xbf16> to vector<64x64xbf16>
    %cst_130 = arith.constant dense<0.000000e+00> : vector<64x256xf32>
    %194 = tpu.matmul %193, %189, %cst_130 {dimension_numbers = #tpu.dot_dimension_numbers<[1], [0], [0], [1], [0, 0, 1, 1], [], []>} : vector<64x64xbf16>, vector<64x256xbf16>, vector<64x256xf32> -> vector<64x256xf32>
    %195 = vector.extract_strided_slice %188 {offsets = [1, 0, 0], sizes = [1, 64, 64], strides = [1, 1, 1]} : vector<3x64x64xbf16> to vector<1x64x64xbf16>
    %196 = vector.shape_cast %195 : vector<1x64x64xbf16> to vector<64x64xbf16>
    %cst_131 = arith.constant dense<0.000000e+00> : vector<64x256xf32>
    %197 = tpu.matmul %196, %190, %cst_131 {dimension_numbers = #tpu.dot_dimension_numbers<[1], [0], [0], [1], [0, 0, 1, 1], [], []>} : vector<64x64xbf16>, vector<64x256xbf16>, vector<64x256xf32> -> vector<64x256xf32>
    %198 = arith.addf %194, %197 : vector<64x256xf32>
    %199 = vector.extract_strided_slice %188 {offsets = [2, 0, 0], sizes = [1, 64, 64], strides = [1, 1, 1]} : vector<3x64x64xbf16> to vector<1x64x64xbf16>
    %200 = vector.shape_cast %199 : vector<1x64x64xbf16> to vector<64x64xbf16>
    %cst_132 = arith.constant dense<0.000000e+00> : vector<64x256xf32>
    %201 = tpu.matmul %200, %191, %cst_132 {dimension_numbers = #tpu.dot_dimension_numbers<[1], [0], [0], [1], [0, 0, 1, 1], [], []>} : vector<64x64xbf16>, vector<64x256xbf16>, vector<64x256xf32> -> vector<64x256xf32>
    %202 = arith.addf %198, %201 : vector<64x256xf32>
    %c6_133 = arith.constant 6 : index
    %c0_134 = arith.constant 0 : index
    %c0_135 = arith.constant 0 : index
    %203 = vector.load %arg5[%c6_133, %c0_134, %c0_135] : memref<8x64x1xf32, #tpu.memory_space<vmem>>, vector<1x64x1xf32>
    %204 = vector.shape_cast %203 : vector<1x64x1xf32> to vector<64x1xf32>
    %205 = vector.broadcast %204 : vector<64x1xf32> to vector<64x256xf32>
    %206 = arith.addf %202, %205 : vector<64x256xf32>
    %cst_136 = arith.constant 2.000000e-01 : f32
    %207 = vector.broadcast %cst_136 : f32 to vector<64x256xf32>
    %208 = arith.mulf %207, %206 : vector<64x256xf32>
    %209 = arith.maximumf %206, %208 : vector<64x256xf32>
    %210 = arith.truncf %209 : vector<64x256xf32> to vector<64x256xbf16>
    %c0_137 = arith.constant 0 : index
    %c128_138 = arith.constant 128 : index
    %211 = vector.load %arg10[%c0_137, %c128_138] : memref<64x512xbf16, #tpu.memory_space<vmem>>, vector<64x256xbf16>
    tpu.vector_store %arg10[%c0_137, %c128_138], %210 {strides = array<i32>} : memref<64x512xbf16, #tpu.memory_space<vmem>>, vector<64x256xbf16>,
    %c7 = arith.constant 7 : index
    %c0_139 = arith.constant 0 : index
    %c0_140 = arith.constant 0 : index
    %c0_141 = arith.constant 0 : index
    %212 = vector.load %arg4[%c7, %c0_139, %c0_140, %c0_141] : memref<8x3x64x64xbf16, #tpu.memory_space<vmem>>, vector<1x3x64x64xbf16>
    %213 = vector.shape_cast %212 : vector<1x3x64x64xbf16> to vector<3x64x64xbf16>
    %c0_142 = arith.constant 0 : index
    %c120 = arith.constant 120 : index
    %214 = vector.load %arg10[%c0_142, %c120] : memref<64x512xbf16, #tpu.memory_space<vmem>>, vector<64x256xbf16>
    %c0_143 = arith.constant 0 : index
    %c128_144 = arith.constant 128 : index
    %215 = vector.load %arg10[%c0_143, %c128_144] : memref<64x512xbf16, #tpu.memory_space<vmem>>, vector<64x256xbf16>
    %c0_145 = arith.constant 0 : index
    %c136 = arith.constant 136 : index
    %216 = vector.load %arg10[%c0_145, %c136] : memref<64x512xbf16, #tpu.memory_space<vmem>>, vector<64x256xbf16>
    %217 = vector.extract_strided_slice %213 {offsets = [0, 0, 0], sizes = [1, 64, 64], strides = [1, 1, 1]} : vector<3x64x64xbf16> to vector<1x64x64xbf16>
    %218 = vector.shape_cast %217 : vector<1x64x64xbf16> to vector<64x64xbf16>
    %cst_146 = arith.constant dense<0.000000e+00> : vector<64x256xf32>
    %219 = tpu.matmul %218, %214, %cst_146 {dimension_numbers = #tpu.dot_dimension_numbers<[1], [0], [0], [1], [0, 0, 1, 1], [], []>} : vector<64x64xbf16>, vector<64x256xbf16>, vector<64x256xf32> -> vector<64x256xf32>
    %220 = vector.extract_strided_slice %213 {offsets = [1, 0, 0], sizes = [1, 64, 64], strides = [1, 1, 1]} : vector<3x64x64xbf16> to vector<1x64x64xbf16>
    %221 = vector.shape_cast %220 : vector<1x64x64xbf16> to vector<64x64xbf16>
    %cst_147 = arith.constant dense<0.000000e+00> : vector<64x256xf32>
    %222 = tpu.matmul %221, %215, %cst_147 {dimension_numbers = #tpu.dot_dimension_numbers<[1], [0], [0], [1], [0, 0, 1, 1], [], []>} : vector<64x64xbf16>, vector<64x256xbf16>, vector<64x256xf32> -> vector<64x256xf32>
    %223 = arith.addf %219, %222 : vector<64x256xf32>
    %224 = vector.extract_strided_slice %213 {offsets = [2, 0, 0], sizes = [1, 64, 64], strides = [1, 1, 1]} : vector<3x64x64xbf16> to vector<1x64x64xbf16>
    %225 = vector.shape_cast %224 : vector<1x64x64xbf16> to vector<64x64xbf16>
    %cst_148 = arith.constant dense<0.000000e+00> : vector<64x256xf32>
    %226 = tpu.matmul %225, %216, %cst_148 {dimension_numbers = #tpu.dot_dimension_numbers<[1], [0], [0], [1], [0, 0, 1, 1], [], []>} : vector<64x64xbf16>, vector<64x256xbf16>, vector<64x256xf32> -> vector<64x256xf32>
    %227 = arith.addf %223, %226 : vector<64x256xf32>
    %c7_149 = arith.constant 7 : index
    %c0_150 = arith.constant 0 : index
    %c0_151 = arith.constant 0 : index
    %228 = vector.load %arg5[%c7_149, %c0_150, %c0_151] : memref<8x64x1xf32, #tpu.memory_space<vmem>>, vector<1x64x1xf32>
    %229 = vector.shape_cast %228 : vector<1x64x1xf32> to vector<64x1xf32>
    %230 = vector.broadcast %229 : vector<64x1xf32> to vector<64x256xf32>
    %231 = arith.addf %227, %230 : vector<64x256xf32>
    %cst_152 = arith.constant 2.000000e-01 : f32
    %232 = vector.broadcast %cst_152 : f32 to vector<64x256xf32>
    %233 = arith.mulf %232, %231 : vector<64x256xf32>
    %234 = arith.maximumf %231, %233 : vector<64x256xf32>
    %235 = arith.truncf %234 : vector<64x256xf32> to vector<64x256xbf16>
    %c0_153 = arith.constant 0 : index
    %c128_154 = arith.constant 128 : index
    %236 = vector.load %arg10[%c0_153, %c128_154] : memref<64x512xbf16, #tpu.memory_space<vmem>>, vector<64x256xbf16>
    tpu.vector_store %arg10[%c0_153, %c128_154], %235 {strides = array<i32>} : memref<64x512xbf16, #tpu.memory_space<vmem>>, vector<64x256xbf16>,
    %c0_155 = arith.constant 0 : index
    %c127_156 = arith.constant 127 : index
    %237 = vector.load %arg10[%c0_155, %c127_156] : memref<64x512xbf16, #tpu.memory_space<vmem>>, vector<64x256xbf16>
    %238 = arith.extf %237 : vector<64x256xbf16> to vector<64x256xf32>
    %c0_157 = arith.constant 0 : index
    %c128_158 = arith.constant 128 : index
    %239 = vector.load %arg10[%c0_157, %c128_158] : memref<64x512xbf16, #tpu.memory_space<vmem>>, vector<64x256xbf16>
    %240 = arith.extf %239 : vector<64x256xbf16> to vector<64x256xf32>
    %c0_159 = arith.constant 0 : index
    %c129_160 = arith.constant 129 : index
    %241 = vector.load %arg10[%c0_159, %c129_160] : memref<64x512xbf16, #tpu.memory_space<vmem>>, vector<64x256xbf16>
    %242 = arith.extf %241 : vector<64x256xbf16> to vector<64x256xf32>
    %c0_161 = arith.constant 0 : index
    %c0_162 = arith.constant 0 : index
    %243 = vector.load %arg6[%c0_161, %c0_162] : memref<64x3xf32, #tpu.memory_space<vmem>>, vector<64x3xf32>
    %244 = vector.extract_strided_slice %243 {offsets = [0, 0], sizes = [64, 1], strides = [1, 1]} : vector<64x3xf32> to vector<64x1xf32>
    %245 = vector.broadcast %244 : vector<64x1xf32> to vector<64x256xf32>
    %246 = arith.mulf %245, %238 : vector<64x256xf32>
    %247 = vector.extract_strided_slice %243 {offsets = [0, 1], sizes = [64, 1], strides = [1, 1]} : vector<64x3xf32> to vector<64x1xf32>
    %248 = vector.broadcast %247 : vector<64x1xf32> to vector<64x256xf32>
    %249 = arith.mulf %248, %240 : vector<64x256xf32>
    %250 = arith.addf %246, %249 : vector<64x256xf32>
    %251 = vector.extract_strided_slice %243 {offsets = [0, 2], sizes = [64, 1], strides = [1, 1]} : vector<64x3xf32> to vector<64x1xf32>
    %252 = vector.broadcast %251 : vector<64x1xf32> to vector<64x256xf32>
    %253 = arith.mulf %252, %242 : vector<64x256xf32>
    %254 = arith.addf %250, %253 : vector<64x256xf32>
    %cst_163 = arith.constant dense<0.000000e+00> : vector<256xf32>
    %255 = vector.multi_reduction <add>, %254, %cst_163 [0] : vector<64x256xf32> to vector<256xf32>
    %256 = vector.shape_cast %255 : vector<256xf32> to vector<1x256xf32>
    %c0_164 = arith.constant 0 : index
    %c0_165 = arith.constant 0 : index
    %257 = vector.load %arg7[%c0_164, %c0_165] : memref<1x1xf32, #tpu.memory_space<vmem>>, vector<1x1xf32>
    %258 = vector.broadcast %257 : vector<1x1xf32> to vector<1x256xf32>
    %259 = arith.addf %256, %258 : vector<1x256xf32>
    %c0_166 = arith.constant 0 : index
    %c0_167 = arith.constant 0 : index
    %c0_168 = arith.constant 0 : index
    %260 = vector.load %arg8[%c0_166, %c0_167, %c0_168] : memref<1x1x256xf32, #tpu.memory_space<vmem>>, vector<1x1x256xf32>
    %261 = vector.shape_cast %260 : vector<1x1x256xf32> to vector<1x256xf32>
    %262 = vector.shape_cast %259 : vector<1x256xf32> to vector<1x1x256xf32>
    tpu.vector_store %arg8[%c0_166, %c0_167, %c0_168], %262 {strides = array<i32>} : memref<1x1x256xf32, #tpu.memory_space<vmem>>, vector<1x1x256xf32>,
    return
  }
  func.func @transform_0(%arg0: i32) -> (i32, i32, i32) {
    %c0_i32 = arith.constant 0 : i32
    %c0_i32_0 = arith.constant 0 : i32
    %c0_i32_1 = arith.constant 0 : i32
    return %arg0, %c0_i32, %c0_i32_0 : i32, i32, i32
  }
  func.func @transform_1(%arg0: i32) -> (i32, i32) {
    %c0_i32 = arith.constant 0 : i32
    %c0_i32_0 = arith.constant 0 : i32
    %c0_i32_1 = arith.constant 0 : i32
    return %c0_i32, %c0_i32_0 : i32, i32
  }
  func.func @transform_2(%arg0: i32) -> (i32, i32) {
    %c0_i32 = arith.constant 0 : i32
    %c0_i32_0 = arith.constant 0 : i32
    %c0_i32_1 = arith.constant 0 : i32
    return %c0_i32, %c0_i32_0 : i32, i32
  }
  func.func @transform_3(%arg0: i32) -> (i32, i32, i32, i32) {
    %c0_i32 = arith.constant 0 : i32
    %c0_i32_0 = arith.constant 0 : i32
    %c0_i32_1 = arith.constant 0 : i32
    %c0_i32_2 = arith.constant 0 : i32
    %c0_i32_3 = arith.constant 0 : i32
    return %c0_i32, %c0_i32_0, %c0_i32_1, %c0_i32_2 : i32, i32, i32, i32
  }
  func.func @transform_4(%arg0: i32) -> (i32, i32, i32) {
    %c0_i32 = arith.constant 0 : i32
    %c0_i32_0 = arith.constant 0 : i32
    %c0_i32_1 = arith.constant 0 : i32
    %c0_i32_2 = arith.constant 0 : i32
    return %c0_i32, %c0_i32_0, %c0_i32_1 : i32, i32, i32
  }
  func.func @transform_5(%arg0: i32) -> (i32, i32) {
    %c0_i32 = arith.constant 0 : i32
    %c0_i32_0 = arith.constant 0 : i32
    %c0_i32_1 = arith.constant 0 : i32
    return %c0_i32, %c0_i32_0 : i32, i32
  }
  func.func @transform_6(%arg0: i32) -> (i32, i32) {
    %c0_i32 = arith.constant 0 : i32
    %c0_i32_0 = arith.constant 0 : i32
    %c0_i32_1 = arith.constant 0 : i32
    return %c0_i32, %c0_i32_0 : i32, i32
  }
  func.func @transform_7(%arg0: i32) -> (i32, i32, i32) {
    %c0_i32 = arith.constant 0 : i32
    %c0_i32_0 = arith.constant 0 : i32
    %c0_i32_1 = arith.constant 0 : i32
    return %arg0, %c0_i32, %c0_i32_0 : i32, i32, i32
  }
}

</mosaic_0001>

<bundles_post_ra>
// kernel: tpu_custom_call.1
= control target key start
LH: loop header
LB: loop body
LE: loop exit
PB: predicated region body
PF: predicated region fallthrough
CT: control target
= control target key end

     0   :  { %s8936_s0 = inlined_call_operand.vmem [shape: f32[2,1,256], index: 0, kind: input, shape index: {}]   ;;  %s8937_s1 = inlined_call_operand.vmem [shape: f32[64,3], index: 1, kind: input, shape index: {}]   ;;  %s8938_s2 = inlined_call_operand.vmem [shape: f32[64,1], index: 2, kind: input, shape index: {}]   ;;  %s8939_s3 = inlined_call_operand.hbm [shape: bf16[8,3,64,64], index: 3, kind: input, shape index: {}]   ;;  %s8940_s4 = inlined_call_operand.vmem [shape: f32[8,64,1], index: 4, kind: input, shape index: {}]   ;;  %s8941_s5 = inlined_call_operand.vmem [shape: f32[64,3], index: 5, kind: input, shape index: {}]   ;;  %s8942_s6 = inlined_call_operand.<no memory space> [shape: f32[1,1], index: 6, kind: input, shape index: {}]   ;;  %s8943_s7 = inlined_call_operand.hbm [shape: f32[2,1,256], index: 7, kind: output, shape index: {}]  }
   0x1   :  { %v12_v0 = vstv %s8942_s6 }
   0x2   :  { %13 = vst [vmem:[#allocation4] sm:$0x1] %v12_v0 }
   0x3   :  { %14 = vsyncpa [#allocation6], 0 }
   0x4   :  { %15 = vsyncpa [#allocation7], 0 }
   0x5   :  { %17 = vsyncpa [#allocation7 + $0x1], 0  ;;  %s7383_s26 = smov 0   ;;  %s7385_s27 = smov 0  }
   0x6   :  { %s7387_s28 = smov 0   ;;  %s7389_s29 = smov 0  }
   0x7 LB: > { %s7404_s6 = sadd.s32 4294967295, %s7313_s29   ;;  %s6433_s30 = sadd.s32 4294967294, %s7313_s29   ;;  %s7313_s29 = sphi %s7389_s29, %s8961_s29   ;;  %s7309_s28 = sphi %s7387_s28, %s8960_s28   ;;  %s7305_s27 = sphi %s7385_s27, %s8959_s27   ;;  %s7301_s26 = sphi %s7383_s26, %s8958_s26  }
   0x8   : > { %s7408_s8 = sadd.s32 1, %s7313_s29   ;;  %s182_s9 = sadd.s32 1, %s7309_s28 }
   0x9   : > { %s179_s10 = ssub.s32 %s7313_s29, %s7408_s8  ;;  %p192_p0 = scmp.ne.s32.totalorder %s7309_s28, %s7305_s27 }
   0xa   : > { %p180_p1 = scmp.eq.s32.totalorder %s179_s10, 0  ;;  %p193_p2 = scmp.eq.s32.totalorder %s7404_s6, 1 }
   0xb   : > { %p198_p3 = scmp.ne.s32.totalorder %s7305_s27, %s7301_s26  ;;  %p199_p4 = scmp.eq.s32.totalorder %s6433_s30, 1 }
   0xc   : > { %s7419_s11 = scalar_select %p180_p1, %s7309_s28, %s182_s9  }
   0xd   : > { %p7421_p5 = por %p193_p2, %p192_p0  ;;  %p7425_p6 = por %p199_p4, %p198_p3 }
   0xe   : > { %p6434_p7 = scmp.ge.s32.totalorder %s7313_s29, 1  ;;  %p206_p8 = scmp.lt.s32.totalorder %s7313_s29, 3 }
   0xf   : > { %s8947_s12 = scalar_select %p7421_p5, 1, 0 }
  0x10   : > { %s8948_s13 = scalar_select %p7425_p6, 1, 0 }
  0x11   : > { %p8944_p9 = scmp.eq.s32.totalorder %s7404_s6, 0  ;;  %p7432_p10 = pnand %p6434_p7, %p206_p8 }
  0x12   : > { %s7315_s15 = smov [#allocation5]   ;;  %s7219_s20 = scalar_lea.hbm %s8939_s3, 12288 }
  0x13   : > { %s8949_s14 = scalar_select %p7432_p10, 1, 0 }
  0x14   : > { %s224_s16 = sshll.u32 %s7315_s15, 4  ;;  %p6957_p11 = pneg %p7432_p10  ;;  %s225_s16 = int_to_ptr.vmem [resolvable:$true] %s224_s16 }
  0x15   : > { %p7220_p13 = scmp.ne.s32.totalorder %s8939_s3, %s7219_s20  ;;  %p7226_p3 = scmp.lt.u32.totalorder %s7219_s20, %s8939_s3 }
  0x16   : > { %p7440_p12 = pnand %p8944_p9, %p6957_p11 }
  0x18   : > { %p7221_p0 = pneg %p7440_p12 }
  0x1a   : > { %p7222_p1 = pnand %p7221_p0, %p7220_p13 }
  0x1c   : > { %p7223_p2 = pneg %p7222_p1 }
  0x1e   : > { %p7228_p4 = pnand %p7226_p3, %p7223_p2 }
  0x20   : > { %7231 = shalt.err (!%p7228_p4)
}
  0x21   : > { %s7232_s25 = scalar_lea.vmem %s225_s16, 12288  ;;  %p7240_p9 = scmp.lt.s32.totalorder %s225_s16, %s225_s16 }
  0x22   : > { %p7233_p7 = scmp.ne.s32.totalorder %s225_s16, %s7232_s25  ;;  %p7241_p6 = scmp.lt.s32.totalorder %s7232_s25, %s7232_s25 }
  0x24   : > { %p7235_p8 = pnand %p7233_p7, %p7221_p0  ;;  %p7242_p5 = por %p7241_p6, %p7240_p9 }
  0x26   : > { %p7236_p11 = pneg %p7235_p8 }
  0x28   : > { %p7243_p10 = pnand %p7242_p5, %p7236_p11 }
  0x2a   : > { %7246 = shalt.err (!%p7243_p10)
}
  0x2b   : > { %s7316_s30 = smov 64   ;;  %s7317_s9 = smov 4  }
  0x2c   : > { %6960 = dma.hbm_to_vmem [thread:$0]  (!%p7440_p12), %s8939_s3, 12288, %s225_s16, [#allocation6], %s7316_s30, %s7316_s30, %s7317_s9  }
  0x2d   : > { %p8951_p13 = scmp.ne.s32.totalorder %s8949_s14, 0 }
  0x2e   : > { %p8952_p1 = scmp.eq.s32.totalorder (!%p8951_p13), %s7404_s6, 0 }
  0x2f   : > { %256 = sbr.rel (%p8951_p13) target bundleno = 4035 (0xfc3), region = 48 }
  0x36   : > { %7292 = dma.done.wait (%p8952_p1), [#allocation6], 12288   ;;  %p8953_p0 = pmov %p8952_p1 }
  0x37   : > { %p287_p5 = scmp.lt.s32.totalorder %s7404_s6, 1  ;;  %v292_v1 = vlaneseq  ;;  %v7318_v2 = vmov 1   ;;  %v7319_v3 = vmov 2   ;;  %v7320_v4 = vmov 0   ;;  %v313_v6 = vld [vmem:[%s8937_s1] sm:$0xff]  ;;  %v314_v7 = vld [vmem:[%s8937_s1 + $0x8] sm:$0xff] }
  0x38   : > { %7294 = vsyncadd (%p8953_p0), [#allocation6], 4294955008  ;;  %7024 = vset.pattern.permute.xlu0 %v7318_v2  ;;  %7025 = vset.pattern.permute.xlu1 %v7319_v3  ;;  %v7321_v5 = vmov 0.0   ;;  %v315_v9 = vld [vmem:[%s8937_s1 + $0x10] sm:$0xff]  ;;  %v316_v10 = vld [vmem:[%s8937_s1 + $0x18] sm:$0xff]  ;;  %s7322_s22 = smov 127  }
  0x39   : > { %s288_s16 = scalar_select %p287_p5, %s7404_s6, 1  ;;  %vm294_vm0 = vcmp.lt.s32.totalorder %v292_v1, 128  ;;  %1080 = vmatprep.mubr.bf16.mxu0 %v7320_v4  ;;  %1677 = vmatprep.mubr.bf16.mxu1 %v7320_v4  ;;  %vm7483_vm1 = vcmp.lt.s32.totalorder %v292_v1, 256  ;;  %v318_v12 = vld [vmem:[%s8937_s1 + $0x28] sm:$0xff]  ;;  %v319_v13 = vld [vmem:[%s8937_s1 + $0x30] sm:$0xff]  ;;  %v317_v14 = vld [vmem:[%s8937_s1 + $0x20] sm:$0xff] }
  0x3a   : > { %296 = vst.msk [vmem:[#allocation2] sm:$0x1] %vm294_vm0, %v7321_v5  ;;  %297 = vst.msk [vmem:[#allocation2 + $0x3] sm:$0x1] %vm294_vm0, %v7321_v5  ;;  %402 = vperm.xlu0 %7024, %v313_v6   ;;  %566 = vperm.xlu1 %7025, %v313_v6   ;;  %v320_v15 = vld [vmem:[%s8937_s1 + $0x38] sm:$0xff]  ;;  %v774_v16 = vld [vmem:[%s8938_s2] sm:$0xff] }
  0x3b   : > { %s6440_s14 = sshll.u32 %s288_s16, 1  ;;  %v776_v17 = vld [vmem:[%s8938_s2 + $0x10] sm:$0xff]  ;;  %v778_v18 = vld [vmem:[%s8938_s2 + $0x20] sm:$0xff]  ;;  %v775_v20 = vld [vmem:[%s8938_s2 + $0x8] sm:$0xff]  ;;  %v7541_v24 = vshrl.u32 %v292_v1, 7  ;;  %vm709_vm2 = vcmask 1031168  }
  0x3c   : > { %s290_s23 = scalar_lea.vmem %s8936_s0, %s6440_s14  ;;  %v780_v19 = vld [vmem:[%s8938_s2 + $0x30] sm:$0xff]  ;;  %v777_v21 = vld [vmem:[%s8938_s2 + $0x18] sm:$0xff]  ;;  %v779_v22 = vld [vmem:[%s8938_s2 + $0x28] sm:$0xff]  ;;  %s7324_s24 = smov 1   ;;  %vm508_vm3 = vcmask 1039360   ;;  %vm942_vm4 = vcmask 7168  }
  0x3d   : > { %v306_v11 = vld [vmem:[%s290_s23] sm:$0x3]  ;;  %v781_v23 = vld [vmem:[%s8938_s2 + $0x38] sm:$0xff]  ;;  %v7544_v25 = vsub.s32 0, %v7541_v24  ;;  %v7547_v26 = vsub.s32 1, %v7541_v24  ;;  %v372_v40 = vsub.s32 2, %v7541_v24 }
  0x3e   : > { %406 = vperm.xlu0 %7024, %v314_v7   ;;  %570 = vperm.xlu1 %7025, %v314_v7   ;;  %309 = vst.msk [vmem:[#allocation2 + $0x1] sm:$0x3] %vm7483_vm1, %v306_v11  ;;  %s7323_s23 = smov 126   ;;  %vm1035_vm5 = vcmask 523264   ;;  %s7325_s15 = smov 2   ;;  %vm1774_vm6 = vcmask 15360  }
  0x3f   : > { %s7326_s19 = smov 3   ;;  %s7327_s20 = smov 125   ;;  %vm2373_vm7 = vcmask 23552   ;;  %vm2531_vm8 = vcmask 1022976   ;;  %vm2972_vm9 = vcmask 31744   ;;  %vm3130_vm10 = vcmask 1014784  }
  0x40   : > { %s7328_s10 = smov 4   ;;  %vm3571_vm11 = vcmask 39936   ;;  %vm3729_vm12 = vcmask 1006592   ;;  %vm4170_vm13 = vcmask 48128   ;;  %vm4328_vm14 = vcmask 998400   ;;  %s6694_s30 = sshll.u32 %s7404_s6, 5 }
  0x41   : > { %vm4769_vm15 = vcmask 56320   ;;  %vm4927_vm0 = vcmask 990208   ;;  %s8891_s14 = scalar_lea.hbm %s8943_s7, %s6694_s30  ;;  %p8956_p9 = scmp.ne.s32.totalorder %s8947_s12, 0 }
  0x42   : > { %410 = vperm.xlu0 %7024, %v315_v9   ;;  %7026 = vset.pattern.permute.xlu1 %v7318_v2  ;;  %s7339_s17 = smov [#allocation8]  }
  0x43   : > { %414 = vperm.xlu1 %7026, %v316_v10   ;;  %s7251_s18 = sshll.u32 %s7339_s17, 4  ;;  %s7252_s18 = int_to_ptr.vmem [resolvable:$false] %s7251_s18 }
  0x45   : > { %v311_v27 = vld [vmem:[#allocation2 + $0x1] sm:$0x3] }
  0x46   : > { %422 = vperm.xlu0 %7024, %v318_v12   ;;  %v7550_v28 = vrot.slane %v311_v27, %v7544_v25  ;;  %v7553_v29 = vrot.slane %v311_v27, %v7547_v26  ;;  %v312_v31 = vld [vmem:[#allocation2 + $0x1] sm:$0x7] }
  0x47   : > { %7027 = vset.pattern.permute.xlu1 %v7319_v3  ;;  %v7560_v34 = vrot.slane %v312_v31, %v7547_v26  ;;  %v7563_v35 = vrot.slane %v312_v31, %v7544_v25  ;;  %v7574_v43 = vrot.slane %v312_v31, %v372_v40 }
  0x48   : > { %578 = vperm.xlu1 %7027, %v316_v10  }
  0x4a   : > { %426 = vperm.xlu0 %7024, %v319_v13  }
  0x4c   : > { %7028 = vset.pattern.permute.xlu1 %v7318_v2 }
  0x4d   : > { %418 = vperm.xlu1 %7028, %v317_v14  }
  0x4e   : > { %7030 = vset.pattern.permute.xlu0 %v7319_v3 }
  0x4f   : > { %574 = vperm.xlu0 %7030, %v315_v9  }
  0x51   : > { %7029 = vset.pattern.permute.xlu1 %v7319_v3 }
  0x52   : > { %582 = vperm.xlu1 %7029, %v317_v14  }
  0x53   : > { %590 = vperm.xlu0 %7030, %v319_v13  }
  0x56   : > { %586 = vperm.xlu1 %7029, %v318_v12  }
  0x57   : > { %7034 = vset.pattern.permute.xlu0 %v7320_v4 }
  0x58   : > { %328 = vperm.xlu0 %7034, %v314_v7  }
  0x5a   : > { %7031 = vset.pattern.permute.xlu1 %v7318_v2 }
  0x5b   : > { %430 = vperm.xlu1 %7031, %v320_v15  }
  0x5c   : > { %784 = vperm.xlu0 %7034, %v774_v16  }
  0x5f   : > { %7032 = vset.pattern.permute.xlu1 %v7319_v3 }
  0x60   : > { %594 = vperm.xlu1 %7032, %v320_v15   ;;  %343 = vperm.xlu0 %7034, %v317_v14  }
  0x64   : > { %7033 = vset.pattern.permute.xlu1 %v7320_v4  ;;  %794 = vperm.xlu0 %7034, %v776_v17  }
  0x65   : > { %323 = vperm.xlu1 %7033, %v313_v6  }
  0x68   : > { %353 = vperm.xlu0 %7034, %v319_v13  }
  0x69   : > { %333 = vperm.xlu1 %7033, %v315_v9  }
  0x6c   : > { %804 = vperm.xlu0 %7034, %v778_v18  }
  0x6d   : > { %338 = vperm.xlu1 %7033, %v316_v10  }
  0x70   : > { %814 = vperm.xlu0 %7034, %v780_v19  }
  0x71   : > { %789 = vperm.xlu1 %7033, %v775_v20  }
  0x75   : > { %348 = vperm.xlu1 %7033, %v318_v12  }
  0x79   : > { %799 = vperm.xlu1 %7033, %v777_v21  }
  0x7d   : > { %358 = vperm.xlu1 %7033, %v320_v15  }
  0x81   : > { %809 = vperm.xlu1 %7033, %v779_v22  }
  0x85   : > { %819 = vperm.xlu1 %7033, %v781_v23  }
  0xb9   : > { %v403_v30 = vpop.permute.xlu0 %402  ;;  %v567_v36 = vpop.permute.xlu1 %566 }
  0xba   : > { %v444_v32 = vmul.f32 %v7550_v28, %v403_v30  ;;  %v445_v33 = vmul.f32 %v7553_v29, %v403_v30  ;;  %v614_v41 = vmul.f32 %v7560_v34, %v567_v36  ;;  %v613_v42 = vmul.f32 %v7563_v35, %v567_v36 }
  0xbb   : > { %v615_v47 = vmul.f32 %v7574_v43, %v567_v36 }
  0xbc   : > { %478 = vrot.lane.b32.xlu1 %v445_v33, %s7322_s22  ;;  %476 = vrot.lane.b32.xlu0 %v444_v32, %s7322_s22 }
  0xbd   : > { %v407_v37 = vpop.permute.xlu0 %406  ;;  %v571_v44 = vpop.permute.xlu1 %570 }
  0xbe   : > { %v446_v38 = vmul.f32 %v7550_v28, %v407_v37  ;;  %v447_v39 = vmul.f32 %v7553_v29, %v407_v37  ;;  %v616_v46 = vmul.f32 %v7563_v35, %v571_v44  ;;  %v618_v49 = vmul.f32 %v7574_v43, %v571_v44 }
  0xbf   : > { %v617_v50 = vmul.f32 %v7560_v34, %v571_v44 }
  0xc0   : > { %482 = vrot.lane.b32.xlu1 %v447_v39, %s7322_s22  ;;  %480 = vrot.lane.b32.xlu0 %v446_v38, %s7322_s22 }
  0xc1   : > { %v411_v45 = vpop.permute.xlu0 %410 }
  0xc2   : > { %v448_v51 = vmul.f32 %v7550_v28, %v411_v45  ;;  %v449_v52 = vmul.f32 %v7553_v29, %v411_v45  ;;  %v415_v54 = vpop.permute.xlu1 %414 }
  0xc3   : > { %v450_v55 = vmul.f32 %v7550_v28, %v415_v54  ;;  %v451_v56 = vmul.f32 %v7553_v29, %v415_v54 }
  0xc4   : > { %663 = vrot.lane.b32.xlu1 %v614_v41, %s7323_s23  ;;  %661 = vrot.lane.b32.xlu0 %v613_v42, %s7323_s23 }
  0xc5   : > { %v423_v48 = vpop.permute.xlu0 %422 }
  0xc6   : > { %v454_v9 = vmul.f32 %v7550_v28, %v423_v48  ;;  %v455_v10 = vmul.f32 %v7553_v29, %v423_v48 }
  0xc7   : > { %v579_v60 = vpop.permute.xlu1 %578 }
  0xc8   : > { %667 = vrot.lane.b32.xlu1 %v616_v46, %s7323_s23  ;;  %665 = vrot.lane.b32.xlu0 %v615_v47, %s7323_s23  ;;  %v622_v61 = vmul.f32 %v7563_v35, %v579_v60  ;;  %v624_v0 = vmul.f32 %v7574_v43, %v579_v60  ;;  %v623_v1 = vmul.f32 %v7560_v34, %v579_v60 }
  0xc9   : > { %v427_v53 = vpop.permute.xlu0 %426 }
  0xca   : > { %v456_v20 = vmul.f32 %v7550_v28, %v427_v53  ;;  %v457_v21 = vmul.f32 %v7553_v29, %v427_v53 }
  0xcc   : > { %671 = vrot.lane.b32.xlu1 %v618_v49, %s7323_s23  ;;  %669 = vrot.lane.b32.xlu0 %v617_v50, %s7323_s23  ;;  %v419_v63 = vpop.permute.xlu1 %418 }
  0xcd   : > { %v452_v5 = vmul.f32 %v7550_v28, %v419_v63  ;;  %v453_v6 = vmul.f32 %v7553_v29, %v419_v63 }
  0xce   : > { %v575_v57 = vpop.permute.xlu0 %574 }
  0xcf   : > { %v620_v58 = vmul.f32 %v7560_v34, %v575_v57  ;;  %v619_v59 = vmul.f32 %v7563_v35, %v575_v57  ;;  %v621_v62 = vmul.f32 %v7574_v43, %v575_v57 }
  0xd0   : > { %486 = vrot.lane.b32.xlu1 %v449_v52, %s7322_s22  ;;  %484 = vrot.lane.b32.xlu0 %v448_v51, %s7322_s22  ;;  %v310_v51 = vld [vmem:[#allocation2] sm:$0x7] }
  0xd1   : > { %v583_v7 = vpop.permute.xlu1 %582  ;;  %v7679_v54 = vrot.slane %v310_v51, %v7544_v25 }
  0xd2   : > { %v626_v12 = vmul.f32 %v7560_v34, %v583_v7  ;;  %v625_v13 = vmul.f32 %v7563_v35, %v583_v7  ;;  %v627_v16 = vmul.f32 %v7574_v43, %v583_v7  ;;  %v591_v30 = vpop.permute.xlu0 %590 }
  0xd3   : > { %v632_v31 = vmul.f32 %v7560_v34, %v591_v30  ;;  %v631_v32 = vmul.f32 %v7563_v35, %v591_v30 }
  0xd4   : > { %490 = vrot.lane.b32.xlu1 %v451_v56, %s7322_s22  ;;  %488 = vrot.lane.b32.xlu0 %v450_v55, %s7322_s22 }
  0xd5   : > { %v587_v11 = vpop.permute.xlu1 %586 }
  0xd6   : > { %v628_v15 = vmul.f32 %v7563_v35, %v587_v11  ;;  %v630_v17 = vmul.f32 %v7574_v43, %v587_v11  ;;  %v629_v18 = vmul.f32 %v7560_v34, %v587_v11 }
  0xd7   : > { %v7648_v37 = vpop.permute.xlu0 %328 }
  0xd8   : > { %675 = vrot.lane.b32.xlu1 %v620_v58, %s7323_s23  ;;  %673 = vrot.lane.b32.xlu0 %v619_v59, %s7323_s23  ;;  %v7685_v58 = vrot.slane %v310_v51, %v372_v40 }
  0xda   : > { %v431_v14 = vpop.permute.xlu1 %430  ;;  %v382_v11 = vmul.f32 %v7685_v58, %v7648_v37 }
  0xdb   : > { %v458_v22 = vmul.f32 %v7550_v28, %v431_v14  ;;  %v459_v23 = vmul.f32 %v7553_v29, %v431_v14  ;;  %v633_v29 = vmul.f32 %v7574_v43, %v591_v30 }
  0xdc   : > { %679 = vrot.lane.b32.xlu1 %v622_v61, %s7323_s23  ;;  %677 = vrot.lane.b32.xlu0 %v621_v62, %s7323_s23  ;;  %v380_v62 = vmul.f32 %v7679_v54, %v7648_v37 }
  0xdf   : > { %v595_v19 = vpop.permute.xlu1 %594 }
  0xe0   : > { %683 = vrot.lane.b32.xlu1 %v624_v0, %s7323_s23  ;;  %681 = vrot.lane.b32.xlu0 %v623_v1, %s7323_s23  ;;  %v634_v28 = vmul.f32 %v7563_v35, %v595_v19  ;;  %v636_v38 = vmul.f32 %v7574_v43, %v595_v19  ;;  %v635_v39 = vmul.f32 %v7560_v34, %v595_v19  ;;  %v7656_v35 = vpop.permute.xlu0 %784 }
  0xe4   : > { %494 = vrot.lane.b32.xlu1 %v453_v6, %s7322_s22  ;;  %492 = vrot.lane.b32.xlu0 %v452_v5, %s7322_s22  ;;  %v7632_v27 = vpop.permute.xlu1 %323  ;;  %v7660_v44 = vpop.permute.xlu0 %343 }
  0xe5   : > { %v377_v57 = vmul.f32 %v7679_v54, %v7632_v27  ;;  %v379_v0 = vmul.f32 %v7685_v58, %v7632_v27 }
  0xe8   : > { %498 = vrot.lane.b32.xlu1 %v455_v10, %s7322_s22  ;;  %496 = vrot.lane.b32.xlu0 %v454_v9, %s7322_s22  ;;  %v7638_v33 = vpop.permute.xlu1 %333  ;;  %v7664_v46 = vpop.permute.xlu0 %794 }
  0xec   : > { %687 = vrot.lane.b32.xlu1 %v626_v12, %s7323_s23  ;;  %685 = vrot.lane.b32.xlu0 %v625_v13, %s7323_s23  ;;  %v7646_v36 = vpop.permute.xlu1 %338  ;;  %v7668_v43 = vpop.permute.xlu0 %353 }
  0xf0   : > { %691 = vrot.lane.b32.xlu1 %v628_v15, %s7323_s23  ;;  %689 = vrot.lane.b32.xlu0 %v627_v16, %s7323_s23  ;;  %v7654_v41 = vpop.permute.xlu1 %789  ;;  %v7672_v48 = vpop.permute.xlu0 %804 }
  0xf4   : > { %695 = vrot.lane.b32.xlu1 %v630_v17, %s7323_s23  ;;  %693 = vrot.lane.b32.xlu0 %v629_v18, %s7323_s23  ;;  %v7658_v42 = vpop.permute.xlu1 %348  ;;  %v7676_v50 = vpop.permute.xlu0 %814 }
  0xf8   : > { %502 = vrot.lane.b32.xlu1 %v457_v21, %s7322_s22  ;;  %500 = vrot.lane.b32.xlu0 %v456_v20, %s7322_s22  ;;  %v7662_v45 = vpop.permute.xlu1 %799 }
  0xfc   : > { %506 = vrot.lane.b32.xlu1 %v459_v23, %s7322_s22  ;;  %504 = vrot.lane.b32.xlu0 %v458_v22, %s7322_s22  ;;  %v7666_v47 = vpop.permute.xlu1 %358 }
 0x100   : > { %699 = vrot.lane.b32.xlu1 %v632_v31, %s7323_s23  ;;  %697 = vrot.lane.b32.xlu0 %v631_v32, %s7323_s23  ;;  %v7670_v34 = vpop.permute.xlu1 %809 }
 0x104   : > { %703 = vrot.lane.b32.xlu1 %v634_v28, %s7323_s23  ;;  %701 = vrot.lane.b32.xlu0 %v633_v29, %s7323_s23  ;;  %v7674_v49 = vpop.permute.xlu1 %819 }
 0x108   : > { %707 = vrot.lane.b32.xlu1 %v636_v38, %s7323_s23  ;;  %705 = vrot.lane.b32.xlu0 %v635_v39, %s7323_s23 }
 0x12e   : > { %v479_v52 = vpop.permute.xlu1 %478  ;;  %v477_v53 = vpop.permute.xlu0 %476 }
 0x12f   : > { %v541_v59 = vadd.f32 %v477_v53, %v377_v57  ;;  %v543_v6 = vadd.f32 %v479_v52, %v379_v0 }
 0x132   : > { %v483_v55 = vpop.permute.xlu1 %482  ;;  %v481_v56 = vpop.permute.xlu0 %480 }
 0x133   : > { %v544_v1 = vadd.f32 %v481_v56, %v380_v62  ;;  %v546_v15 = vadd.f32 %v483_v55, %v382_v11 }
 0x136   : > { %v664_v60 = vpop.permute.xlu1 %663  ;;  %v662_v61 = vpop.permute.xlu0 %661 }
 0x137   : > { %v750_v63 = vadd.f32 %v662_v61, %v541_v59 }
 0x139   : > { %v822_v5 = vadd.f32 %v7656_v35, %v750_v63  ;;  %v383_v63 = vmul.f32 %v7679_v54, %v7638_v33 }
 0x13a   : > { %v668_v7 = vpop.permute.xlu1 %667  ;;  %v666_v9 = vpop.permute.xlu0 %665 }
 0x13b   : > { %v753_v10 = vadd.f32 %v668_v7, %v544_v1  ;;  %v711_v40 = vsel %vm709_vm2, %v664_v60, %v666_v9  ;;  %v846_v13 = vmul.f32 0.2, %v822_v5 }
 0x13c   : > { %v752_v12 = vadd.f32 %v711_v40, %v543_v6  ;;  %v386_v40 = vmul.f32 %v7679_v54, %v7646_v36 }
 0x13d   : > { %v825_v14 = vadd.f32 %v7654_v41, %v753_v10  ;;  %v870_v22 = vmax.f32 %v822_v5, %v846_v13  ;;  %v7708_v5 = vrot.slane %v310_v51, %v7547_v26  ;;  %v510_v10 = vsel %vm508_vm3, %v481_v56, %v483_v55 }
 0x13e   : > { %v824_v16 = vadd.f32 %v7656_v35, %v752_v12  ;;  %v672_v17 = vpop.permute.xlu1 %671  ;;  %v670_v18 = vpop.permute.xlu0 %669  ;;  %v385_v13 = vmul.f32 %v7685_v58, %v7638_v33  ;;  %v509_v26 = vsel %vm508_vm3, %v477_v53, %v479_v52  ;;  %v388_v53 = vmul.f32 %v7685_v58, %v7646_v36 }
 0x13f   : > { %v849_v19 = vmul.f32 0.2, %v825_v14  ;;  %v713_v20 = vsel %vm709_vm2, %v670_v18, %v672_v17  ;;  %v381_v12 = vmul.f32 %v7708_v5, %v7648_v37  ;;  %v712_v51 = vsel %vm709_vm2, %v668_v7, %v670_v18 }
 0x140   : > { %v755_v21 = vadd.f32 %v713_v20, %v546_v15  ;;  %v848_v30 = vmul.f32 0.2, %v824_v16  ;;  %v378_v55 = vmul.f32 %v7708_v5, %v7632_v27  ;;  %v710_v37 = vsel %vm709_vm2, %v662_v61, %v664_v60 }
 0x141   : > { %v873_v23 = vmax.f32 %v825_v14, %v849_v19  ;;  %v545_v56 = vadd.f32 %v510_v10, %v381_v12 }
 0x142   : > { %v827_v31 = vadd.f32 %v7654_v41, %v755_v21  ;;  %v7699_v32 = vpop.permute.xlu1 %486  ;;  %v7701_v28 = vpop.permute.xlu0 %484  ;;  %v872_v59 = vmax.f32 %v824_v16, %v848_v30 }
 0x143   : > { %v894_v29 = vpack.c.bf16 %v873_v23, %v870_v22  ;;  %v547_v1 = vadd.f32 %v7701_v28, %v383_v63  ;;  %v549_v16 = vadd.f32 %v7699_v32, %v385_v13  ;;  %v542_v22 = vadd.f32 %v509_v26, %v378_v55 }
 0x144   : > { %v851_v38 = vmul.f32 0.2, %v827_v31  ;;  %v754_v52 = vadd.f32 %v712_v51, %v545_v56 }
 0x145   : > { %918 = vrot.lane.b32.xlu0 %v894_v29, %s7324_s24  ;;  %v751_v27 = vadd.f32 %v710_v37, %v542_v22  ;;  %v511_v37 = vsel %vm508_vm3, %v7701_v28, %v7699_v32  ;;  %v392_v32 = vmul.f32 %v7679_v54, %v7658_v42 }
 0x146   : > { %v491_v39 = vpop.permute.xlu1 %490  ;;  %v489_v57 = vpop.permute.xlu0 %488  ;;  %v875_v62 = vmax.f32 %v827_v31, %v851_v38  ;;  %v826_v61 = vadd.f32 %v7654_v41, %v754_v52 }
 0x147   : > { %v550_v14 = vadd.f32 %v489_v57, %v386_v40  ;;  %v552_v30 = vadd.f32 %v491_v39, %v388_v53 }
 0x148   : > { %v896_v0 = vpack.c.bf16 %v875_v62, %v872_v59  ;;  %v850_v51 = vmul.f32 0.2, %v826_v61 }
 0x14a   : > { %v676_v6 = vpop.permute.xlu1 %675  ;;  %v674_v9 = vpop.permute.xlu0 %673  ;;  %922 = vrot.lane.b32.xlu0 %v896_v0, %s7324_s24  ;;  %v874_v22 = vmax.f32 %v826_v61, %v850_v51 }
 0x14b   : > { %v756_v11 = vadd.f32 %v674_v9, %v547_v1  ;;  %v823_v1 = vadd.f32 %v7656_v35, %v751_v27  ;;  %v387_v35 = vmul.f32 %v7708_v5, %v7646_v36  ;;  %v714_v53 = vsel %vm709_vm2, %v674_v9, %v676_v6 }
 0x14d   : > { %v828_v15 = vadd.f32 %v7664_v46, %v756_v11 }
 0x14e   : > { %v680_v17 = vpop.permute.xlu1 %679  ;;  %v678_v19 = vpop.permute.xlu0 %677 }
 0x14f   : > { %v759_v20 = vadd.f32 %v680_v17, %v550_v14  ;;  %v715_v21 = vsel %vm709_vm2, %v676_v6, %v678_v19  ;;  %v852_v18 = vmul.f32 0.2, %v828_v15  ;;  %v512_v14 = vsel %vm508_vm3, %v489_v57, %v491_v39 }
 0x150   : > { %v758_v7 = vadd.f32 %v715_v21, %v549_v16  ;;  %v847_v16 = vmul.f32 0.2, %v823_v1  ;;  %v389_v19 = vmul.f32 %v7679_v54, %v7660_v44  ;;  %v384_v39 = vmul.f32 %v7708_v5, %v7638_v33 }
 0x151   : > { %v831_v23 = vadd.f32 %v7662_v45, %v759_v20  ;;  %v876_v63 = vmax.f32 %v828_v15, %v852_v18  ;;  %v551_v57 = vadd.f32 %v512_v14, %v387_v35  ;;  %v391_v33 = vmul.f32 %v7685_v58, %v7660_v44 }
 0x152   : > { %v830_v31 = vadd.f32 %v7664_v46, %v758_v7  ;;  %v684_v29 = vpop.permute.xlu1 %683  ;;  %v682_v38 = vpop.permute.xlu0 %681  ;;  %v871_v18 = vmax.f32 %v823_v1, %v847_v16 }
 0x153   : > { %v855_v59 = vmul.f32 0.2, %v831_v23  ;;  %v717_v60 = vsel %vm709_vm2, %v682_v38, %v684_v29  ;;  %v716_v20 = vsel %vm709_vm2, %v680_v17, %v682_v38 }
 0x154   : > { %v761_v62 = vadd.f32 %v717_v60, %v552_v30  ;;  %v854_v10 = vmul.f32 0.2, %v830_v31  ;;  %v760_v27 = vadd.f32 %v716_v20, %v551_v57  ;;  %v895_v17 = vpack.c.bf16 %v874_v22, %v871_v18 }
 0x155   : > { %v879_v0 = vmax.f32 %v831_v23, %v855_v59  ;;  %v548_v23 = vadd.f32 %v511_v37, %v384_v39  ;;  %v393_v18 = vmul.f32 %v7708_v5, %v7658_v42 }
 0x156   : > { %v833_v40 = vadd.f32 %v7662_v45, %v761_v62  ;;  %v7734_v11 = vpop.permute.xlu1 %494  ;;  %v7736_v12 = vpop.permute.xlu0 %492  ;;  %v878_v15 = vmax.f32 %v830_v31, %v854_v10  ;;  %v832_v38 = vadd.f32 %v7662_v45, %v760_v27  ;;  %v394_v62 = vmul.f32 %v7685_v58, %v7658_v42 }
 0x157   : > { %v897_v13 = vpack.c.bf16 %v879_v0, %v876_v63  ;;  %v553_v52 = vadd.f32 %v7736_v12, %v389_v19  ;;  %v757_v30 = vadd.f32 %v714_v53, %v548_v23  ;;  %v555_v59 = vadd.f32 %v7734_v11, %v391_v33 }
 0x158   : > { %v857_v26 = vmul.f32 0.2, %v833_v40  ;;  %v856_v14 = vmul.f32 0.2, %v832_v38  ;;  %v390_v33 = vmul.f32 %v7708_v5, %v7660_v44 }
 0x159   : > { %924 = vrot.lane.b32.xlu1 %v897_v13, %s7324_s24  ;;  %v829_v63 = vadd.f32 %v7664_v46, %v757_v30 }
 0x15a   : > { %v499_v41 = vpop.permute.xlu1 %498  ;;  %v497_v55 = vpop.permute.xlu0 %496  ;;  %v881_v56 = vmax.f32 %v833_v40, %v857_v26  ;;  %v880_v22 = vmax.f32 %v832_v38, %v856_v14 }
 0x15b   : > { %v556_v31 = vadd.f32 %v497_v55, %v392_v32  ;;  %v558_v40 = vadd.f32 %v499_v41, %v394_v62  ;;  %v853_v19 = vmul.f32 0.2, %v829_v63  ;;  %v514_v57 = vsel %vm508_vm3, %v497_v55, %v499_v41 }
 0x15c   : > { %v899_v21 = vpack.c.bf16 %v881_v56, %v878_v15  ;;  %v513_v41 = vsel %vm508_vm3, %v7736_v12, %v7734_v11  ;;  %v557_v55 = vadd.f32 %v514_v57, %v393_v18 }
 0x15d   : > { %v877_v53 = vmax.f32 %v829_v63, %v853_v19 }
 0x15e   : > { %v688_v36 = vpop.permute.xlu1 %687  ;;  %v686_v7 = vpop.permute.xlu0 %685  ;;  %928 = vrot.lane.b32.xlu1 %v899_v21, %s7324_s24 }
 0x15f   : > { %v762_v28 = vadd.f32 %v686_v7, %v553_v52 }
 0x161   : > { %v834_v29 = vadd.f32 %v7672_v48, %v762_v28  ;;  %v395_v28 = vmul.f32 %v7679_v54, %v7668_v43 }
 0x162   : > { %v692_v6 = vpop.permute.xlu1 %691  ;;  %v690_v9 = vpop.permute.xlu0 %689  ;;  %920 = vrot.lane.b32.xlu1 %v895_v17, %s7324_s24  ;;  %v898_v17 = vpack.c.bf16 %v880_v22, %v877_v53 }
 0x163   : > { %v765_v60 = vadd.f32 %v692_v6, %v556_v31  ;;  %v719_v61 = vsel %vm709_vm2, %v688_v36, %v690_v9  ;;  %v858_v0 = vmul.f32 0.2, %v834_v29  ;;  %v718_v9 = vsel %vm709_vm2, %v686_v7, %v688_v36 }
 0x164   : > { %v764_v10 = vadd.f32 %v719_v61, %v555_v59  ;;  %v398_v59 = vmul.f32 %v7679_v54, %v7666_v47 }
 0x165   : > { %v837_v1 = vadd.f32 %v7670_v34, %v765_v60  ;;  %v882_v16 = vmax.f32 %v834_v29, %v858_v0  ;;  %v554_v60 = vadd.f32 %v513_v41, %v390_v33 }
 0x166   : > { %v696_v13 = vpop.permute.xlu1 %695  ;;  %v694_v26 = vpop.permute.xlu0 %693  ;;  %v836_v56 = vadd.f32 %v7672_v48, %v764_v10 }
 0x167   : > { %v861_v51 = vmul.f32 0.2, %v837_v1  ;;  %v721_v45 = vsel %vm709_vm2, %v694_v26, %v696_v13  ;;  %v720_v32 = vsel %vm709_vm2, %v692_v6, %v694_v26  ;;  %v396_v6 = vmul.f32 %v7708_v5, %v7668_v43 }
 0x168   : > { %v767_v15 = vadd.f32 %v721_v45, %v558_v40  ;;  %v860_v52 = vmul.f32 0.2, %v836_v56  ;;  %v766_v38 = vadd.f32 %v720_v32, %v557_v55  ;;  %v763_v0 = vadd.f32 %v718_v9, %v554_v60 }
 0x169   : > { %v885_v35 = vmax.f32 %v837_v1, %v861_v51  ;;  %v397_v1 = vmul.f32 %v7685_v58, %v7668_v43  ;;  %v400_v43 = vmul.f32 %v7685_v58, %v7666_v47 }
 0x16a   : > { %v839_v37 = vadd.f32 %v7670_v34, %v767_v15  ;;  %v503_v46 = vpop.permute.xlu1 %502  ;;  %v501_v20 = vpop.permute.xlu0 %500  ;;  %v884_v29 = vmax.f32 %v836_v56, %v860_v52  ;;  %v838_v36 = vadd.f32 %v7670_v34, %v766_v38  ;;  %v399_v15 = vmul.f32 %v7708_v5, %v7666_v47 }
 0x16b   : > { %v900_v21 = vpack.c.bf16 %v885_v35, %v882_v16  ;;  %v515_v31 = vsel %vm508_vm3, %v501_v20, %v503_v46  ;;  %v559_v42 = vadd.f32 %v501_v20, %v395_v28  ;;  %v561_v26 = vadd.f32 %v503_v46, %v397_v1 }
 0x16c   : > { %v863_v39 = vmul.f32 0.2, %v839_v37  ;;  %v560_v63 = vadd.f32 %v515_v31, %v396_v6  ;;  %v835_v56 = vadd.f32 %v7672_v48, %v763_v0  ;;  %v862_v57 = vmul.f32 0.2, %v838_v36 }
 0x16d   : > { %930 = vrot.lane.b32.xlu0 %v900_v21, %s7324_s24 }
 0x16e   : > { %v507_v23 = vpop.permute.xlu1 %506  ;;  %v505_v27 = vpop.permute.xlu0 %504  ;;  %v887_v30 = vmax.f32 %v839_v37, %v863_v39  ;;  %v859_v18 = vmul.f32 0.2, %v835_v56 }
 0x16f   : > { %v562_v10 = vadd.f32 %v505_v27, %v398_v59  ;;  %v516_v51 = vsel %vm508_vm3, %v505_v27, %v507_v23  ;;  %v564_v19 = vadd.f32 %v507_v23, %v400_v43  ;;  %v7125_v43 = vld [vmem:[#allocation5 + $0x30] sm:$0xff]  }
 0x170   : > { %v902_v62 = vpack.c.bf16 %v887_v30, %v884_v29  ;;  %v563_v37 = vadd.f32 %v516_v51, %v399_v15  ;;  %v883_v33 = vmax.f32 %v835_v56, %v859_v18  ;;  %v7124_v15 = vld [vmem:[#allocation5 + $0x28] sm:$0xff]  }
 0x171   : > { %926 = vrot.lane.b32.xlu0 %v898_v17, %s7324_s24  ;;  %v886_v17 = vmax.f32 %v838_v36, %v862_v57  ;;  %v1453_v56 = vld [vmem:[%s8940_s4 + $0x8] sm:$0xff] }
 0x172   : > { %v700_v11 = vpop.permute.xlu1 %699  ;;  %v698_v12 = vpop.permute.xlu0 %697 }
 0x173   : > { %v722_v44 = vsel %vm709_vm2, %v698_v12, %v700_v11  ;;  %v768_v61 = vadd.f32 %v698_v12, %v559_v42  ;;  %v901_v29 = vpack.c.bf16 %v886_v17, %v883_v33 }
 0x174   : > { %v769_v54 = vadd.f32 %v722_v44, %v560_v63 }
 0x175   : > { %v840_v40 = vadd.f32 %v7676_v50, %v768_v61  ;;  %934 = vrot.lane.b32.xlu0 %v902_v62, %s7324_s24 }
 0x176   : > { %v704_v7 = vpop.permute.xlu1 %703  ;;  %v702_v13 = vpop.permute.xlu0 %701  ;;  %v841_v46 = vadd.f32 %v7676_v50, %v769_v54 }
 0x177   : > { %v771_v45 = vadd.f32 %v704_v7, %v562_v10  ;;  %v723_v14 = vsel %vm709_vm2, %v700_v11, %v702_v13  ;;  %v864_v16 = vmul.f32 0.2, %v840_v40 }
 0x178   : > { %v770_v35 = vadd.f32 %v723_v14, %v561_v26  ;;  %v865_v32 = vmul.f32 0.2, %v841_v46  ;;  %v7123_v14 = vld [vmem:[#allocation5 + $0x20] sm:$0xff]  }
 0x179   : > { %v843_v34 = vadd.f32 %v7674_v49, %v771_v45  ;;  %v888_v58 = vmax.f32 %v840_v40, %v864_v16  ;;  %v7126_v16 = vld [vmem:[#allocation5 + $0x38] sm:$0xff]  }
 0x17a   : > { %v708_v20 = vpop.permute.xlu1 %707  ;;  %v706_v21 = vpop.permute.xlu0 %705  ;;  %v842_v48 = vadd.f32 %v7676_v50, %v770_v35  ;;  %v889_v31 = vmax.f32 %v841_v46, %v865_v32  ;;  %v1455_v35 = vld [vmem:[%s8940_s4 + $0x18] sm:$0xff]  ;;  %v1456_v46 = vld [vmem:[%s8940_s4 + $0x20] sm:$0xff] }
 0x17b   : > { %v867_v22 = vmul.f32 0.2, %v843_v34  ;;  %v724_v39 = vsel %vm709_vm2, %v704_v7, %v706_v21  ;;  %v725_v5 = vsel %vm709_vm2, %v706_v21, %v708_v20  ;;  %v1459_v20 = vld [vmem:[%s8940_s4 + $0x38] sm:$0xff]  ;;  %v1458_v21 = vld [vmem:[%s8940_s4 + $0x30] sm:$0xff] }
 0x17c   : > { %v772_v52 = vadd.f32 %v724_v39, %v563_v37  ;;  %v773_v47 = vadd.f32 %v725_v5, %v564_v19  ;;  %v866_v55 = vmul.f32 0.2, %v842_v48  ;;  %v1454_v19 = vld [vmem:[%s8940_s4 + $0x10] sm:$0xff]  ;;  %v1457_v37 = vld [vmem:[%s8940_s4 + $0x28] sm:$0xff] }
 0x17d   : > { %v891_v53 = vmax.f32 %v843_v34, %v867_v22  ;;  %v1452_v34 = vld [vmem:[%s8940_s4] sm:$0xff] }
 0x17e   : > { %v844_v23 = vadd.f32 %v7674_v49, %v772_v52  ;;  %v845_v27 = vadd.f32 %v7674_v49, %v773_v47  ;;  %v890_v9 = vmax.f32 %v842_v48, %v866_v55 }
 0x17f   : > { %v903_v28 = vpack.c.bf16 %v891_v53, %v888_v58 }
 0x180   : > { %v868_v30 = vmul.f32 0.2, %v844_v23  ;;  %v869_v41 = vmul.f32 0.2, %v845_v27 }
 0x181   : > { %936 = vrot.lane.b32.xlu1 %v903_v28, %s7324_s24 }
 0x182   : > { %v892_v42 = vmax.f32 %v844_v23, %v868_v30  ;;  %v893_v50 = vmax.f32 %v845_v27, %v869_v41 }
 0x184   : > { %v904_v6 = vpack.c.bf16 %v892_v42, %v889_v31  ;;  %v905_v49 = vpack.c.bf16 %v893_v50, %v890_v9  ;;  %v7127_v50 = vld [vmem:[#allocation5] sm:$0xff]  }
 0x185   : > { %932 = vrot.lane.b32.xlu1 %v901_v29, %s7324_s24 }
 0x186   : > { %938 = vrot.lane.b32.xlu0 %v904_v6, %s7324_s24 }
 0x189   : > { %940 = vrot.lane.b32.xlu1 %v905_v49, %s7324_s24 }
 0x18a   : > { %7036 = vrot.lane.b32.xlu0 %v7320_v4, %s7324_s24 }
 0x18d   : > { %1165 = vrot.lane.b32.xlu1 %v7320_v4, %s7324_s24 }
 0x1b7   : > { %v919_v59 = vpop.permute.xlu0 %918 }
 0x1bc   : > { %v923_v12 = vpop.permute.xlu0 %922 }
 0x1cb   : > { %v925_v38 = vpop.permute.xlu1 %924 }
 0x1d0   : > { %v929_v11 = vpop.permute.xlu1 %928 }
 0x1d4   : > { %v921_v60 = vpop.permute.xlu1 %920 }
 0x1d5   : > { %v943_v44 = vsel %vm942_vm4, %v919_v59, %v921_v60  ;;  %v944_v61 = vsel %vm942_vm4, %v921_v60, %v923_v12 }
 0x1d6   : > { %1155 = vrot.lane.b32.xlu0 %v943_v44, %s7324_s24  ;;  %1157 = vrot.lane.b32.xlu1 %v944_v61, %s7324_s24 }
 0x1d7   : > { %1048 = vmatprep.subr.bf16.mxu0 %v944_v61 }
 0x1d8   : > { %1049 = vmatpush1.bf16.msra.mxu0 %v943_v44 }
 0x1df   : > { %v931_v62 = vpop.permute.xlu0 %930 }
 0x1e3   : > { %v927_v63 = vpop.permute.xlu0 %926 }
 0x1e4   : > { %v946_v0 = vsel %vm942_vm4, %v927_v63, %v929_v11  ;;  %v945_v1 = vsel %vm942_vm4, %v925_v38, %v927_v63 }
 0x1e5   : > { %1163 = vrot.lane.b32.xlu0 %v946_v0, %s7324_s24  ;;  %1050 = vmatprep.subr.bf16.mxu0 %v946_v0 }
 0x1e6   : > { %1161 = vrot.lane.b32.xlu1 %v945_v1, %s7324_s24  ;;  %1051 = vmatpush1.bf16.msra.mxu0 %v945_v1 }
 0x1e7   : > { %v935_v40 = vpop.permute.xlu0 %934 }
 0x1f3   : > { %v937_v10 = vpop.permute.xlu1 %936 }
 0x1f7   : > { %v933_v36 = vpop.permute.xlu1 %932 }
 0x1f8   : > { %v947_v54 = vsel %vm942_vm4, %v931_v62, %v933_v36  ;;  %v948_v7 = vsel %vm942_vm4, %v933_v36, %v935_v40  ;;  %v939_v13 = vpop.permute.xlu0 %938 }
 0x1f9   : > { %1167 = vrot.lane.b32.xlu1 %v947_v54, %s7324_s24  ;;  %1169 = vrot.lane.b32.xlu0 %v948_v7, %s7324_s24  ;;  %v949_v45 = vsel %vm942_vm4, %v937_v10, %v939_v13 }
 0x1fa   : > { %1052 = vmatprep.subr.bf16.mxu0 %v948_v7 }
 0x1fb   : > { %1053 = vmatpush1.bf16.msra.mxu0 %v947_v54  ;;  %v941_v26 = vpop.permute.xlu1 %940 }
 0x1fc   : > { %v950_v51 = vsel %vm942_vm4, %v939_v13, %v941_v26  ;;  %v7037_v39 = vpop.permute.xlu0 %7036 }
 0x1fd   : > { %1175 = vrot.lane.b32.xlu1 %v950_v51, %s7324_s24  ;;  %1054 = vmatprep.subr.bf16.mxu0 %v950_v51  ;;  %v7038_v5 = vunpack.i.l.bf16 %v7037_v39  ;;  %v7039_v58 = vunpack.i.h.bf16 %v7037_v39 }
 0x1fe   : > { %1173 = vrot.lane.b32.xlu0 %v949_v45, %s7324_s24 }
 0x1ff   : > { %1055 = vmatpush1.bf16.msra.mxu0 %v949_v45  ;;  %v1166_v22 = vpop.permute.xlu1 %1165 }
 0x201   : > { %1326 = vrot.lane.b32.xlu1 %v7320_v4, %s7322_s22 }
 0x202   : > { %1171 = vrot.lane.b32.xlu0 %v7320_v4, %s7324_s24  ;;  %6445 = vmatmul.mubr.msk.bf16.vlgmr.msra.gmra.mrb[0].mxu0 %vm1035_vm5, %v7123_v14  ;;  %v7131_v14 = vld [vmem:[#allocation5 + $0x40] sm:$0xff]  }
 0x203   : > { %1090 = vmatprep.mubr.bf16.mxu0 %v7320_v4 }
 0x205   : > { %1312 = vrot.lane.b32.xlu1 %v944_v61, %s7322_s22  ;;  %v7128_v61 = vld [vmem:[#allocation5 + $0x8] sm:$0xff]  }
 0x206   : > { %7041 = vrot.lane.b32.xlu0 %v7320_v4, %s7322_s22 }
 0x209   : > { %1310 = vrot.lane.b32.xlu1 %v943_v44, %s7322_s22 }
 0x20a   : > { %1318 = vrot.lane.b32.xlu0 %v946_v0, %s7322_s22  ;;  %6446 = vmatmul.mubr.msk.bf16.gmra.mrb[4].mxu0 %vm1035_vm5, %v7124_v15  ;;  %v7132_v15 = vld [vmem:[#allocation5 + $0x48] sm:$0xff]  }
 0x20b   : > { %1100 = vmatprep.mubr.bf16.mxu0 %v7320_v4 }
 0x20d   : > { %1316 = vrot.lane.b32.xlu1 %v945_v1, %s7322_s22 }
 0x20e   : > { %1324 = vrot.lane.b32.xlu0 %v948_v7, %s7322_s22 }
 0x211   : > { %1330 = vrot.lane.b32.xlu1 %v950_v51, %s7322_s22 }
 0x212   : > { %1322 = vrot.lane.b32.xlu0 %v947_v54, %s7322_s22  ;;  %6447 = vmatmul.mubr.msk.bf16.gmra.mrb[8].mxu0 %vm1035_vm5, %v7125_v43  ;;  %v7129_v54 = vld [vmem:[#allocation5 + $0x10] sm:$0xff]  }
 0x213   : > { %1110 = vmatprep.mubr.bf16.mxu0 %v7320_v4  ;;  %v7133_v43 = vld [vmem:[#allocation5 + $0x50] sm:$0xff]  }
 0x215   : > { %1328 = vrot.lane.b32.xlu1 %v949_v45, %s7322_s22  ;;  %v7130_v45 = vld [vmem:[#allocation5 + $0x18] sm:$0xff]  }
 0x216   : > { %1332 = vrot.lane.b32.xlu0 %v7320_v4, %s7322_s22 }
 0x219   : > { %1467 = vperm.xlu1 %7033, %v1453_v56   ;;  %v7134_v56 = vld [vmem:[#allocation5 + $0x58] sm:$0xff]  }
 0x21a   : > { %1462 = vperm.xlu0 %7034, %v1452_v34   ;;  %6448 = vmatmul.mubr.msk.bf16.gmra.mrb[12].mxu0 %vm1035_vm5, %v7126_v16 }
 0x21b   : > { %1237 = vmatprep.mubr.bf16.mxu0 %v7320_v4 }
 0x21d   : > { %1477 = vperm.xlu1 %7033, %v1455_v35  }
 0x21e   : > { %1472 = vperm.xlu0 %7034, %v1454_v19  }
 0x221   : > { %1487 = vperm.xlu1 %7033, %v1457_v37  }
 0x222   : > { %1482 = vperm.xlu0 %7034, %v1456_v46  }
 0x225   : > { %1497 = vperm.xlu1 %7033, %v1459_v20  }
 0x226   : > { %1492 = vperm.xlu0 %7034, %v1458_v21  }
 0x229   : > { %1762 = vrot.lane.b32.xlu1 %v7320_v4, %s7325_s15 }
 0x22a   : > { %7046 = vrot.lane.b32.xlu0 %v7320_v4, %s7325_s15 }
 0x248   : > { %v1158_v57 = vpop.permute.xlu1 %1157  ;;  %v1156_v52 = vpop.permute.xlu0 %1155 }
 0x249   : > { %v1178_v47 = vsel %vm942_vm4, %v1156_v52, %v1158_v57  ;;  %v1177_v48 = vsel %vm942_vm4, %v7038_v5, %v1156_v52 }
 0x24a   : > { %1205 = vmatprep.subr.bf16.mxu0 %v1178_v47 }
 0x24b   : > { %1206 = vmatpush1.bf16.msra.mxu0 %v1177_v48 }
 0x257   : > { %v1164_v53 = vpop.permute.xlu0 %1163 }
 0x258   : > { %v1162_v18 = vpop.permute.xlu1 %1161 }
 0x259   : > { %v1180_v23 = vsel %vm942_vm4, %v1162_v18, %v1164_v53  ;;  %v1179_v27 = vsel %vm942_vm4, %v7039_v58, %v1162_v18 }
 0x25a   : > { %1207 = vmatprep.subr.bf16.mxu0 %v1180_v23 }
 0x25b   : > { %1208 = vmatpush1.bf16.msra.mxu0 %v1179_v27 }
 0x26b   : > { %v1168_v32 = vpop.permute.xlu1 %1167  ;;  %v1170_v28 = vpop.permute.xlu0 %1169 }
 0x26c   : > { %v1182_v17 = vsel %vm942_vm4, %v1168_v32, %v1170_v28  ;;  %v1181_v30 = vsel %vm942_vm4, %v1166_v22, %v1168_v32 }
 0x26d   : > { %1209 = vmatprep.subr.bf16.mxu0 %v1182_v17 }
 0x26e   : > { %1210 = vmatpush1.bf16.msra.mxu0 %v1181_v30 }
 0x26f   : > { %v1176_v41 = vpop.permute.xlu1 %1175 }
 0x270   : > { %v1174_v55 = vpop.permute.xlu0 %1173 }
 0x271   : > { %v1184_v33 = vsel %vm942_vm4, %v1174_v55, %v1176_v41 }
 0x272   : > { %1211 = vmatprep.subr.bf16.mxu0 %v1184_v33 }
 0x273   : > { %v1327_v31 = vpop.permute.xlu1 %1326 }
 0x274   : > { %v1172_v42 = vpop.permute.xlu0 %1171 }
 0x275   : > { %v1183_v29 = vsel %vm942_vm4, %v1172_v42, %v1174_v55 }
 0x276   : > { %1212 = vmatpush1.bf16.msra.mxu0 %v1183_v29 }
 0x277   : > { %v1313_v6 = vpop.permute.xlu1 %1312 }
 0x278   : > { %v7042_v9 = vpop.permute.xlu0 %7041 }
 0x279   : > { %v7044_v49 = vunpack.i.h.bf16 %v7042_v9  ;;  %v7043_v38 = vunpack.i.l.bf16 %v7042_v9  ;;  %6453 = vmatmul.mubr.msk.bf16.vlgmr.msra.gmra.mrb[0].mxu0 %vm1035_vm5, %v7127_v50 }
 0x27a   : > { %1247 = vmatprep.mubr.bf16.mxu0 %v7320_v4 }
 0x27b   : > { %v1311_v59 = vpop.permute.xlu1 %1310  ;;  %v1336_v11 = vsel %vm508_vm3, %v1313_v6, %v7043_v38 }
 0x27c   : > { %v1335_v12 = vsel %vm508_vm3, %v1311_v59, %v1313_v6  ;;  %v1319_v60 = vpop.permute.xlu0 %1318  ;;  %1363 = vmatprep.subr.bf16.mxu0 %v1336_v11 }
 0x27d   : > { %1364 = vmatpush1.bf16.msra.mxu0 %v1335_v12  ;;  %v1338_v44 = vsel %vm508_vm3, %v1319_v60, %v7044_v49 }
 0x27e   : > { %1365 = vmatprep.subr.bf16.mxu0 %v1338_v44 }
 0x27f   : > { %v1317_v62 = vpop.permute.xlu1 %1316 }
 0x280   : > { %v1337_v63 = vsel %vm508_vm3, %v1317_v62, %v1319_v60  ;;  %v1325_v0 = vpop.permute.xlu0 %1324 }
 0x281   : > { %6454 = vmatmul.mubr.msk.bf16.gmra.mrb[4].mxu0 %vm1035_vm5, %v7128_v61  ;;  %v1340_v1 = vsel %vm508_vm3, %v1325_v0, %v1327_v31 }
 0x282   : > { %1366 = vmatpush1.bf16.msra.mxu0 %v1337_v63  ;;  %1257 = vmatprep.mubr.bf16.mxu0 %v7320_v4 }
 0x283   : > { %1367 = vmatprep.subr.bf16.mxu0 %v1340_v1  ;;  %v1331_v10 = vpop.permute.xlu1 %1330 }
 0x284   : > { %v1323_v40 = vpop.permute.xlu0 %1322 }
 0x285   : > { %v1339_v36 = vsel %vm508_vm3, %v1323_v40, %v1325_v0 }
 0x286   : > { %1368 = vmatpush1.bf16.msra.mxu0 %v1339_v36 }
 0x287   : > { %v1329_v7 = vpop.permute.xlu1 %1328 }
 0x288   : > { %v1341_v13 = vsel %vm508_vm3, %v1329_v7, %v1331_v10  ;;  %v1333_v26 = vpop.permute.xlu0 %1332 }
 0x289   : > { %6455 = vmatmul.mubr.msk.bf16.gmra.mrb[8].mxu0 %vm1035_vm5, %v7129_v54  ;;  %v1342_v51 = vsel %vm508_vm3, %v1331_v10, %v1333_v26 }
 0x28a   : > { %1369 = vmatprep.subr.bf16.mxu0 %v1342_v51  ;;  %1267 = vmatprep.mubr.bf16.mxu0 %v7320_v4 }
 0x28b   : > { %1370 = vmatpush1.bf16.msra.mxu0 %v1341_v13 }
 0x291   : > { %6456 = vmatmul.mubr.msk.bf16.gmra.mrb[12].mxu0 %vm1035_vm5, %v7130_v45 }
 0x292   : > { %1395 = vmatprep.mubr.bf16.mxu0 %v7320_v4 }
 0x298   : > { %v1468_v37 = vpop.permute.xlu1 %1467 }
 0x299   : > { %6461 = vmatmul.mubr.msk.bf16.vlgmr.msra.gmra.mrb[0].mxu0 %vm1035_vm5, %v7131_v14  ;;  %v1463_v16 = vpop.permute.xlu0 %1462 }
 0x29a   : > { %1405 = vmatprep.mubr.bf16.mxu0 %v7320_v4 }
 0x29c   : > { %v1478_v30 = vpop.permute.xlu1 %1477 }
 0x29d   : > { %v1473_v53 = vpop.permute.xlu0 %1472 }
 0x2a0   : > { %v1488_v0 = vpop.permute.xlu1 %1487 }
 0x2a1   : > { %6462 = vmatmul.mubr.msk.bf16.gmra.mrb[4].mxu0 %vm1035_vm5, %v7132_v15  ;;  %v1483_v11 = vpop.permute.xlu0 %1482 }
 0x2a2   : > { %1415 = vmatprep.mubr.bf16.mxu0 %v7320_v4 }
 0x2a9   : > { %6463 = vmatmul.mubr.msk.bf16.gmra.mrb[8].mxu0 %vm1035_vm5, %v7133_v43  ;;  %v1493_v43 = vpop.permute.xlu0 %1492 }
 0x2aa   : > { %1425 = vmatprep.mubr.bf16.mxu0 %v7320_v4 }
 0x2b1   : > { %6464 = vmatmul.mubr.msk.bf16.gmra.mrb[12].mxu0 %vm1035_vm5, %v7134_v56 }
 0x2b2   : > { %2276 = vmatprep.mubr.bf16.mxu0 %v7320_v4 }
 0x36c   : > { %v1397_v34 = vpop.f32.mrb[0].mxu0 }
 0x36d   : > { %v1500_v35 = vadd.f32 %v1463_v16, %v1397_v34  ;;  %v1399_v19 = vpop.f32.mrb[1].mxu0 }
 0x36e   : > { %v1501_v46 = vadd.f32 %v1463_v16, %v1399_v19  ;;  %v1401_v20 = vpop.f32.mrb[2].mxu0 }
 0x36f   : > { %v1516_v21 = vmul.f32 0.2, %v1500_v35  ;;  %v1502_v22 = vadd.f32 %v1468_v37, %v1401_v20  ;;  %v1403_v39 = vpop.f32.mrb[3].mxu0 }
 0x370   : > { %v1517_v5 = vmul.f32 0.2, %v1501_v46  ;;  %v1503_v57 = vadd.f32 %v1468_v37, %v1403_v39 }
 0x371   : > { %v1518_v52 = vmul.f32 0.2, %v1502_v22  ;;  %v1532_v48 = vmax.f32 %v1500_v35, %v1516_v21 }
 0x372   : > { %v1519_v47 = vmul.f32 0.2, %v1503_v57  ;;  %v1533_v18 = vmax.f32 %v1501_v46, %v1517_v5  ;;  %v1498_v46 = vpop.permute.xlu1 %1497 }
 0x373   : > { %v1534_v58 = vmax.f32 %v1502_v22, %v1518_v52 }
 0x374   : > { %v1535_v23 = vmax.f32 %v1503_v57, %v1519_v47  ;;  %v1407_v27 = vpop.f32.mrb[4].mxu0 }
 0x375   : > { %v7916_v32 = vpack.c.bf16 %v1534_v58, %v1532_v48  ;;  %v1504_v28 = vadd.f32 %v1473_v53, %v1407_v27  ;;  %v1409_v17 = vpop.f32.mrb[5].mxu0 }
 0x376   : > { %v7918_v41 = vpack.c.bf16 %v1535_v23, %v1533_v18  ;;  %v1505_v55 = vadd.f32 %v1473_v53, %v1409_v17  ;;  %v1411_v33 = vpop.f32.mrb[6].mxu0 }
 0x377   : > { %v1520_v31 = vmul.f32 0.2, %v1504_v28  ;;  %v1506_v42 = vadd.f32 %v1478_v30, %v1411_v33  ;;  %1752 = vrot.lane.b32.xlu0 %v7916_v32, %s7325_s15  ;;  %v1413_v29 = vpop.f32.mrb[7].mxu0  ;;  %v7138_v33 = vld [vmem:[#allocation5 + $0x98] sm:$0xff]  }
 0x378   : > { %v1521_v50 = vmul.f32 0.2, %v1505_v55  ;;  %v1507_v6 = vadd.f32 %v1478_v30, %v1413_v29  ;;  %1754 = vrot.lane.b32.xlu1 %v7918_v41, %s7325_s15  ;;  %1645 = vmatprep.subr.bf16.mxu1 %v7918_v41  ;;  %v7135_v30 = vld [vmem:[#allocation5 + $0x80] sm:$0xff]   ;;  %v6492_v29 = vld [vmem:[%s8940_s4 + $0x58] sm:$0xff] }
 0x379   : > { %v1522_v9 = vmul.f32 0.2, %v1506_v42  ;;  %1646 = vmatpush1.bf16.msra.mxu1 %v7916_v32  ;;  %v1536_v38 = vmax.f32 %v1504_v28, %v1520_v31  ;;  %v6490_v31 = vld [vmem:[%s8940_s4 + $0x48] sm:$0xff] }
 0x37a   : > { %v1523_v49 = vmul.f32 0.2, %v1507_v6  ;;  %v1537_v12 = vmax.f32 %v1505_v55, %v1521_v50  ;;  %v7136_v55 = vld [vmem:[#allocation5 + $0x88] sm:$0xff]   ;;  %v6493_v50 = vld [vmem:[%s8940_s4 + $0x60] sm:$0xff] }
 0x37b   : > { %v1538_v59 = vmax.f32 %v1506_v42, %v1522_v9  ;;  %v6491_v42 = vld [vmem:[%s8940_s4 + $0x50] sm:$0xff] }
 0x37c   : > { %v1539_v60 = vmax.f32 %v1507_v6, %v1523_v49  ;;  %v1417_v44 = vpop.f32.mrb[8].mxu0  ;;  %v6494_v6 = vld [vmem:[%s8940_s4 + $0x68] sm:$0xff]  ;;  %v6495_v9 = vld [vmem:[%s8940_s4 + $0x70] sm:$0xff]  ;;  %v6496_v49 = vld [vmem:[%s8940_s4 + $0x78] sm:$0xff] }
 0x37d   : > { %v1550_v61 = vpack.c.bf16 %v1538_v59, %v1536_v38  ;;  %v1508_v62 = vadd.f32 %v1483_v11, %v1417_v44  ;;  %v1419_v63 = vpop.f32.mrb[9].mxu0  ;;  %v7047_v38 = vpop.permute.xlu0 %7046 }
 0x37e   : > { %v1551_v1 = vpack.c.bf16 %v1539_v60, %v1537_v12  ;;  %v1509_v10 = vadd.f32 %v1483_v11, %v1419_v63  ;;  %v1421_v40 = vpop.f32.mrb[10].mxu0  ;;  %v1763_v59 = vpop.permute.xlu1 %1762  ;;  %v7048_v11 = vunpack.i.l.bf16 %v7047_v38 }
 0x37f   : > { %v1524_v36 = vmul.f32 0.2, %v1508_v62  ;;  %v1510_v54 = vadd.f32 %v1488_v0, %v1421_v40  ;;  %1758 = vrot.lane.b32.xlu1 %v1550_v61, %s7325_s15  ;;  %v1423_v7 = vpop.f32.mrb[11].mxu0 }
 0x380   : > { %v1525_v13 = vmul.f32 0.2, %v1509_v10  ;;  %v1511_v26 = vadd.f32 %v1488_v0, %v1423_v7  ;;  %1760 = vrot.lane.b32.xlu0 %v1551_v1, %s7325_s15  ;;  %1647 = vmatprep.subr.bf16.mxu1 %v1551_v1 }
 0x381   : > { %v1526_v51 = vmul.f32 0.2, %v1510_v54  ;;  %1648 = vmatpush1.bf16.msra.mxu1 %v1550_v61  ;;  %v1540_v14 = vmax.f32 %v1508_v62, %v1524_v36  ;;  %v7049_v62 = vunpack.i.h.bf16 %v7047_v38 }
 0x382   : > { %v1527_v45 = vmul.f32 0.2, %v1511_v26  ;;  %v1541_v56 = vmax.f32 %v1509_v10, %v1525_v13 }
 0x383   : > { %v1542_v15 = vmax.f32 %v1510_v54, %v1526_v51 }
 0x384   : > { %v1543_v16 = vmax.f32 %v1511_v26, %v1527_v45  ;;  %v1427_v34 = vpop.f32.mrb[12].mxu0 }
 0x385   : > { %v1552_v35 = vpack.c.bf16 %v1542_v15, %v1540_v14  ;;  %v1512_v19 = vadd.f32 %v1493_v43, %v1427_v34  ;;  %v1429_v37 = vpop.f32.mrb[13].mxu0 }
 0x386   : > { %v1553_v20 = vpack.c.bf16 %v1543_v16, %v1541_v56  ;;  %v1513_v21 = vadd.f32 %v1493_v43, %v1429_v37  ;;  %v1431_v22 = vpop.f32.mrb[14].mxu0  ;;  %v7139_v43 = vld [vmem:[#allocation5 + $0x60] sm:$0xff]  }
 0x387   : > { %v1528_v39 = vmul.f32 0.2, %v1512_v19  ;;  %v1514_v5 = vadd.f32 %v1498_v46, %v1431_v22  ;;  %1764 = vrot.lane.b32.xlu1 %v1552_v35, %s7325_s15  ;;  %v1433_v57 = vpop.f32.mrb[15].mxu0  ;;  %v7140_v22 = vld [vmem:[#allocation5 + $0x68] sm:$0xff]  }
 0x388   : > { %v1529_v52 = vmul.f32 0.2, %v1513_v21  ;;  %v1515_v47 = vadd.f32 %v1498_v46, %v1433_v57  ;;  %1766 = vrot.lane.b32.xlu0 %v1553_v20, %s7325_s15  ;;  %1649 = vmatprep.subr.bf16.mxu1 %v1553_v20 }
 0x389   : > { %v1530_v48 = vmul.f32 0.2, %v1514_v5  ;;  %1650 = vmatpush1.bf16.msra.mxu1 %v1552_v35  ;;  %v1544_v53 = vmax.f32 %v1512_v19, %v1528_v39 }
 0x38a   : > { %v1531_v58 = vmul.f32 0.2, %v1515_v47  ;;  %v1545_v23 = vmax.f32 %v1513_v21, %v1529_v52 }
 0x38b   : > { %v1546_v18 = vmax.f32 %v1514_v5, %v1530_v48 }
 0x38c   : > { %v1547_v27 = vmax.f32 %v1515_v47, %v1531_v58 }
 0x38d   : > { %v1554_v28 = vpack.c.bf16 %v1546_v18, %v1544_v53  ;;  %v7141_v53 = vld [vmem:[#allocation5 + $0x70] sm:$0xff]  }
 0x38e   : > { %v1555_v17 = vpack.c.bf16 %v1547_v27, %v1545_v23 }
 0x38f   : > { %1770 = vrot.lane.b32.xlu0 %v1554_v28, %s7325_s15 }
 0x390   : > { %1772 = vrot.lane.b32.xlu1 %v1555_v17, %s7325_s15  ;;  %1651 = vmatprep.subr.bf16.mxu1 %v1555_v17 }
 0x391   : > { %1652 = vmatpush1.bf16.msra.mxu1 %v1554_v28 }
 0x393   : > { %1768 = vrot.lane.b32.xlu0 %v7320_v4, %s7325_s15  ;;  %s7329_s15 = smov 124  }
 0x394   : > { %1910 = vrot.lane.b32.xlu1 %v7918_v41, %s7323_s23  ;;  %6469 = vmatmul.mubr.msk.bf16.vlgmr.msra.gmra.mrb[0].mxu1 %vm1035_vm5, %v7135_v30  ;;  %v7137_v41 = vld [vmem:[#allocation5 + $0x90] sm:$0xff]   ;;  %v7143_v30 = vld [vmem:[#allocation5 + $0xa0] sm:$0xff]  }
 0x395   : > { %1687 = vmatprep.mubr.bf16.mxu1 %v7320_v4 }
 0x397   : > { %7051 = vrot.lane.b32.xlu0 %v7320_v4, %s7323_s23 }
 0x398   : > { %1908 = vrot.lane.b32.xlu1 %v7916_v32, %s7323_s23  ;;  %v6489_v32 = vld [vmem:[%s8940_s4 + $0x40] sm:$0xff] }
 0x39b   : > { %1916 = vrot.lane.b32.xlu0 %v1551_v1, %s7323_s23 }
 0x39c   : > { %1914 = vrot.lane.b32.xlu1 %v1550_v61, %s7323_s23  ;;  %6470 = vmatmul.mubr.msk.bf16.gmra.mrb[4].mxu1 %vm1035_vm5, %v7136_v55  ;;  %v7144_v55 = vld [vmem:[#allocation5 + $0xa8] sm:$0xff]  }
 0x39d   : > { %1697 = vmatprep.mubr.bf16.mxu1 %v7320_v4 }
 0x39f   : > { %1922 = vrot.lane.b32.xlu0 %v1553_v20, %s7323_s23 }
 0x3a0   : > { %1924 = vrot.lane.b32.xlu1 %v7320_v4, %s7323_s23 }
 0x3a3   : > { %1920 = vrot.lane.b32.xlu0 %v1552_v35, %s7323_s23 }
 0x3a4   : > { %1928 = vrot.lane.b32.xlu1 %v1555_v17, %s7323_s23  ;;  %6471 = vmatmul.mubr.msk.bf16.gmra.mrb[8].mxu1 %vm1035_vm5, %v7137_v41  ;;  %v7142_v17 = vld [vmem:[#allocation5 + $0x78] sm:$0xff]   ;;  %v7145_v41 = vld [vmem:[#allocation5 + $0xb0] sm:$0xff]  }
 0x3a5   : > { %1707 = vmatprep.mubr.bf16.mxu1 %v7320_v4 }
 0x3a7   : > { %1930 = vrot.lane.b32.xlu0 %v7320_v4, %s7323_s23 }
 0x3a8   : > { %1926 = vrot.lane.b32.xlu1 %v1554_v28, %s7323_s23 }
 0x3ab   : > { %2061 = vperm.xlu0 %7034, %v6489_v32   ;;  %v7146_v32 = vld [vmem:[#allocation5 + $0xb8] sm:$0xff]  }
 0x3ac   : > { %2066 = vperm.xlu1 %7033, %v6490_v31   ;;  %6472 = vmatmul.mubr.msk.bf16.gmra.mrb[12].mxu1 %vm1035_vm5, %v7138_v33 }
 0x3ad   : > { %1835 = vmatprep.mubr.bf16.mxu1 %v7320_v4 }
 0x3af   : > { %2071 = vperm.xlu0 %7034, %v6491_v42  }
 0x3b0   : > { %2076 = vperm.xlu1 %7033, %v6492_v29  }
 0x3b3   : > { %2081 = vperm.xlu0 %7034, %v6493_v50  }
 0x3b4   : > { %2086 = vperm.xlu1 %7033, %v6494_v6  }
 0x3b7   : > { %2091 = vperm.xlu0 %7034, %v6495_v9  }
 0x3b8   : > { %2096 = vperm.xlu1 %7033, %v6496_v49  }
 0x3bb   : > { %7056 = vrot.lane.b32.xlu0 %v7320_v4, %s7326_s19 }
 0x3bc   : > { %2361 = vrot.lane.b32.xlu1 %v7320_v4, %s7326_s19 }
 0x3e9   : > { %v1753_v12 = vpop.permute.xlu0 %1752 }
 0x3ea   : > { %v1755_v60 = vpop.permute.xlu1 %1754  ;;  %v1775_v61 = vsel %vm1774_vm6, %v7048_v11, %v1753_v12 }
 0x3eb   : > { %v1776_v44 = vsel %vm1774_vm6, %v1753_v12, %v1755_v60 }
 0x3ec   : > { %1803 = vmatprep.subr.bf16.mxu1 %v1776_v44 }
 0x3ed   : > { %1804 = vmatpush1.bf16.msra.mxu1 %v1775_v61 }
 0x3f1   : > { %v1759_v63 = vpop.permute.xlu1 %1758 }
 0x3f2   : > { %v1761_v0 = vpop.permute.xlu0 %1760  ;;  %v1777_v10 = vsel %vm1774_vm6, %v7049_v62, %v1759_v63 }
 0x3f3   : > { %v1778_v1 = vsel %vm1774_vm6, %v1759_v63, %v1761_v0 }
 0x3f4   : > { %1805 = vmatprep.subr.bf16.mxu1 %v1778_v1 }
 0x3f5   : > { %1806 = vmatpush1.bf16.msra.mxu1 %v1777_v10 }
 0x3f9   : > { %v1765_v40 = vpop.permute.xlu1 %1764 }
 0x3fa   : > { %v1767_v36 = vpop.permute.xlu0 %1766  ;;  %v1779_v7 = vsel %vm1774_vm6, %v1763_v59, %v1765_v40 }
 0x3fb   : > { %v1780_v54 = vsel %vm1774_vm6, %v1765_v40, %v1767_v36 }
 0x3fc   : > { %1807 = vmatprep.subr.bf16.mxu1 %v1780_v54 }
 0x3fd   : > { %1808 = vmatpush1.bf16.msra.mxu1 %v1779_v7 }
 0x401   : > { %v1771_v13 = vpop.permute.xlu0 %1770 }
 0x402   : > { %v1773_v26 = vpop.permute.xlu1 %1772 }
 0x403   : > { %v1782_v51 = vsel %vm1774_vm6, %v1771_v13, %v1773_v26 }
 0x404   : > { %1809 = vmatprep.subr.bf16.mxu1 %v1782_v51 }
 0x405   : > { %v1769_v45 = vpop.permute.xlu0 %1768 }
 0x406   : > { %v1781_v14 = vsel %vm1774_vm6, %v1769_v45, %v1771_v13  ;;  %v1911_v15 = vpop.permute.xlu1 %1910  ;;  %vm5368_vm6 = vcmask 64512  }
 0x407   : > { %1810 = vmatpush1.bf16.msra.mxu1 %v1781_v14 }
 0x409   : > { %v7052_v56 = vpop.permute.xlu0 %7051 }
 0x40a   : > { %v7054_v16 = vunpack.i.h.bf16 %v7052_v56  ;;  %v7053_v34 = vunpack.i.l.bf16 %v7052_v56  ;;  %v1909_v35 = vpop.permute.xlu1 %1908  ;;  %6477 = vmatmul.mubr.msk.bf16.vlgmr.msra.gmra.mrb[0].mxu1 %vm1035_vm5, %v7139_v43 }
 0x40b   : > { %1845 = vmatprep.mubr.bf16.mxu1 %v7320_v4  ;;  %v1933_v37 = vsel %vm709_vm2, %v1909_v35, %v1911_v15 }
 0x40c   : > { %v1934_v19 = vsel %vm709_vm2, %v1911_v15, %v7053_v34 }
 0x40d   : > { %v1917_v46 = vpop.permute.xlu0 %1916  ;;  %1961 = vmatprep.subr.bf16.mxu1 %v1934_v19 }
 0x40e   : > { %v1915_v20 = vpop.permute.xlu1 %1914  ;;  %1962 = vmatpush1.bf16.msra.mxu1 %v1933_v37  ;;  %v1936_v21 = vsel %vm709_vm2, %v1917_v46, %v7054_v16 }
 0x40f   : > { %1963 = vmatprep.subr.bf16.mxu1 %v1936_v21  ;;  %v1935_v5 = vsel %vm709_vm2, %v1915_v20, %v1917_v46 }
 0x411   : > { %v1923_v39 = vpop.permute.xlu0 %1922 }
 0x412   : > { %v1925_v57 = vpop.permute.xlu1 %1924  ;;  %6478 = vmatmul.mubr.msk.bf16.gmra.mrb[4].mxu1 %vm1035_vm5, %v7140_v22 }
 0x413   : > { %1964 = vmatpush1.bf16.msra.mxu1 %v1935_v5  ;;  %v1938_v52 = vsel %vm709_vm2, %v1923_v39, %v1925_v57  ;;  %1855 = vmatprep.mubr.bf16.mxu1 %v7320_v4 }
 0x414   : > { %1965 = vmatprep.subr.bf16.mxu1 %v1938_v52 }
 0x415   : > { %v1921_v47 = vpop.permute.xlu0 %1920 }
 0x416   : > { %v1937_v48 = vsel %vm709_vm2, %v1921_v47, %v1923_v39  ;;  %v1929_v58 = vpop.permute.xlu1 %1928 }
 0x417   : > { %1966 = vmatpush1.bf16.msra.mxu1 %v1937_v48 }
 0x419   : > { %v1931_v18 = vpop.permute.xlu0 %1930 }
 0x41a   : > { %v1927_v23 = vpop.permute.xlu1 %1926  ;;  %6479 = vmatmul.mubr.msk.bf16.gmra.mrb[8].mxu1 %vm1035_vm5, %v7141_v53  ;;  %v1940_v27 = vsel %vm709_vm2, %v1929_v58, %v1931_v18 }
 0x41b   : > { %v1939_v28 = vsel %vm709_vm2, %v1927_v23, %v1929_v58  ;;  %1967 = vmatprep.subr.bf16.mxu1 %v1940_v27  ;;  %1865 = vmatprep.mubr.bf16.mxu1 %v7320_v4 }
 0x41c   : > { %1968 = vmatpush1.bf16.msra.mxu1 %v1939_v28 }
 0x422   : > { %6480 = vmatmul.mubr.msk.bf16.gmra.mrb[12].mxu1 %vm1035_vm5, %v7142_v17 }
 0x423   : > { %1993 = vmatprep.mubr.bf16.mxu1 %v7320_v4 }
 0x42a   : > { %6485 = vmatmul.mubr.msk.bf16.vlgmr.msra.gmra.mrb[0].mxu1 %vm1035_vm5, %v7143_v30  ;;  %v2062_v33 = vpop.permute.xlu0 %2061 }
 0x42b   : > { %2003 = vmatprep.mubr.bf16.mxu1 %v7320_v4  ;;  %v2067_v50 = vpop.permute.xlu1 %2066 }
 0x42e   : > { %v2072_v63 = vpop.permute.xlu0 %2071 }
 0x42f   : > { %v2077_v7 = vpop.permute.xlu1 %2076 }
 0x432   : > { %6486 = vmatmul.mubr.msk.bf16.gmra.mrb[4].mxu1 %vm1035_vm5, %v7144_v55  ;;  %v2082_v37 = vpop.permute.xlu0 %2081 }
 0x433   : > { %2013 = vmatprep.mubr.bf16.mxu1 %v7320_v4  ;;  %v2087_v57 = vpop.permute.xlu1 %2086 }
 0x43a   : > { %6487 = vmatmul.mubr.msk.bf16.gmra.mrb[8].mxu1 %vm1035_vm5, %v7145_v41  ;;  %v2092_v41 = vpop.permute.xlu0 %2091 }
 0x43b   : > { %2023 = vmatprep.mubr.bf16.mxu1 %v7320_v4 }
 0x442   : > { %6488 = vmatmul.mubr.msk.bf16.gmra.mrb[12].mxu1 %vm1035_vm5, %v7146_v32 }
 0x443   : > { %2875 = vmatprep.mubr.bf16.mxu1 %v7320_v4 }
 0x4fd   : > { %v1995_v31 = vpop.f32.mrb[0].mxu1 }
 0x4fe   : > { %v2099_v42 = vadd.f32 %v2062_v33, %v1995_v31  ;;  %v1997_v29 = vpop.f32.mrb[1].mxu1 }
 0x4ff   : > { %v2100_v6 = vadd.f32 %v2062_v33, %v1997_v29  ;;  %v1999_v9 = vpop.f32.mrb[2].mxu1 }
 0x500   : > { %v2115_v49 = vmul.f32 0.2, %v2099_v42  ;;  %v2101_v38 = vadd.f32 %v2067_v50, %v1999_v9  ;;  %v2001_v59 = vpop.f32.mrb[3].mxu1 }
 0x501   : > { %v2116_v11 = vmul.f32 0.2, %v2100_v6  ;;  %v2102_v12 = vadd.f32 %v2067_v50, %v2001_v59 }
 0x502   : > { %v2117_v60 = vmul.f32 0.2, %v2101_v38  ;;  %v2131_v61 = vmax.f32 %v2099_v42, %v2115_v49 }
 0x503   : > { %v2118_v44 = vmul.f32 0.2, %v2102_v12  ;;  %v2132_v0 = vmax.f32 %v2100_v6, %v2116_v11  ;;  %v2097_v6 = vpop.permute.xlu1 %2096 }
 0x504   : > { %v2133_v62 = vmax.f32 %v2101_v38, %v2117_v60 }
 0x505   : > { %v2134_v1 = vmax.f32 %v2102_v12, %v2118_v44  ;;  %v2005_v10 = vpop.f32.mrb[4].mxu1 }
 0x506   : > { %v8018_v40 = vpack.c.bf16 %v2133_v62, %v2131_v61  ;;  %v2103_v36 = vadd.f32 %v2072_v63, %v2005_v10  ;;  %v2007_v54 = vpop.f32.mrb[5].mxu1 }
 0x507   : > { %v8020_v13 = vpack.c.bf16 %v2134_v1, %v2132_v0  ;;  %v2104_v26 = vadd.f32 %v2072_v63, %v2007_v54  ;;  %v2009_v51 = vpop.f32.mrb[6].mxu1 }
 0x508   : > { %v2119_v45 = vmul.f32 0.2, %v2103_v36  ;;  %v2105_v14 = vadd.f32 %v2077_v7, %v2009_v51  ;;  %2351 = vrot.lane.b32.xlu0 %v8018_v40, %s7326_s19  ;;  %v2011_v15 = vpop.f32.mrb[7].mxu1  ;;  %v7149_v51 = vld [vmem:[#allocation5 + $0xf0] sm:$0xff]  }
 0x509   : > { %v2120_v43 = vmul.f32 0.2, %v2104_v26  ;;  %v2106_v56 = vadd.f32 %v2077_v7, %v2011_v15  ;;  %2353 = vrot.lane.b32.xlu1 %v8020_v13, %s7326_s19  ;;  %2244 = vmatprep.subr.bf16.mxu0 %v8020_v13  ;;  %v7147_v7 = vld [vmem:[#allocation5 + $0xe0] sm:$0xff]   ;;  %v6524_v15 = vld [vmem:[%s8940_s4 + $0x98] sm:$0xff] }
 0x50a   : > { %v2121_v16 = vmul.f32 0.2, %v2105_v14  ;;  %2245 = vmatpush1.bf16.msra.mxu0 %v8018_v40  ;;  %v2135_v35 = vmax.f32 %v2103_v36, %v2119_v45  ;;  %v6522_v45 = vld [vmem:[%s8940_s4 + $0x88] sm:$0xff] }
 0x50b   : > { %v2122_v34 = vmul.f32 0.2, %v2106_v56  ;;  %v2136_v46 = vmax.f32 %v2104_v26, %v2120_v43  ;;  %v7148_v26 = vld [vmem:[#allocation5 + $0xe8] sm:$0xff]   ;;  %v6525_v43 = vld [vmem:[%s8940_s4 + $0xa0] sm:$0xff] }
 0x50c   : > { %v2137_v19 = vmax.f32 %v2105_v14, %v2121_v16  ;;  %v6523_v14 = vld [vmem:[%s8940_s4 + $0x90] sm:$0xff] }
 0x50d   : > { %v2138_v20 = vmax.f32 %v2106_v56, %v2122_v34  ;;  %v2015_v21 = vpop.f32.mrb[8].mxu1  ;;  %v6526_v56 = vld [vmem:[%s8940_s4 + $0xa8] sm:$0xff]  ;;  %v6527_v16 = vld [vmem:[%s8940_s4 + $0xb0] sm:$0xff]  ;;  %v6528_v34 = vld [vmem:[%s8940_s4 + $0xb8] sm:$0xff] }
 0x50e   : > { %v2149_v22 = vpack.c.bf16 %v2137_v19, %v2135_v35  ;;  %v2107_v39 = vadd.f32 %v2082_v37, %v2015_v21  ;;  %v2017_v5 = vpop.f32.mrb[9].mxu1  ;;  %v7057_v35 = vpop.permute.xlu0 %7056 }
 0x50f   : > { %v2150_v52 = vpack.c.bf16 %v2138_v20, %v2136_v46  ;;  %v2108_v47 = vadd.f32 %v2082_v37, %v2017_v5  ;;  %v2019_v48 = vpop.f32.mrb[10].mxu1  ;;  %v2362_v19 = vpop.permute.xlu1 %2361  ;;  %v7058_v37 = vunpack.i.l.bf16 %v7057_v35 }
 0x510   : > { %v2123_v58 = vmul.f32 0.2, %v2107_v39  ;;  %v2109_v53 = vadd.f32 %v2087_v57, %v2019_v48  ;;  %2357 = vrot.lane.b32.xlu1 %v2149_v22, %s7326_s19  ;;  %v2021_v18 = vpop.f32.mrb[11].mxu1 }
 0x511   : > { %v2124_v23 = vmul.f32 0.2, %v2108_v47  ;;  %v2110_v27 = vadd.f32 %v2087_v57, %v2021_v18  ;;  %2359 = vrot.lane.b32.xlu0 %v2150_v52, %s7326_s19  ;;  %2246 = vmatprep.subr.bf16.mxu0 %v2150_v52 }
 0x512   : > { %v2125_v28 = vmul.f32 0.2, %v2109_v53  ;;  %2247 = vmatpush1.bf16.msra.mxu0 %v2149_v22  ;;  %v2139_v30 = vmax.f32 %v2107_v39, %v2123_v58  ;;  %v7059_v39 = vunpack.i.h.bf16 %v7057_v35 }
 0x513   : > { %v2126_v17 = vmul.f32 0.2, %v2110_v27  ;;  %v2140_v32 = vmax.f32 %v2108_v47, %v2124_v23 }
 0x514   : > { %v2141_v55 = vmax.f32 %v2109_v53, %v2125_v28 }
 0x515   : > { %v2142_v33 = vmax.f32 %v2110_v27, %v2126_v17  ;;  %v2025_v31 = vpop.f32.mrb[12].mxu1 }
 0x516   : > { %v2151_v42 = vpack.c.bf16 %v2141_v55, %v2139_v30  ;;  %v2111_v29 = vadd.f32 %v2092_v41, %v2025_v31  ;;  %v2027_v50 = vpop.f32.mrb[13].mxu1 }
 0x517   : > { %v2152_v9 = vpack.c.bf16 %v2142_v33, %v2140_v32  ;;  %v2112_v49 = vadd.f32 %v2092_v41, %v2027_v50  ;;  %v2029_v38 = vpop.f32.mrb[14].mxu1  ;;  %v7151_v41 = vld [vmem:[#allocation5 + $0xc0] sm:$0xff]  }
 0x518   : > { %v2127_v59 = vmul.f32 0.2, %v2111_v29  ;;  %v2113_v11 = vadd.f32 %v2097_v6, %v2029_v38  ;;  %2363 = vrot.lane.b32.xlu1 %v2151_v42, %s7326_s19  ;;  %v2031_v12 = vpop.f32.mrb[15].mxu1  ;;  %v7152_v38 = vld [vmem:[#allocation5 + $0xc8] sm:$0xff]  }
 0x519   : > { %v2128_v60 = vmul.f32 0.2, %v2112_v49  ;;  %v2114_v44 = vadd.f32 %v2097_v6, %v2031_v12  ;;  %2365 = vrot.lane.b32.xlu0 %v2152_v9, %s7326_s19  ;;  %2248 = vmatprep.subr.bf16.mxu0 %v2152_v9 }
 0x51a   : > { %v2129_v61 = vmul.f32 0.2, %v2113_v11  ;;  %2249 = vmatpush1.bf16.msra.mxu0 %v2151_v42  ;;  %v2143_v63 = vmax.f32 %v2111_v29, %v2127_v59 }
 0x51b   : > { %v2130_v62 = vmul.f32 0.2, %v2114_v44  ;;  %v2144_v1 = vmax.f32 %v2112_v49, %v2128_v60 }
 0x51c   : > { %v2145_v0 = vmax.f32 %v2113_v11, %v2129_v61 }
 0x51d   : > { %v2146_v10 = vmax.f32 %v2114_v44, %v2130_v62 }
 0x51e   : > { %v2153_v36 = vpack.c.bf16 %v2145_v0, %v2143_v63  ;;  %v7153_v63 = vld [vmem:[#allocation5 + $0xd0] sm:$0xff]  }
 0x51f   : > { %v2154_v54 = vpack.c.bf16 %v2146_v10, %v2144_v1 }
 0x520   : > { %2369 = vrot.lane.b32.xlu0 %v2153_v36, %s7326_s19 }
 0x521   : > { %2371 = vrot.lane.b32.xlu1 %v2154_v54, %s7326_s19  ;;  %2250 = vmatprep.subr.bf16.mxu0 %v2154_v54 }
 0x522   : > { %2251 = vmatpush1.bf16.msra.mxu0 %v2153_v36 }
 0x524   : > { %2367 = vrot.lane.b32.xlu0 %v7320_v4, %s7326_s19  ;;  %s7330_s19 = smov 5  }
 0x525   : > { %2509 = vrot.lane.b32.xlu1 %v8020_v13, %s7327_s20  ;;  %6501 = vmatmul.mubr.msk.bf16.vlgmr.msra.gmra.mrb[16].mxu0 %vm1035_vm5, %v7147_v7  ;;  %v7150_v13 = vld [vmem:[#allocation5 + $0xf8] sm:$0xff]   ;;  %v7155_v7 = vld [vmem:[#allocation5 + $0x100] sm:$0xff]  }
 0x526   : > { %2286 = vmatprep.mubr.bf16.mxu0 %v7320_v4 }
 0x528   : > { %7061 = vrot.lane.b32.xlu0 %v7320_v4, %s7327_s20 }
 0x529   : > { %2507 = vrot.lane.b32.xlu1 %v8018_v40, %s7327_s20  ;;  %v6521_v40 = vld [vmem:[%s8940_s4 + $0x80] sm:$0xff] }
 0x52c   : > { %2515 = vrot.lane.b32.xlu0 %v2150_v52, %s7327_s20 }
 0x52d   : > { %2513 = vrot.lane.b32.xlu1 %v2149_v22, %s7327_s20  ;;  %6502 = vmatmul.mubr.msk.bf16.gmra.mrb[20].mxu0 %vm1035_vm5, %v7148_v26  ;;  %v7156_v26 = vld [vmem:[#allocation5 + $0x108] sm:$0xff]  }
 0x52e   : > { %2296 = vmatprep.mubr.bf16.mxu0 %v7320_v4 }
 0x530   : > { %2521 = vrot.lane.b32.xlu0 %v2152_v9, %s7327_s20 }
 0x531   : > { %2523 = vrot.lane.b32.xlu1 %v7320_v4, %s7327_s20 }
 0x534   : > { %2519 = vrot.lane.b32.xlu0 %v2151_v42, %s7327_s20 }
 0x535   : > { %2527 = vrot.lane.b32.xlu1 %v2154_v54, %s7327_s20  ;;  %6503 = vmatmul.mubr.msk.bf16.gmra.mrb[24].mxu0 %vm1035_vm5, %v7149_v51  ;;  %v7154_v54 = vld [vmem:[#allocation5 + $0xd8] sm:$0xff]   ;;  %v7157_v51 = vld [vmem:[#allocation5 + $0x110] sm:$0xff]  }
 0x536   : > { %2306 = vmatprep.mubr.bf16.mxu0 %v7320_v4 }
 0x538   : > { %2529 = vrot.lane.b32.xlu0 %v7320_v4, %s7327_s20 }
 0x539   : > { %2525 = vrot.lane.b32.xlu1 %v2153_v36, %s7327_s20  ;;  %s7331_s20 = smov 123  }
 0x53c   : > { %2660 = vperm.xlu0 %7034, %v6521_v40   ;;  %v7158_v40 = vld [vmem:[#allocation5 + $0x118] sm:$0xff]  }
 0x53d   : > { %2665 = vperm.xlu1 %7033, %v6522_v45   ;;  %6504 = vmatmul.mubr.msk.bf16.gmra.mrb[28].mxu0 %vm1035_vm5, %v7150_v13 }
 0x53e   : > { %2434 = vmatprep.mubr.bf16.mxu0 %v7320_v4 }
 0x540   : > { %2670 = vperm.xlu0 %7034, %v6523_v14  }
 0x541   : > { %2675 = vperm.xlu1 %7033, %v6524_v15  }
 0x544   : > { %2680 = vperm.xlu0 %7034, %v6525_v43  }
 0x545   : > { %2685 = vperm.xlu1 %7033, %v6526_v56  }
 0x548   : > { %2690 = vperm.xlu0 %7034, %v6527_v16  }
 0x549   : > { %2695 = vperm.xlu1 %7033, %v6528_v34  }
 0x54c   : > { %7066 = vrot.lane.b32.xlu0 %v7320_v4, %s7328_s10 }
 0x54d   : > { %2960 = vrot.lane.b32.xlu1 %v7320_v4, %s7328_s10 }
 0x57a   : > { %v2352_v46 = vpop.permute.xlu0 %2351 }
 0x57b   : > { %v2354_v20 = vpop.permute.xlu1 %2353  ;;  %v2374_v22 = vsel %vm2373_vm7, %v7058_v37, %v2352_v46 }
 0x57c   : > { %v2375_v21 = vsel %vm2373_vm7, %v2352_v46, %v2354_v20 }
 0x57d   : > { %2402 = vmatprep.subr.bf16.mxu0 %v2375_v21 }
 0x57e   : > { %2403 = vmatpush1.bf16.msra.mxu0 %v2374_v22 }
 0x582   : > { %v2358_v5 = vpop.permute.xlu1 %2357 }
 0x583   : > { %v2360_v57 = vpop.permute.xlu0 %2359  ;;  %v2376_v47 = vsel %vm2373_vm7, %v7059_v39, %v2358_v5 }
 0x584   : > { %v2377_v52 = vsel %vm2373_vm7, %v2358_v5, %v2360_v57 }
 0x585   : > { %2404 = vmatprep.subr.bf16.mxu0 %v2377_v52 }
 0x586   : > { %2405 = vmatpush1.bf16.msra.mxu0 %v2376_v47 }
 0x58a   : > { %v2364_v48 = vpop.permute.xlu1 %2363 }
 0x58b   : > { %v2366_v58 = vpop.permute.xlu0 %2365  ;;  %v2378_v18 = vsel %vm2373_vm7, %v2362_v19, %v2364_v48 }
 0x58c   : > { %v2379_v53 = vsel %vm2373_vm7, %v2364_v48, %v2366_v58 }
 0x58d   : > { %2406 = vmatprep.subr.bf16.mxu0 %v2379_v53 }
 0x58e   : > { %2407 = vmatpush1.bf16.msra.mxu0 %v2378_v18 }
 0x592   : > { %v2370_v23 = vpop.permute.xlu0 %2369 }
 0x593   : > { %v2372_v27 = vpop.permute.xlu1 %2371 }
 0x594   : > { %v2381_v28 = vsel %vm2373_vm7, %v2370_v23, %v2372_v27 }
 0x595   : > { %2408 = vmatprep.subr.bf16.mxu0 %v2381_v28 }
 0x596   : > { %v2368_v17 = vpop.permute.xlu0 %2367 }
 0x597   : > { %v2380_v30 = vsel %vm2373_vm7, %v2368_v17, %v2370_v23  ;;  %v2510_v55 = vpop.permute.xlu1 %2509  ;;  %vm5526_vm7 = vcmask 982016  }
 0x598   : > { %2409 = vmatpush1.bf16.msra.mxu0 %v2380_v30 }
 0x59a   : > { %v7062_v32 = vpop.permute.xlu0 %7061 }
 0x59b   : > { %v7064_v33 = vunpack.i.h.bf16 %v7062_v32  ;;  %v7063_v31 = vunpack.i.l.bf16 %v7062_v32  ;;  %v2508_v42 = vpop.permute.xlu1 %2507  ;;  %6509 = vmatmul.mubr.msk.bf16.vlgmr.msra.gmra.mrb[16].mxu0 %vm1035_vm5, %v7151_v41 }
 0x59c   : > { %2444 = vmatprep.mubr.bf16.mxu0 %v7320_v4  ;;  %v2532_v50 = vsel %vm2531_vm8, %v2508_v42, %v2510_v55 }
 0x59d   : > { %v2533_v29 = vsel %vm2531_vm8, %v2510_v55, %v7063_v31 }
 0x59e   : > { %v2516_v6 = vpop.permute.xlu0 %2515  ;;  %2560 = vmatprep.subr.bf16.mxu0 %v2533_v29 }
 0x59f   : > { %v2514_v9 = vpop.permute.xlu1 %2513  ;;  %2561 = vmatpush1.bf16.msra.mxu0 %v2532_v50  ;;  %v2535_v49 = vsel %vm2531_vm8, %v2516_v6, %v7064_v33 }
 0x5a0   : > { %2562 = vmatprep.subr.bf16.mxu0 %v2535_v49  ;;  %v2534_v11 = vsel %vm2531_vm8, %v2514_v9, %v2516_v6 }
 0x5a2   : > { %v2522_v59 = vpop.permute.xlu0 %2521 }
 0x5a3   : > { %v2524_v12 = vpop.permute.xlu1 %2523  ;;  %6510 = vmatmul.mubr.msk.bf16.gmra.mrb[20].mxu0 %vm1035_vm5, %v7152_v38 }
 0x5a4   : > { %2563 = vmatpush1.bf16.msra.mxu0 %v2534_v11  ;;  %v2537_v60 = vsel %vm2531_vm8, %v2522_v59, %v2524_v12  ;;  %2454 = vmatprep.mubr.bf16.mxu0 %v7320_v4 }
 0x5a5   : > { %2564 = vmatprep.subr.bf16.mxu0 %v2537_v60 }
 0x5a6   : > { %v2520_v44 = vpop.permute.xlu0 %2519 }
 0x5a7   : > { %v2536_v61 = vsel %vm2531_vm8, %v2520_v44, %v2522_v59  ;;  %v2528_v62 = vpop.permute.xlu1 %2527 }
 0x5a8   : > { %2565 = vmatpush1.bf16.msra.mxu0 %v2536_v61 }
 0x5aa   : > { %v2530_v0 = vpop.permute.xlu0 %2529 }
 0x5ab   : > { %v2526_v1 = vpop.permute.xlu1 %2525  ;;  %6511 = vmatmul.mubr.msk.bf16.gmra.mrb[24].mxu0 %vm1035_vm5, %v7153_v63  ;;  %v2539_v10 = vsel %vm2531_vm8, %v2528_v62, %v2530_v0 }
 0x5ac   : > { %v2538_v36 = vsel %vm2531_vm8, %v2526_v1, %v2528_v62  ;;  %2566 = vmatprep.subr.bf16.mxu0 %v2539_v10  ;;  %2464 = vmatprep.mubr.bf16.mxu0 %v7320_v4 }
 0x5ad   : > { %2567 = vmatpush1.bf16.msra.mxu0 %v2538_v36 }
 0x5b3   : > { %6512 = vmatmul.mubr.msk.bf16.gmra.mrb[28].mxu0 %vm1035_vm5, %v7154_v54 }
 0x5b4   : > { %2592 = vmatprep.mubr.bf16.mxu0 %v7320_v4 }
 0x5bb   : > { %6517 = vmatmul.mubr.msk.bf16.vlgmr.msra.gmra.mrb[16].mxu0 %vm1035_vm5, %v7155_v7  ;;  %v2661_v13 = vpop.permute.xlu0 %2660 }
 0x5bc   : > { %2602 = vmatprep.mubr.bf16.mxu0 %v7320_v4  ;;  %v2666_v43 = vpop.permute.xlu1 %2665 }
 0x5bf   : > { %v2671_v5 = vpop.permute.xlu0 %2670 }
 0x5c0   : > { %v2676_v18 = vpop.permute.xlu1 %2675 }
 0x5c3   : > { %6518 = vmatmul.mubr.msk.bf16.gmra.mrb[20].mxu0 %vm1035_vm5, %v7156_v26  ;;  %v2681_v50 = vpop.permute.xlu0 %2680 }
 0x5c4   : > { %2612 = vmatprep.mubr.bf16.mxu0 %v7320_v4  ;;  %v2686_v12 = vpop.permute.xlu1 %2685 }
 0x5cb   : > { %6519 = vmatmul.mubr.msk.bf16.gmra.mrb[24].mxu0 %vm1035_vm5, %v7157_v51  ;;  %v2691_v51 = vpop.permute.xlu0 %2690 }
 0x5cc   : > { %2622 = vmatprep.mubr.bf16.mxu0 %v7320_v4 }
 0x5d3   : > { %6520 = vmatmul.mubr.msk.bf16.gmra.mrb[28].mxu0 %vm1035_vm5, %v7158_v40 }
 0x5d4   : > { %3474 = vmatprep.mubr.bf16.mxu0 %v7320_v4 }
 0x68e   : > { %v2594_v45 = vpop.f32.mrb[16].mxu0 }
 0x68f   : > { %v2698_v14 = vadd.f32 %v2661_v13, %v2594_v45  ;;  %v2596_v15 = vpop.f32.mrb[17].mxu0 }
 0x690   : > { %v2699_v56 = vadd.f32 %v2661_v13, %v2596_v15  ;;  %v2598_v16 = vpop.f32.mrb[18].mxu0 }
 0x691   : > { %v2714_v34 = vmul.f32 0.2, %v2698_v14  ;;  %v2700_v35 = vadd.f32 %v2666_v43, %v2598_v16  ;;  %v2600_v19 = vpop.f32.mrb[19].mxu0 }
 0x692   : > { %v2715_v37 = vmul.f32 0.2, %v2699_v56  ;;  %v2701_v46 = vadd.f32 %v2666_v43, %v2600_v19 }
 0x693   : > { %v2716_v20 = vmul.f32 0.2, %v2700_v35  ;;  %v2730_v22 = vmax.f32 %v2698_v14, %v2714_v34 }
 0x694   : > { %v2717_v21 = vmul.f32 0.2, %v2701_v46  ;;  %v2731_v57 = vmax.f32 %v2699_v56, %v2715_v37  ;;  %v2696_v56 = vpop.permute.xlu1 %2695 }
 0x695   : > { %v2732_v39 = vmax.f32 %v2700_v35, %v2716_v20 }
 0x696   : > { %v2733_v52 = vmax.f32 %v2701_v46, %v2717_v21  ;;  %v2604_v47 = vpop.f32.mrb[20].mxu0 }
 0x697   : > { %v8109_v48 = vpack.c.bf16 %v2732_v39, %v2730_v22  ;;  %v2702_v58 = vadd.f32 %v2671_v5, %v2604_v47  ;;  %v2606_v53 = vpop.f32.mrb[21].mxu0 }
 0x698   : > { %v8111_v23 = vpack.c.bf16 %v2733_v52, %v2731_v57  ;;  %v2703_v27 = vadd.f32 %v2671_v5, %v2606_v53  ;;  %v2608_v28 = vpop.f32.mrb[22].mxu0 }
 0x699   : > { %v2718_v17 = vmul.f32 0.2, %v2702_v58  ;;  %v2704_v30 = vadd.f32 %v2676_v18, %v2608_v28  ;;  %2950 = vrot.lane.b32.xlu0 %v8109_v48, %s7328_s10  ;;  %v2610_v55 = vpop.f32.mrb[23].mxu0  ;;  %v7161_v28 = vld [vmem:[#allocation5 + $0x150] sm:$0xff]  }
 0x69a   : > { %v2719_v41 = vmul.f32 0.2, %v2703_v27  ;;  %v2705_v32 = vadd.f32 %v2676_v18, %v2610_v55  ;;  %2952 = vrot.lane.b32.xlu1 %v8111_v23, %s7328_s10  ;;  %2843 = vmatprep.subr.bf16.mxu1 %v8111_v23  ;;  %v7159_v18 = vld [vmem:[#allocation5 + $0x140] sm:$0xff]   ;;  %v6556_v55 = vld [vmem:[%s8940_s4 + $0xd8] sm:$0xff] }
 0x69b   : > { %v2720_v33 = vmul.f32 0.2, %v2704_v30  ;;  %2844 = vmatpush1.bf16.msra.mxu1 %v8109_v48  ;;  %v2734_v42 = vmax.f32 %v2702_v58, %v2718_v17  ;;  %v6554_v17 = vld [vmem:[%s8940_s4 + $0xc8] sm:$0xff] }
 0x69c   : > { %v2721_v31 = vmul.f32 0.2, %v2705_v32  ;;  %v2735_v6 = vmax.f32 %v2703_v27, %v2719_v41  ;;  %v7160_v27 = vld [vmem:[#allocation5 + $0x148] sm:$0xff]   ;;  %v6557_v41 = vld [vmem:[%s8940_s4 + $0xe0] sm:$0xff] }
 0x69d   : > { %v2736_v29 = vmax.f32 %v2704_v30, %v2720_v33  ;;  %v6555_v30 = vld [vmem:[%s8940_s4 + $0xd0] sm:$0xff] }
 0x69e   : > { %v2737_v9 = vmax.f32 %v2705_v32, %v2721_v31  ;;  %v2614_v49 = vpop.f32.mrb[24].mxu0  ;;  %v6558_v32 = vld [vmem:[%s8940_s4 + $0xe8] sm:$0xff]  ;;  %v6559_v33 = vld [vmem:[%s8940_s4 + $0xf0] sm:$0xff]  ;;  %v6560_v31 = vld [vmem:[%s8940_s4 + $0xf8] sm:$0xff] }
 0x69f   : > { %v2748_v38 = vpack.c.bf16 %v2736_v29, %v2734_v42  ;;  %v2706_v59 = vadd.f32 %v2681_v50, %v2614_v49  ;;  %v2616_v11 = vpop.f32.mrb[25].mxu0  ;;  %v7067_v42 = vpop.permute.xlu0 %7066 }
 0x6a0   : > { %v2749_v60 = vpack.c.bf16 %v2737_v9, %v2735_v6  ;;  %v2707_v44 = vadd.f32 %v2681_v50, %v2616_v11  ;;  %v2618_v61 = vpop.f32.mrb[26].mxu0  ;;  %v2961_v29 = vpop.permute.xlu1 %2960  ;;  %v7068_v50 = vunpack.i.l.bf16 %v7067_v42 }
 0x6a1   : > { %v2722_v62 = vmul.f32 0.2, %v2706_v59  ;;  %v2708_v63 = vadd.f32 %v2686_v12, %v2618_v61  ;;  %2956 = vrot.lane.b32.xlu1 %v2748_v38, %s7328_s10  ;;  %v2620_v0 = vpop.f32.mrb[27].mxu0 }
 0x6a2   : > { %v2723_v1 = vmul.f32 0.2, %v2707_v44  ;;  %v2709_v10 = vadd.f32 %v2686_v12, %v2620_v0  ;;  %2958 = vrot.lane.b32.xlu0 %v2749_v60, %s7328_s10  ;;  %2845 = vmatprep.subr.bf16.mxu1 %v2749_v60 }
 0x6a3   : > { %v2724_v36 = vmul.f32 0.2, %v2708_v63  ;;  %2846 = vmatpush1.bf16.msra.mxu1 %v2748_v38  ;;  %v2738_v7 = vmax.f32 %v2706_v59, %v2722_v62  ;;  %v7069_v59 = vunpack.i.h.bf16 %v7067_v42 }
 0x6a4   : > { %v2725_v54 = vmul.f32 0.2, %v2709_v10  ;;  %v2739_v40 = vmax.f32 %v2707_v44, %v2723_v1 }
 0x6a5   : > { %v2740_v26 = vmax.f32 %v2708_v63, %v2724_v36 }
 0x6a6   : > { %v2741_v13 = vmax.f32 %v2709_v10, %v2725_v54  ;;  %v2624_v45 = vpop.f32.mrb[28].mxu0 }
 0x6a7   : > { %v2750_v14 = vpack.c.bf16 %v2740_v26, %v2738_v7  ;;  %v2710_v15 = vadd.f32 %v2691_v51, %v2624_v45  ;;  %v2626_v43 = vpop.f32.mrb[29].mxu0 }
 0x6a8   : > { %v2751_v16 = vpack.c.bf16 %v2741_v13, %v2739_v40  ;;  %v2711_v34 = vadd.f32 %v2691_v51, %v2626_v43  ;;  %v2628_v35 = vpop.f32.mrb[30].mxu0  ;;  %v7163_v51 = vld [vmem:[#allocation5 + $0x120] sm:$0xff]  }
 0x6a9   : > { %v2726_v19 = vmul.f32 0.2, %v2710_v15  ;;  %v2712_v37 = vadd.f32 %v2696_v56, %v2628_v35  ;;  %2962 = vrot.lane.b32.xlu1 %v2750_v14, %s7328_s10  ;;  %v2630_v46 = vpop.f32.mrb[31].mxu0  ;;  %v7164_v35 = vld [vmem:[#allocation5 + $0x128] sm:$0xff]  }
 0x6aa   : > { %v2727_v20 = vmul.f32 0.2, %v2711_v34  ;;  %v2713_v21 = vadd.f32 %v2696_v56, %v2630_v46  ;;  %2964 = vrot.lane.b32.xlu0 %v2751_v16, %s7328_s10  ;;  %2847 = vmatprep.subr.bf16.mxu1 %v2751_v16 }
 0x6ab   : > { %v2728_v22 = vmul.f32 0.2, %v2712_v37  ;;  %2848 = vmatpush1.bf16.msra.mxu1 %v2750_v14  ;;  %v2742_v5 = vmax.f32 %v2710_v15, %v2726_v19 }
 0x6ac   : > { %v2729_v39 = vmul.f32 0.2, %v2713_v21  ;;  %v2743_v52 = vmax.f32 %v2711_v34, %v2727_v20 }
 0x6ad   : > { %v2744_v57 = vmax.f32 %v2712_v37, %v2728_v22 }
 0x6ae   : > { %v2745_v47 = vmax.f32 %v2713_v21, %v2729_v39 }
 0x6af   : > { %v2752_v58 = vpack.c.bf16 %v2744_v57, %v2742_v5  ;;  %v7165_v5 = vld [vmem:[#allocation5 + $0x130] sm:$0xff]  }
 0x6b0   : > { %v2753_v53 = vpack.c.bf16 %v2745_v47, %v2743_v52 }
 0x6b1   : > { %2968 = vrot.lane.b32.xlu0 %v2752_v58, %s7328_s10 }
 0x6b2   : > { %2970 = vrot.lane.b32.xlu1 %v2753_v53, %s7328_s10  ;;  %2849 = vmatprep.subr.bf16.mxu1 %v2753_v53 }
 0x6b3   : > { %2850 = vmatpush1.bf16.msra.mxu1 %v2752_v58 }
 0x6b5   : > { %2966 = vrot.lane.b32.xlu0 %v7320_v4, %s7328_s10  ;;  %s7332_s10 = smov 6  }
 0x6b6   : > { %3108 = vrot.lane.b32.xlu1 %v8111_v23, %s7329_s15  ;;  %6533 = vmatmul.mubr.msk.bf16.vlgmr.msra.gmra.mrb[16].mxu1 %vm1035_vm5, %v7159_v18  ;;  %v7162_v23 = vld [vmem:[#allocation5 + $0x158] sm:$0xff]   ;;  %v7167_v18 = vld [vmem:[#allocation5 + $0x160] sm:$0xff]  }
 0x6b7   : > { %2885 = vmatprep.mubr.bf16.mxu1 %v7320_v4 }
 0x6b9   : > { %7071 = vrot.lane.b32.xlu0 %v7320_v4, %s7329_s15 }
 0x6ba   : > { %3106 = vrot.lane.b32.xlu1 %v8109_v48, %s7329_s15  ;;  %v6553_v48 = vld [vmem:[%s8940_s4 + $0xc0] sm:$0xff] }
 0x6bd   : > { %3114 = vrot.lane.b32.xlu0 %v2749_v60, %s7329_s15 }
 0x6be   : > { %3112 = vrot.lane.b32.xlu1 %v2748_v38, %s7329_s15  ;;  %6534 = vmatmul.mubr.msk.bf16.gmra.mrb[20].mxu1 %vm1035_vm5, %v7160_v27  ;;  %v7168_v27 = vld [vmem:[#allocation5 + $0x168] sm:$0xff]  }
 0x6bf   : > { %2895 = vmatprep.mubr.bf16.mxu1 %v7320_v4 }
 0x6c1   : > { %3120 = vrot.lane.b32.xlu0 %v2751_v16, %s7329_s15 }
 0x6c2   : > { %3122 = vrot.lane.b32.xlu1 %v7320_v4, %s7329_s15 }
 0x6c5   : > { %3118 = vrot.lane.b32.xlu0 %v2750_v14, %s7329_s15 }
 0x6c6   : > { %3126 = vrot.lane.b32.xlu1 %v2753_v53, %s7329_s15  ;;  %6535 = vmatmul.mubr.msk.bf16.gmra.mrb[24].mxu1 %vm1035_vm5, %v7161_v28  ;;  %v7166_v53 = vld [vmem:[#allocation5 + $0x138] sm:$0xff]   ;;  %v7169_v28 = vld [vmem:[#allocation5 + $0x170] sm:$0xff]  }
 0x6c7   : > { %2905 = vmatprep.mubr.bf16.mxu1 %v7320_v4 }
 0x6c9   : > { %3128 = vrot.lane.b32.xlu0 %v7320_v4, %s7329_s15 }
 0x6ca   : > { %3124 = vrot.lane.b32.xlu1 %v2752_v58, %s7329_s15  ;;  %s7333_s15 = smov 122  }
 0x6cd   : > { %3259 = vperm.xlu0 %7034, %v6553_v48   ;;  %v7170_v48 = vld [vmem:[#allocation5 + $0x178] sm:$0xff]  }
 0x6ce   : > { %3264 = vperm.xlu1 %7033, %v6554_v17   ;;  %6536 = vmatmul.mubr.msk.bf16.gmra.mrb[28].mxu1 %vm1035_vm5, %v7162_v23 }
 0x6cf   : > { %3033 = vmatprep.mubr.bf16.mxu1 %v7320_v4 }
 0x6d1   : > { %3269 = vperm.xlu0 %7034, %v6555_v30  }
 0x6d2   : > { %3274 = vperm.xlu1 %7033, %v6556_v55  }
 0x6d5   : > { %3279 = vperm.xlu0 %7034, %v6557_v41  }
 0x6d6   : > { %3284 = vperm.xlu1 %7033, %v6558_v32  }
 0x6d9   : > { %3289 = vperm.xlu0 %7034, %v6559_v33  }
 0x6da   : > { %3294 = vperm.xlu1 %7033, %v6560_v31  }
 0x6dd   : > { %7076 = vrot.lane.b32.xlu0 %v7320_v4, %s7330_s19 }
 0x6de   : > { %3559 = vrot.lane.b32.xlu1 %v7320_v4, %s7330_s19 }
 0x70b   : > { %v2951_v6 = vpop.permute.xlu0 %2950 }
 0x70c   : > { %v2953_v9 = vpop.permute.xlu1 %2952  ;;  %v2973_v38 = vsel %vm2972_vm9, %v7068_v50, %v2951_v6 }
 0x70d   : > { %v2974_v49 = vsel %vm2972_vm9, %v2951_v6, %v2953_v9 }
 0x70e   : > { %3001 = vmatprep.subr.bf16.mxu1 %v2974_v49 }
 0x70f   : > { %3002 = vmatpush1.bf16.msra.mxu1 %v2973_v38 }
 0x713   : > { %v2957_v11 = vpop.permute.xlu1 %2956 }
 0x714   : > { %v2959_v12 = vpop.permute.xlu0 %2958  ;;  %v2975_v44 = vsel %vm2972_vm9, %v7069_v59, %v2957_v11 }
 0x715   : > { %v2976_v60 = vsel %vm2972_vm9, %v2957_v11, %v2959_v12 }
 0x716   : > { %3003 = vmatprep.subr.bf16.mxu1 %v2976_v60 }
 0x717   : > { %3004 = vmatpush1.bf16.msra.mxu1 %v2975_v44 }
 0x71b   : > { %v2963_v61 = vpop.permute.xlu1 %2962 }
 0x71c   : > { %v2965_v62 = vpop.permute.xlu0 %2964  ;;  %v2977_v0 = vsel %vm2972_vm9, %v2961_v29, %v2963_v61 }
 0x71d   : > { %v2978_v63 = vsel %vm2972_vm9, %v2963_v61, %v2965_v62 }
 0x71e   : > { %3005 = vmatprep.subr.bf16.mxu1 %v2978_v63 }
 0x71f   : > { %3006 = vmatpush1.bf16.msra.mxu1 %v2977_v0 }
 0x723   : > { %v2969_v1 = vpop.permute.xlu0 %2968 }
 0x724   : > { %v2971_v10 = vpop.permute.xlu1 %2970 }
 0x725   : > { %v2980_v36 = vsel %vm2972_vm9, %v2969_v1, %v2971_v10 }
 0x726   : > { %3007 = vmatprep.subr.bf16.mxu1 %v2980_v36 }
 0x727   : > { %v2967_v54 = vpop.permute.xlu0 %2966 }
 0x728   : > { %v2979_v7 = vsel %vm2972_vm9, %v2967_v54, %v2969_v1  ;;  %v3109_v26 = vpop.permute.xlu1 %3108 }
 0x729   : > { %3008 = vmatpush1.bf16.msra.mxu1 %v2979_v7 }
 0x72b   : > { %v7072_v40 = vpop.permute.xlu0 %7071 }
 0x72c   : > { %v7074_v13 = vunpack.i.h.bf16 %v7072_v40  ;;  %v7073_v45 = vunpack.i.l.bf16 %v7072_v40  ;;  %v3107_v14 = vpop.permute.xlu1 %3106  ;;  %6541 = vmatmul.mubr.msk.bf16.vlgmr.msra.gmra.mrb[16].mxu1 %vm1035_vm5, %v7163_v51 }
 0x72d   : > { %3043 = vmatprep.mubr.bf16.mxu1 %v7320_v4  ;;  %v3131_v43 = vsel %vm3130_vm10, %v3107_v14, %v3109_v26 }
 0x72e   : > { %v3132_v15 = vsel %vm3130_vm10, %v3109_v26, %v7073_v45 }
 0x72f   : > { %v3115_v56 = vpop.permute.xlu0 %3114  ;;  %3159 = vmatprep.subr.bf16.mxu1 %v3132_v15 }
 0x730   : > { %v3113_v16 = vpop.permute.xlu1 %3112  ;;  %3160 = vmatpush1.bf16.msra.mxu1 %v3131_v43  ;;  %v3134_v34 = vsel %vm3130_vm10, %v3115_v56, %v7074_v13 }
 0x731   : > { %3161 = vmatprep.subr.bf16.mxu1 %v3134_v34  ;;  %v3133_v37 = vsel %vm3130_vm10, %v3113_v16, %v3115_v56 }
 0x733   : > { %v3121_v19 = vpop.permute.xlu0 %3120 }
 0x734   : > { %v3123_v46 = vpop.permute.xlu1 %3122  ;;  %6542 = vmatmul.mubr.msk.bf16.gmra.mrb[20].mxu1 %vm1035_vm5, %v7164_v35 }
 0x735   : > { %3162 = vmatpush1.bf16.msra.mxu1 %v3133_v37  ;;  %v3136_v20 = vsel %vm3130_vm10, %v3121_v19, %v3123_v46  ;;  %3053 = vmatprep.mubr.bf16.mxu1 %v7320_v4 }
 0x736   : > { %3163 = vmatprep.subr.bf16.mxu1 %v3136_v20 }
 0x737   : > { %v3119_v21 = vpop.permute.xlu0 %3118 }
 0x738   : > { %v3135_v22 = vsel %vm3130_vm10, %v3119_v21, %v3121_v19  ;;  %v3127_v39 = vpop.permute.xlu1 %3126 }
 0x739   : > { %3164 = vmatpush1.bf16.msra.mxu1 %v3135_v22 }
 0x73b   : > { %v3129_v57 = vpop.permute.xlu0 %3128 }
 0x73c   : > { %v3125_v52 = vpop.permute.xlu1 %3124  ;;  %6543 = vmatmul.mubr.msk.bf16.gmra.mrb[24].mxu1 %vm1035_vm5, %v7165_v5  ;;  %v3138_v47 = vsel %vm3130_vm10, %v3127_v39, %v3129_v57 }
 0x73d   : > { %v3137_v58 = vsel %vm3130_vm10, %v3125_v52, %v3127_v39  ;;  %3165 = vmatprep.subr.bf16.mxu1 %v3138_v47  ;;  %3063 = vmatprep.mubr.bf16.mxu1 %v7320_v4 }
 0x73e   : > { %3166 = vmatpush1.bf16.msra.mxu1 %v3137_v58 }
 0x744   : > { %6544 = vmatmul.mubr.msk.bf16.gmra.mrb[28].mxu1 %vm1035_vm5, %v7166_v53 }
 0x745   : > { %3191 = vmatprep.mubr.bf16.mxu1 %v7320_v4 }
 0x74c   : > { %6549 = vmatmul.mubr.msk.bf16.vlgmr.msra.gmra.mrb[16].mxu1 %vm1035_vm5, %v7167_v18  ;;  %v3260_v23 = vpop.permute.xlu0 %3259 }
 0x74d   : > { %3201 = vmatprep.mubr.bf16.mxu1 %v7320_v4  ;;  %v3265_v41 = vpop.permute.xlu1 %3264 }
 0x750   : > { %v3270_v11 = vpop.permute.xlu0 %3269 }
 0x751   : > { %v3275_v0 = vpop.permute.xlu1 %3274 }
 0x754   : > { %6550 = vmatmul.mubr.msk.bf16.gmra.mrb[20].mxu1 %vm1035_vm5, %v7168_v27  ;;  %v3280_v43 = vpop.permute.xlu0 %3279 }
 0x755   : > { %3211 = vmatprep.mubr.bf16.mxu1 %v7320_v4  ;;  %v3285_v46 = vpop.permute.xlu1 %3284 }
 0x75c   : > { %6551 = vmatmul.mubr.msk.bf16.gmra.mrb[24].mxu1 %vm1035_vm5, %v7169_v28  ;;  %v3290_v28 = vpop.permute.xlu0 %3289 }
 0x75d   : > { %3221 = vmatprep.mubr.bf16.mxu1 %v7320_v4 }
 0x764   : > { %6552 = vmatmul.mubr.msk.bf16.gmra.mrb[28].mxu1 %vm1035_vm5, %v7170_v48 }
 0x765   : > { %4073 = vmatprep.mubr.bf16.mxu1 %v7320_v4 }
 0x81f   : > { %v3193_v17 = vpop.f32.mrb[16].mxu1 }
 0x820   : > { %v3297_v30 = vadd.f32 %v3260_v23, %v3193_v17  ;;  %v3195_v55 = vpop.f32.mrb[17].mxu1 }
 0x821   : > { %v3298_v32 = vadd.f32 %v3260_v23, %v3195_v55  ;;  %v3197_v33 = vpop.f32.mrb[18].mxu1 }
 0x822   : > { %v3313_v31 = vmul.f32 0.2, %v3297_v30  ;;  %v3299_v42 = vadd.f32 %v3265_v41, %v3197_v33  ;;  %v3199_v29 = vpop.f32.mrb[19].mxu1 }
 0x823   : > { %v3314_v50 = vmul.f32 0.2, %v3298_v32  ;;  %v3300_v6 = vadd.f32 %v3265_v41, %v3199_v29 }
 0x824   : > { %v3315_v9 = vmul.f32 0.2, %v3299_v42  ;;  %v3329_v38 = vmax.f32 %v3297_v30, %v3313_v31 }
 0x825   : > { %v3316_v49 = vmul.f32 0.2, %v3300_v6  ;;  %v3330_v12 = vmax.f32 %v3298_v32, %v3314_v50  ;;  %v3295_v32 = vpop.permute.xlu1 %3294 }
 0x826   : > { %v3331_v59 = vmax.f32 %v3299_v42, %v3315_v9 }
 0x827   : > { %v3332_v60 = vmax.f32 %v3300_v6, %v3316_v49  ;;  %v3203_v44 = vpop.f32.mrb[20].mxu1 }
 0x828   : > { %v8200_v61 = vpack.c.bf16 %v3331_v59, %v3329_v38  ;;  %v3301_v62 = vadd.f32 %v3270_v11, %v3203_v44  ;;  %v3205_v63 = vpop.f32.mrb[21].mxu1 }
 0x829   : > { %v8202_v1 = vpack.c.bf16 %v3332_v60, %v3330_v12  ;;  %v3302_v10 = vadd.f32 %v3270_v11, %v3205_v63  ;;  %v3207_v36 = vpop.f32.mrb[22].mxu1 }
 0x82a   : > { %v3317_v54 = vmul.f32 0.2, %v3301_v62  ;;  %v3303_v7 = vadd.f32 %v3275_v0, %v3207_v36  ;;  %3549 = vrot.lane.b32.xlu0 %v8200_v61, %s7330_s19  ;;  %v3209_v26 = vpop.f32.mrb[23].mxu1  ;;  %v7173_v36 = vld [vmem:[#allocation5 + $0x1b0] sm:$0xff]  }
 0x82b   : > { %v3318_v51 = vmul.f32 0.2, %v3302_v10  ;;  %v3304_v40 = vadd.f32 %v3275_v0, %v3209_v26  ;;  %3551 = vrot.lane.b32.xlu1 %v8202_v1, %s7330_s19  ;;  %3442 = vmatprep.subr.bf16.mxu0 %v8202_v1  ;;  %v7171_v0 = vld [vmem:[#allocation5 + $0x1a0] sm:$0xff]   ;;  %v6588_v26 = vld [vmem:[%s8940_s4 + $0x118] sm:$0xff] }
 0x82c   : > { %v3319_v13 = vmul.f32 0.2, %v3303_v7  ;;  %3443 = vmatpush1.bf16.msra.mxu0 %v8200_v61  ;;  %v3333_v14 = vmax.f32 %v3301_v62, %v3317_v54  ;;  %v6586_v54 = vld [vmem:[%s8940_s4 + $0x108] sm:$0xff] }
 0x82d   : > { %v3320_v45 = vmul.f32 0.2, %v3304_v40  ;;  %v3334_v56 = vmax.f32 %v3302_v10, %v3318_v51  ;;  %v7172_v10 = vld [vmem:[#allocation5 + $0x1a8] sm:$0xff]   ;;  %v6589_v51 = vld [vmem:[%s8940_s4 + $0x120] sm:$0xff] }
 0x82e   : > { %v3335_v15 = vmax.f32 %v3303_v7, %v3319_v13  ;;  %v6587_v7 = vld [vmem:[%s8940_s4 + $0x110] sm:$0xff] }
 0x82f   : > { %v3336_v16 = vmax.f32 %v3304_v40, %v3320_v45  ;;  %v3213_v34 = vpop.f32.mrb[24].mxu1  ;;  %v6590_v40 = vld [vmem:[%s8940_s4 + $0x128] sm:$0xff]  ;;  %v6591_v13 = vld [vmem:[%s8940_s4 + $0x130] sm:$0xff]  ;;  %v6592_v45 = vld [vmem:[%s8940_s4 + $0x138] sm:$0xff] }
 0x830   : > { %v3347_v35 = vpack.c.bf16 %v3335_v15, %v3333_v14  ;;  %v3305_v19 = vadd.f32 %v3280_v43, %v3213_v34  ;;  %v3215_v37 = vpop.f32.mrb[25].mxu1  ;;  %v7077_v14 = vpop.permute.xlu0 %7076 }
 0x831   : > { %v3348_v20 = vpack.c.bf16 %v3336_v16, %v3334_v56  ;;  %v3306_v21 = vadd.f32 %v3280_v43, %v3215_v37  ;;  %v3217_v22 = vpop.f32.mrb[26].mxu1  ;;  %v3560_v15 = vpop.permute.xlu1 %3559  ;;  %v7078_v43 = vunpack.i.l.bf16 %v7077_v14 }
 0x832   : > { %v3321_v39 = vmul.f32 0.2, %v3305_v19  ;;  %v3307_v5 = vadd.f32 %v3285_v46, %v3217_v22  ;;  %3555 = vrot.lane.b32.xlu1 %v3347_v35, %s7330_s19  ;;  %v3219_v57 = vpop.f32.mrb[27].mxu1 }
 0x833   : > { %v3322_v52 = vmul.f32 0.2, %v3306_v21  ;;  %v3308_v47 = vadd.f32 %v3285_v46, %v3219_v57  ;;  %3557 = vrot.lane.b32.xlu0 %v3348_v20, %s7330_s19  ;;  %3444 = vmatprep.subr.bf16.mxu0 %v3348_v20 }
 0x834   : > { %v3323_v58 = vmul.f32 0.2, %v3307_v5  ;;  %3445 = vmatpush1.bf16.msra.mxu0 %v3347_v35  ;;  %v3337_v18 = vmax.f32 %v3305_v19, %v3321_v39  ;;  %v7079_v19 = vunpack.i.h.bf16 %v7077_v14 }
 0x835   : > { %v3324_v53 = vmul.f32 0.2, %v3308_v47  ;;  %v3338_v48 = vmax.f32 %v3306_v21, %v3322_v52 }
 0x836   : > { %v3339_v27 = vmax.f32 %v3307_v5, %v3323_v58 }
 0x837   : > { %v3340_v23 = vmax.f32 %v3308_v47, %v3324_v53  ;;  %v3223_v17 = vpop.f32.mrb[28].mxu1 }
 0x838   : > { %v3349_v30 = vpack.c.bf16 %v3339_v27, %v3337_v18  ;;  %v3309_v55 = vadd.f32 %v3290_v28, %v3223_v17  ;;  %v3225_v41 = vpop.f32.mrb[29].mxu1 }
 0x839   : > { %v3350_v33 = vpack.c.bf16 %v3340_v23, %v3338_v48  ;;  %v3310_v31 = vadd.f32 %v3290_v28, %v3225_v41  ;;  %v3227_v42 = vpop.f32.mrb[30].mxu1  ;;  %v7175_v28 = vld [vmem:[#allocation5 + $0x180] sm:$0xff]  }
 0x83a   : > { %v3325_v29 = vmul.f32 0.2, %v3309_v55  ;;  %v3311_v50 = vadd.f32 %v3295_v32, %v3227_v42  ;;  %3561 = vrot.lane.b32.xlu1 %v3349_v30, %s7330_s19  ;;  %v3229_v6 = vpop.f32.mrb[31].mxu1  ;;  %v7176_v42 = vld [vmem:[#allocation5 + $0x188] sm:$0xff]  }
 0x83b   : > { %v3326_v9 = vmul.f32 0.2, %v3310_v31  ;;  %v3312_v49 = vadd.f32 %v3295_v32, %v3229_v6  ;;  %3563 = vrot.lane.b32.xlu0 %v3350_v33, %s7330_s19  ;;  %3446 = vmatprep.subr.bf16.mxu0 %v3350_v33 }
 0x83c   : > { %v3327_v38 = vmul.f32 0.2, %v3311_v50  ;;  %3447 = vmatpush1.bf16.msra.mxu0 %v3349_v30  ;;  %v3341_v11 = vmax.f32 %v3309_v55, %v3325_v29 }
 0x83d   : > { %v3328_v59 = vmul.f32 0.2, %v3312_v49  ;;  %v3342_v60 = vmax.f32 %v3310_v31, %v3326_v9 }
 0x83e   : > { %v3343_v12 = vmax.f32 %v3311_v50, %v3327_v38 }
 0x83f   : > { %v3344_v44 = vmax.f32 %v3312_v49, %v3328_v59 }
 0x840   : > { %v3351_v62 = vpack.c.bf16 %v3343_v12, %v3341_v11  ;;  %v7177_v11 = vld [vmem:[#allocation5 + $0x190] sm:$0xff]  }
 0x841   : > { %v3352_v63 = vpack.c.bf16 %v3344_v44, %v3342_v60 }
 0x842   : > { %3567 = vrot.lane.b32.xlu0 %v3351_v62, %s7330_s19 }
 0x843   : > { %3569 = vrot.lane.b32.xlu1 %v3352_v63, %s7330_s19  ;;  %3448 = vmatprep.subr.bf16.mxu0 %v3352_v63 }
 0x844   : > { %3449 = vmatpush1.bf16.msra.mxu0 %v3351_v62 }
 0x846   : > { %3565 = vrot.lane.b32.xlu0 %v7320_v4, %s7330_s19  ;;  %s7334_s19 = smov 7  }
 0x847   : > { %3707 = vrot.lane.b32.xlu1 %v8202_v1, %s7331_s20  ;;  %6565 = vmatmul.mubr.msk.bf16.vlgmr.msra.gmra.mrb[32].mxu0 %vm1035_vm5, %v7171_v0  ;;  %v7174_v1 = vld [vmem:[#allocation5 + $0x1b8] sm:$0xff]   ;;  %v7179_v0 = vld [vmem:[#allocation5 + $0x1c0] sm:$0xff]  }
 0x848   : > { %3484 = vmatprep.mubr.bf16.mxu0 %v7320_v4 }
 0x84a   : > { %7081 = vrot.lane.b32.xlu0 %v7320_v4, %s7331_s20 }
 0x84b   : > { %3705 = vrot.lane.b32.xlu1 %v8200_v61, %s7331_s20  ;;  %v6585_v61 = vld [vmem:[%s8940_s4 + $0x100] sm:$0xff] }
 0x84e   : > { %3713 = vrot.lane.b32.xlu0 %v3348_v20, %s7331_s20 }
 0x84f   : > { %3711 = vrot.lane.b32.xlu1 %v3347_v35, %s7331_s20  ;;  %6566 = vmatmul.mubr.msk.bf16.gmra.mrb[36].mxu0 %vm1035_vm5, %v7172_v10  ;;  %v7180_v10 = vld [vmem:[#allocation5 + $0x1c8] sm:$0xff]  }
 0x850   : > { %3494 = vmatprep.mubr.bf16.mxu0 %v7320_v4 }
 0x852   : > { %3719 = vrot.lane.b32.xlu0 %v3350_v33, %s7331_s20 }
 0x853   : > { %3721 = vrot.lane.b32.xlu1 %v7320_v4, %s7331_s20 }
 0x856   : > { %3717 = vrot.lane.b32.xlu0 %v3349_v30, %s7331_s20 }
 0x857   : > { %3725 = vrot.lane.b32.xlu1 %v3352_v63, %s7331_s20  ;;  %6567 = vmatmul.mubr.msk.bf16.gmra.mrb[40].mxu0 %vm1035_vm5, %v7173_v36  ;;  %v7178_v63 = vld [vmem:[#allocation5 + $0x198] sm:$0xff]   ;;  %v7181_v36 = vld [vmem:[#allocation5 + $0x1d0] sm:$0xff]  }
 0x858   : > { %3504 = vmatprep.mubr.bf16.mxu0 %v7320_v4 }
 0x85a   : > { %3727 = vrot.lane.b32.xlu0 %v7320_v4, %s7331_s20 }
 0x85b   : > { %3723 = vrot.lane.b32.xlu1 %v3351_v62, %s7331_s20  ;;  %s7335_s20 = smov 121  }
 0x85e   : > { %3858 = vperm.xlu0 %7034, %v6585_v61   ;;  %v7182_v61 = vld [vmem:[#allocation5 + $0x1d8] sm:$0xff]  }
 0x85f   : > { %3863 = vperm.xlu1 %7033, %v6586_v54   ;;  %6568 = vmatmul.mubr.msk.bf16.gmra.mrb[44].mxu0 %vm1035_vm5, %v7174_v1 }
 0x860   : > { %3632 = vmatprep.mubr.bf16.mxu0 %v7320_v4 }
 0x862   : > { %3868 = vperm.xlu0 %7034, %v6587_v7  }
 0x863   : > { %3873 = vperm.xlu1 %7033, %v6588_v26  }
 0x866   : > { %3878 = vperm.xlu0 %7034, %v6589_v51  }
 0x867   : > { %3883 = vperm.xlu1 %7033, %v6590_v40  }
 0x86a   : > { %3888 = vperm.xlu0 %7034, %v6591_v13  }
 0x86b   : > { %3893 = vperm.xlu1 %7033, %v6592_v45  }
 0x86e   : > { %7086 = vrot.lane.b32.xlu0 %v7320_v4, %s7332_s10 }
 0x86f   : > { %4158 = vrot.lane.b32.xlu1 %v7320_v4, %s7332_s10 }
 0x89c   : > { %v3550_v56 = vpop.permute.xlu0 %3549 }
 0x89d   : > { %v3552_v16 = vpop.permute.xlu1 %3551  ;;  %v3572_v35 = vsel %vm3571_vm11, %v7078_v43, %v3550_v56 }
 0x89e   : > { %v3573_v34 = vsel %vm3571_vm11, %v3550_v56, %v3552_v16 }
 0x89f   : > { %3600 = vmatprep.subr.bf16.mxu0 %v3573_v34 }
 0x8a0   : > { %3601 = vmatpush1.bf16.msra.mxu0 %v3572_v35 }
 0x8a4   : > { %v3556_v37 = vpop.permute.xlu1 %3555 }
 0x8a5   : > { %v3558_v46 = vpop.permute.xlu0 %3557  ;;  %v3574_v21 = vsel %vm3571_vm11, %v7079_v19, %v3556_v37 }
 0x8a6   : > { %v3575_v20 = vsel %vm3571_vm11, %v3556_v37, %v3558_v46 }
 0x8a7   : > { %3602 = vmatprep.subr.bf16.mxu0 %v3575_v20 }
 0x8a8   : > { %3603 = vmatpush1.bf16.msra.mxu0 %v3574_v21 }
 0x8ac   : > { %v3562_v22 = vpop.permute.xlu1 %3561 }
 0x8ad   : > { %v3564_v39 = vpop.permute.xlu0 %3563  ;;  %v3576_v57 = vsel %vm3571_vm11, %v3560_v15, %v3562_v22 }
 0x8ae   : > { %v3577_v5 = vsel %vm3571_vm11, %v3562_v22, %v3564_v39 }
 0x8af   : > { %3604 = vmatprep.subr.bf16.mxu0 %v3577_v5 }
 0x8b0   : > { %3605 = vmatpush1.bf16.msra.mxu0 %v3576_v57 }
 0x8b4   : > { %v3568_v52 = vpop.permute.xlu0 %3567 }
 0x8b5   : > { %v3570_v47 = vpop.permute.xlu1 %3569 }
 0x8b6   : > { %v3579_v58 = vsel %vm3571_vm11, %v3568_v52, %v3570_v47 }
 0x8b7   : > { %3606 = vmatprep.subr.bf16.mxu0 %v3579_v58 }
 0x8b8   : > { %v3566_v53 = vpop.permute.xlu0 %3565 }
 0x8b9   : > { %v3578_v18 = vsel %vm3571_vm11, %v3566_v53, %v3568_v52  ;;  %v3708_v27 = vpop.permute.xlu1 %3707 }
 0x8ba   : > { %3607 = vmatpush1.bf16.msra.mxu0 %v3578_v18 }
 0x8bc   : > { %v7082_v48 = vpop.permute.xlu0 %7081 }
 0x8bd   : > { %v7084_v23 = vunpack.i.h.bf16 %v7082_v48  ;;  %v7083_v17 = vunpack.i.l.bf16 %v7082_v48  ;;  %v3706_v30 = vpop.permute.xlu1 %3705  ;;  %6573 = vmatmul.mubr.msk.bf16.vlgmr.msra.gmra.mrb[32].mxu0 %vm1035_vm5, %v7175_v28 }
 0x8be   : > { %3642 = vmatprep.mubr.bf16.mxu0 %v7320_v4  ;;  %v3730_v41 = vsel %vm3729_vm12, %v3706_v30, %v3708_v27 }
 0x8bf   : > { %v3731_v55 = vsel %vm3729_vm12, %v3708_v27, %v7083_v17 }
 0x8c0   : > { %v3714_v32 = vpop.permute.xlu0 %3713  ;;  %3758 = vmatprep.subr.bf16.mxu0 %v3731_v55 }
 0x8c1   : > { %v3712_v33 = vpop.permute.xlu1 %3711  ;;  %3759 = vmatpush1.bf16.msra.mxu0 %v3730_v41  ;;  %v3733_v31 = vsel %vm3729_vm12, %v3714_v32, %v7084_v23 }
 0x8c2   : > { %3760 = vmatprep.subr.bf16.mxu0 %v3733_v31  ;;  %v3732_v50 = vsel %vm3729_vm12, %v3712_v33, %v3714_v32 }
 0x8c4   : > { %v3720_v29 = vpop.permute.xlu0 %3719 }
 0x8c5   : > { %v3722_v6 = vpop.permute.xlu1 %3721  ;;  %6574 = vmatmul.mubr.msk.bf16.gmra.mrb[36].mxu0 %vm1035_vm5, %v7176_v42 }
 0x8c6   : > { %3761 = vmatpush1.bf16.msra.mxu0 %v3732_v50  ;;  %v3735_v9 = vsel %vm3729_vm12, %v3720_v29, %v3722_v6  ;;  %3652 = vmatprep.mubr.bf16.mxu0 %v7320_v4 }
 0x8c7   : > { %3762 = vmatprep.subr.bf16.mxu0 %v3735_v9 }
 0x8c8   : > { %v3718_v49 = vpop.permute.xlu0 %3717 }
 0x8c9   : > { %v3734_v38 = vsel %vm3729_vm12, %v3718_v49, %v3720_v29  ;;  %v3726_v59 = vpop.permute.xlu1 %3725 }
 0x8ca   : > { %3763 = vmatpush1.bf16.msra.mxu0 %v3734_v38 }
 0x8cc   : > { %v3728_v12 = vpop.permute.xlu0 %3727 }
 0x8cd   : > { %v3724_v60 = vpop.permute.xlu1 %3723  ;;  %6575 = vmatmul.mubr.msk.bf16.gmra.mrb[40].mxu0 %vm1035_vm5, %v7177_v11  ;;  %v3737_v44 = vsel %vm3729_vm12, %v3726_v59, %v3728_v12 }
 0x8ce   : > { %v3736_v62 = vsel %vm3729_vm12, %v3724_v60, %v3726_v59  ;;  %3764 = vmatprep.subr.bf16.mxu0 %v3737_v44  ;;  %3662 = vmatprep.mubr.bf16.mxu0 %v7320_v4 }
 0x8cf   : > { %3765 = vmatpush1.bf16.msra.mxu0 %v3736_v62 }
 0x8d5   : > { %6576 = vmatmul.mubr.msk.bf16.gmra.mrb[44].mxu0 %vm1035_vm5, %v7178_v63 }
 0x8d6   : > { %3790 = vmatprep.mubr.bf16.mxu0 %v7320_v4 }
 0x8dd   : > { %6581 = vmatmul.mubr.msk.bf16.vlgmr.msra.gmra.mrb[32].mxu0 %vm1035_vm5, %v7179_v0  ;;  %v3859_v1 = vpop.permute.xlu0 %3858 }
 0x8de   : > { %3800 = vmatprep.mubr.bf16.mxu0 %v7320_v4  ;;  %v3864_v51 = vpop.permute.xlu1 %3863 }
 0x8e1   : > { %v3869_v37 = vpop.permute.xlu0 %3868 }
 0x8e2   : > { %v3874_v57 = vpop.permute.xlu1 %3873 }
 0x8e5   : > { %6582 = vmatmul.mubr.msk.bf16.gmra.mrb[36].mxu0 %vm1035_vm5, %v7180_v10  ;;  %v3879_v41 = vpop.permute.xlu0 %3878 }
 0x8e6   : > { %3810 = vmatprep.mubr.bf16.mxu0 %v7320_v4  ;;  %v3884_v6 = vpop.permute.xlu1 %3883 }
 0x8ed   : > { %6583 = vmatmul.mubr.msk.bf16.gmra.mrb[40].mxu0 %vm1035_vm5, %v7181_v36  ;;  %v3889_v36 = vpop.permute.xlu0 %3888 }
 0x8ee   : > { %3820 = vmatprep.mubr.bf16.mxu0 %v7320_v4 }
 0x8f5   : > { %6584 = vmatmul.mubr.msk.bf16.gmra.mrb[44].mxu0 %vm1035_vm5, %v7182_v61 }
 0x8f6   : > { %4672 = vmatprep.mubr.bf16.mxu0 %v7320_v4 }
 0x9b0   : > { %v3792_v54 = vpop.f32.mrb[32].mxu0 }
 0x9b1   : > { %v3896_v7 = vadd.f32 %v3859_v1, %v3792_v54  ;;  %v3794_v26 = vpop.f32.mrb[33].mxu0 }
 0x9b2   : > { %v3897_v40 = vadd.f32 %v3859_v1, %v3794_v26  ;;  %v3796_v13 = vpop.f32.mrb[34].mxu0 }
 0x9b3   : > { %v3912_v45 = vmul.f32 0.2, %v3896_v7  ;;  %v3898_v14 = vadd.f32 %v3864_v51, %v3796_v13  ;;  %v3798_v15 = vpop.f32.mrb[35].mxu0 }
 0x9b4   : > { %v3913_v43 = vmul.f32 0.2, %v3897_v40  ;;  %v3899_v56 = vadd.f32 %v3864_v51, %v3798_v15 }
 0x9b5   : > { %v3914_v16 = vmul.f32 0.2, %v3898_v14  ;;  %v3928_v35 = vmax.f32 %v3896_v7, %v3912_v45 }
 0x9b6   : > { %v3915_v34 = vmul.f32 0.2, %v3899_v56  ;;  %v3929_v46 = vmax.f32 %v3897_v40, %v3913_v43  ;;  %v3894_v40 = vpop.permute.xlu1 %3893 }
 0x9b7   : > { %v3930_v19 = vmax.f32 %v3898_v14, %v3914_v16 }
 0x9b8   : > { %v3931_v20 = vmax.f32 %v3899_v56, %v3915_v34  ;;  %v3802_v21 = vpop.f32.mrb[36].mxu0 }
 0x9b9   : > { %v8291_v22 = vpack.c.bf16 %v3930_v19, %v3928_v35  ;;  %v3900_v39 = vadd.f32 %v3869_v37, %v3802_v21  ;;  %v3804_v5 = vpop.f32.mrb[37].mxu0 }
 0x9ba   : > { %v8293_v52 = vpack.c.bf16 %v3931_v20, %v3929_v46  ;;  %v3901_v47 = vadd.f32 %v3869_v37, %v3804_v5  ;;  %v3806_v58 = vpop.f32.mrb[38].mxu0 }
 0x9bb   : > { %v3916_v53 = vmul.f32 0.2, %v3900_v39  ;;  %v3902_v18 = vadd.f32 %v3874_v57, %v3806_v58  ;;  %4148 = vrot.lane.b32.xlu0 %v8291_v22, %s7332_s10  ;;  %v3808_v27 = vpop.f32.mrb[39].mxu0  ;;  %v7185_v58 = vld [vmem:[#allocation5 + $0x210] sm:$0xff]  }
 0x9bc   : > { %v3917_v28 = vmul.f32 0.2, %v3901_v47  ;;  %v3903_v48 = vadd.f32 %v3874_v57, %v3808_v27  ;;  %4150 = vrot.lane.b32.xlu1 %v8293_v52, %s7332_s10  ;;  %4041 = vmatprep.subr.bf16.mxu1 %v8293_v52  ;;  %v7183_v57 = vld [vmem:[#allocation5 + $0x200] sm:$0xff]   ;;  %v6620_v27 = vld [vmem:[%s8940_s4 + $0x158] sm:$0xff] }
 0x9bd   : > { %v3918_v23 = vmul.f32 0.2, %v3902_v18  ;;  %4042 = vmatpush1.bf16.msra.mxu1 %v8291_v22  ;;  %v3932_v30 = vmax.f32 %v3900_v39, %v3916_v53  ;;  %v6618_v53 = vld [vmem:[%s8940_s4 + $0x148] sm:$0xff] }
 0x9be   : > { %v3919_v17 = vmul.f32 0.2, %v3903_v48  ;;  %v3933_v32 = vmax.f32 %v3901_v47, %v3917_v28  ;;  %v7184_v47 = vld [vmem:[#allocation5 + $0x208] sm:$0xff]   ;;  %v6621_v28 = vld [vmem:[%s8940_s4 + $0x160] sm:$0xff] }
 0x9bf   : > { %v3934_v55 = vmax.f32 %v3902_v18, %v3918_v23  ;;  %v6619_v18 = vld [vmem:[%s8940_s4 + $0x150] sm:$0xff] }
 0x9c0   : > { %v3935_v33 = vmax.f32 %v3903_v48, %v3919_v17  ;;  %v3812_v31 = vpop.f32.mrb[40].mxu0  ;;  %v6622_v48 = vld [vmem:[%s8940_s4 + $0x168] sm:$0xff]  ;;  %v6623_v23 = vld [vmem:[%s8940_s4 + $0x170] sm:$0xff]  ;;  %v6624_v17 = vld [vmem:[%s8940_s4 + $0x178] sm:$0xff] }
 0x9c1   : > { %v3946_v42 = vpack.c.bf16 %v3934_v55, %v3932_v30  ;;  %v3904_v29 = vadd.f32 %v3879_v41, %v3812_v31  ;;  %v3814_v50 = vpop.f32.mrb[41].mxu0  ;;  %v7087_v30 = vpop.permute.xlu0 %7086 }
 0x9c2   : > { %v3947_v9 = vpack.c.bf16 %v3935_v33, %v3933_v32  ;;  %v3905_v49 = vadd.f32 %v3879_v41, %v3814_v50  ;;  %v3816_v38 = vpop.f32.mrb[42].mxu0  ;;  %v4159_v55 = vpop.permute.xlu1 %4158  ;;  %v7088_v41 = vunpack.i.l.bf16 %v7087_v30 }
 0x9c3   : > { %v3920_v59 = vmul.f32 0.2, %v3904_v29  ;;  %v3906_v11 = vadd.f32 %v3884_v6, %v3816_v38  ;;  %4154 = vrot.lane.b32.xlu1 %v3946_v42, %s7332_s10  ;;  %v3818_v12 = vpop.f32.mrb[43].mxu0 }
 0x9c4   : > { %v3921_v60 = vmul.f32 0.2, %v3905_v49  ;;  %v3907_v44 = vadd.f32 %v3884_v6, %v3818_v12  ;;  %4156 = vrot.lane.b32.xlu0 %v3947_v9, %s7332_s10  ;;  %4043 = vmatprep.subr.bf16.mxu1 %v3947_v9 }
 0x9c5   : > { %v3922_v62 = vmul.f32 0.2, %v3906_v11  ;;  %4044 = vmatpush1.bf16.msra.mxu1 %v3946_v42  ;;  %v3936_v0 = vmax.f32 %v3904_v29, %v3920_v59  ;;  %v7089_v29 = vunpack.i.h.bf16 %v7087_v30 }
 0x9c6   : > { %v3923_v63 = vmul.f32 0.2, %v3907_v44  ;;  %v3937_v61 = vmax.f32 %v3905_v49, %v3921_v60 }
 0x9c7   : > { %v3938_v10 = vmax.f32 %v3906_v11, %v3922_v62 }
 0x9c8   : > { %v3939_v1 = vmax.f32 %v3907_v44, %v3923_v63  ;;  %v3822_v54 = vpop.f32.mrb[44].mxu0 }
 0x9c9   : > { %v3948_v7 = vpack.c.bf16 %v3938_v10, %v3936_v0  ;;  %v3908_v26 = vadd.f32 %v3889_v36, %v3822_v54  ;;  %v3824_v51 = vpop.f32.mrb[45].mxu0 }
 0x9ca   : > { %v3949_v13 = vpack.c.bf16 %v3939_v1, %v3937_v61  ;;  %v3909_v45 = vadd.f32 %v3889_v36, %v3824_v51  ;;  %v3826_v14 = vpop.f32.mrb[46].mxu0  ;;  %v7187_v36 = vld [vmem:[#allocation5 + $0x1e0] sm:$0xff]  }
 0x9cb   : > { %v3924_v15 = vmul.f32 0.2, %v3908_v26  ;;  %v3910_v43 = vadd.f32 %v3894_v40, %v3826_v14  ;;  %4160 = vrot.lane.b32.xlu1 %v3948_v7, %s7332_s10  ;;  %v3828_v56 = vpop.f32.mrb[47].mxu0  ;;  %v7188_v14 = vld [vmem:[#allocation5 + $0x1e8] sm:$0xff]  }
 0x9cc   : > { %v3925_v16 = vmul.f32 0.2, %v3909_v45  ;;  %v3911_v34 = vadd.f32 %v3894_v40, %v3828_v56  ;;  %4162 = vrot.lane.b32.xlu0 %v3949_v13, %s7332_s10  ;;  %4045 = vmatprep.subr.bf16.mxu1 %v3949_v13 }
 0x9cd   : > { %v3926_v35 = vmul.f32 0.2, %v3910_v43  ;;  %4046 = vmatpush1.bf16.msra.mxu1 %v3948_v7  ;;  %v3940_v37 = vmax.f32 %v3908_v26, %v3924_v15 }
 0x9ce   : > { %v3927_v19 = vmul.f32 0.2, %v3911_v34  ;;  %v3941_v20 = vmax.f32 %v3909_v45, %v3925_v16 }
 0x9cf   : > { %v3942_v46 = vmax.f32 %v3910_v43, %v3926_v35 }
 0x9d0   : > { %v3943_v21 = vmax.f32 %v3911_v34, %v3927_v19 }
 0x9d1   : > { %v3950_v39 = vpack.c.bf16 %v3942_v46, %v3940_v37  ;;  %v7189_v37 = vld [vmem:[#allocation5 + $0x1f0] sm:$0xff]  }
 0x9d2   : > { %v3951_v5 = vpack.c.bf16 %v3943_v21, %v3941_v20 }
 0x9d3   : > { %4166 = vrot.lane.b32.xlu0 %v3950_v39, %s7332_s10 }
 0x9d4   : > { %4168 = vrot.lane.b32.xlu1 %v3951_v5, %s7332_s10  ;;  %4047 = vmatprep.subr.bf16.mxu1 %v3951_v5 }
 0x9d5   : > { %4048 = vmatpush1.bf16.msra.mxu1 %v3950_v39 }
 0x9d7   : > { %4164 = vrot.lane.b32.xlu0 %v7320_v4, %s7332_s10  ;;  %s7336_s10 = smov 8  }
 0x9d8   : > { %4306 = vrot.lane.b32.xlu1 %v8293_v52, %s7333_s15  ;;  %6597 = vmatmul.mubr.msk.bf16.vlgmr.msra.gmra.mrb[32].mxu1 %vm1035_vm5, %v7183_v57  ;;  %v7186_v52 = vld [vmem:[#allocation5 + $0x218] sm:$0xff]   ;;  %v7191_v57 = vld [vmem:[#allocation5 + $0x220] sm:$0xff]  }
 0x9d9   : > { %4083 = vmatprep.mubr.bf16.mxu1 %v7320_v4 }
 0x9db   : > { %7091 = vrot.lane.b32.xlu0 %v7320_v4, %s7333_s15 }
 0x9dc   : > { %4304 = vrot.lane.b32.xlu1 %v8291_v22, %s7333_s15  ;;  %v6617_v22 = vld [vmem:[%s8940_s4 + $0x140] sm:$0xff] }
 0x9df   : > { %4312 = vrot.lane.b32.xlu0 %v3947_v9, %s7333_s15 }
 0x9e0   : > { %4310 = vrot.lane.b32.xlu1 %v3946_v42, %s7333_s15  ;;  %6598 = vmatmul.mubr.msk.bf16.gmra.mrb[36].mxu1 %vm1035_vm5, %v7184_v47  ;;  %v7192_v47 = vld [vmem:[#allocation5 + $0x228] sm:$0xff]  }
 0x9e1   : > { %4093 = vmatprep.mubr.bf16.mxu1 %v7320_v4 }
 0x9e3   : > { %4318 = vrot.lane.b32.xlu0 %v3949_v13, %s7333_s15 }
 0x9e4   : > { %4320 = vrot.lane.b32.xlu1 %v7320_v4, %s7333_s15 }
 0x9e7   : > { %4316 = vrot.lane.b32.xlu0 %v3948_v7, %s7333_s15 }
 0x9e8   : > { %4324 = vrot.lane.b32.xlu1 %v3951_v5, %s7333_s15  ;;  %6599 = vmatmul.mubr.msk.bf16.gmra.mrb[40].mxu1 %vm1035_vm5, %v7185_v58  ;;  %v7190_v5 = vld [vmem:[#allocation5 + $0x1f8] sm:$0xff]   ;;  %v7193_v58 = vld [vmem:[#allocation5 + $0x230] sm:$0xff]  }
 0x9e9   : > { %4103 = vmatprep.mubr.bf16.mxu1 %v7320_v4 }
 0x9eb   : > { %4326 = vrot.lane.b32.xlu0 %v7320_v4, %s7333_s15 }
 0x9ec   : > { %4322 = vrot.lane.b32.xlu1 %v3950_v39, %s7333_s15  ;;  %s7337_s15 = smov 120  }
 0x9ef   : > { %4457 = vperm.xlu0 %7034, %v6617_v22   ;;  %v7194_v22 = vld [vmem:[#allocation5 + $0x238] sm:$0xff]  }
 0x9f0   : > { %4462 = vperm.xlu1 %7033, %v6618_v53   ;;  %6600 = vmatmul.mubr.msk.bf16.gmra.mrb[44].mxu1 %vm1035_vm5, %v7186_v52 }
 0x9f1   : > { %4231 = vmatprep.mubr.bf16.mxu1 %v7320_v4 }
 0x9f3   : > { %4467 = vperm.xlu0 %7034, %v6619_v18  }
 0x9f4   : > { %4472 = vperm.xlu1 %7033, %v6620_v27  }
 0x9f7   : > { %4477 = vperm.xlu0 %7034, %v6621_v28  }
 0x9f8   : > { %4482 = vperm.xlu1 %7033, %v6622_v48  }
 0x9fb   : > { %4487 = vperm.xlu0 %7034, %v6623_v23  }
 0x9fc   : > { %4492 = vperm.xlu1 %7033, %v6624_v17  }
 0x9ff   : > { %7096 = vrot.lane.b32.xlu0 %v7320_v4, %s7334_s19 }
 0xa00   : > { %4757 = vrot.lane.b32.xlu1 %v7320_v4, %s7334_s19 }
 0xa2d   : > { %v4149_v32 = vpop.permute.xlu0 %4148 }
 0xa2e   : > { %v4151_v33 = vpop.permute.xlu1 %4150  ;;  %v4171_v42 = vsel %vm4170_vm13, %v7088_v41, %v4149_v32 }
 0xa2f   : > { %v4172_v31 = vsel %vm4170_vm13, %v4149_v32, %v4151_v33 }
 0xa30   : > { %4199 = vmatprep.subr.bf16.mxu1 %v4172_v31 }
 0xa31   : > { %4200 = vmatpush1.bf16.msra.mxu1 %v4171_v42 }
 0xa35   : > { %v4155_v50 = vpop.permute.xlu1 %4154 }
 0xa36   : > { %v4157_v6 = vpop.permute.xlu0 %4156  ;;  %v4173_v49 = vsel %vm4170_vm13, %v7089_v29, %v4155_v50 }
 0xa37   : > { %v4174_v9 = vsel %vm4170_vm13, %v4155_v50, %v4157_v6 }
 0xa38   : > { %4201 = vmatprep.subr.bf16.mxu1 %v4174_v9 }
 0xa39   : > { %4202 = vmatpush1.bf16.msra.mxu1 %v4173_v49 }
 0xa3d   : > { %v4161_v38 = vpop.permute.xlu1 %4160 }
 0xa3e   : > { %v4163_v59 = vpop.permute.xlu0 %4162  ;;  %v4175_v12 = vsel %vm4170_vm13, %v4159_v55, %v4161_v38 }
 0xa3f   : > { %v4176_v11 = vsel %vm4170_vm13, %v4161_v38, %v4163_v59 }
 0xa40   : > { %4203 = vmatprep.subr.bf16.mxu1 %v4176_v11 }
 0xa41   : > { %4204 = vmatpush1.bf16.msra.mxu1 %v4175_v12 }
 0xa45   : > { %v4167_v60 = vpop.permute.xlu0 %4166 }
 0xa46   : > { %v4169_v44 = vpop.permute.xlu1 %4168 }
 0xa47   : > { %v4178_v62 = vsel %vm4170_vm13, %v4167_v60, %v4169_v44 }
 0xa48   : > { %4205 = vmatprep.subr.bf16.mxu1 %v4178_v62 }
 0xa49   : > { %v4165_v63 = vpop.permute.xlu0 %4164 }
 0xa4a   : > { %v4177_v0 = vsel %vm4170_vm13, %v4165_v63, %v4167_v60  ;;  %v4307_v10 = vpop.permute.xlu1 %4306 }
 0xa4b   : > { %4206 = vmatpush1.bf16.msra.mxu1 %v4177_v0 }
 0xa4d   : > { %v7092_v61 = vpop.permute.xlu0 %7091 }
 0xa4e   : > { %v7094_v1 = vunpack.i.h.bf16 %v7092_v61  ;;  %v7093_v54 = vunpack.i.l.bf16 %v7092_v61  ;;  %v4305_v7 = vpop.permute.xlu1 %4304  ;;  %6605 = vmatmul.mubr.msk.bf16.vlgmr.msra.gmra.mrb[32].mxu1 %vm1035_vm5, %v7187_v36 }
 0xa4f   : > { %4241 = vmatprep.mubr.bf16.mxu1 %v7320_v4  ;;  %v4329_v51 = vsel %vm4328_vm14, %v4305_v7, %v4307_v10 }
 0xa50   : > { %v4330_v26 = vsel %vm4328_vm14, %v4307_v10, %v7093_v54 }
 0xa51   : > { %v4313_v40 = vpop.permute.xlu0 %4312  ;;  %4357 = vmatprep.subr.bf16.mxu1 %v4330_v26 }
 0xa52   : > { %v4311_v13 = vpop.permute.xlu1 %4310  ;;  %4358 = vmatpush1.bf16.msra.mxu1 %v4329_v51  ;;  %v4332_v45 = vsel %vm4328_vm14, %v4313_v40, %v7094_v1 }
 0xa53   : > { %4359 = vmatprep.subr.bf16.mxu1 %v4332_v45  ;;  %v4331_v43 = vsel %vm4328_vm14, %v4311_v13, %v4313_v40 }
 0xa55   : > { %v4319_v15 = vpop.permute.xlu0 %4318 }
 0xa56   : > { %v4321_v56 = vpop.permute.xlu1 %4320  ;;  %6606 = vmatmul.mubr.msk.bf16.gmra.mrb[36].mxu1 %vm1035_vm5, %v7188_v14 }
 0xa57   : > { %4360 = vmatpush1.bf16.msra.mxu1 %v4331_v43  ;;  %v4334_v16 = vsel %vm4328_vm14, %v4319_v15, %v4321_v56  ;;  %4251 = vmatprep.mubr.bf16.mxu1 %v7320_v4 }
 0xa58   : > { %4361 = vmatprep.subr.bf16.mxu1 %v4334_v16 }
 0xa59   : > { %v4317_v34 = vpop.permute.xlu0 %4316 }
 0xa5a   : > { %v4333_v35 = vsel %vm4328_vm14, %v4317_v34, %v4319_v15  ;;  %v4325_v19 = vpop.permute.xlu1 %4324 }
 0xa5b   : > { %4362 = vmatpush1.bf16.msra.mxu1 %v4333_v35 }
 0xa5d   : > { %v4327_v46 = vpop.permute.xlu0 %4326 }
 0xa5e   : > { %v4323_v20 = vpop.permute.xlu1 %4322  ;;  %6607 = vmatmul.mubr.msk.bf16.gmra.mrb[40].mxu1 %vm1035_vm5, %v7189_v37  ;;  %v4336_v21 = vsel %vm4328_vm14, %v4325_v19, %v4327_v46 }
 0xa5f   : > { %v4335_v39 = vsel %vm4328_vm14, %v4323_v20, %v4325_v19  ;;  %4363 = vmatprep.subr.bf16.mxu1 %v4336_v21  ;;  %4261 = vmatprep.mubr.bf16.mxu1 %v7320_v4 }
 0xa60   : > { %4364 = vmatpush1.bf16.msra.mxu1 %v4335_v39 }
 0xa66   : > { %6608 = vmatmul.mubr.msk.bf16.gmra.mrb[44].mxu1 %vm1035_vm5, %v7190_v5 }
 0xa67   : > { %4389 = vmatprep.mubr.bf16.mxu1 %v7320_v4 }
 0xa6e   : > { %6613 = vmatmul.mubr.msk.bf16.vlgmr.msra.gmra.mrb[32].mxu1 %vm1035_vm5, %v7191_v57  ;;  %v4458_v52 = vpop.permute.xlu0 %4457 }
 0xa6f   : > { %4399 = vmatprep.mubr.bf16.mxu1 %v7320_v4  ;;  %v4463_v28 = vpop.permute.xlu1 %4462 }
 0xa72   : > { %v4468_v50 = vpop.permute.xlu0 %4467 }
 0xa73   : > { %v4473_v12 = vpop.permute.xlu1 %4472 }
 0xa76   : > { %6614 = vmatmul.mubr.msk.bf16.gmra.mrb[36].mxu1 %vm1035_vm5, %v7192_v47  ;;  %v4478_v51 = vpop.permute.xlu0 %4477 }
 0xa77   : > { %4409 = vmatprep.mubr.bf16.mxu1 %v7320_v4  ;;  %v4483_v56 = vpop.permute.xlu1 %4482 }
 0xa7e   : > { %6615 = vmatmul.mubr.msk.bf16.gmra.mrb[40].mxu1 %vm1035_vm5, %v7193_v58  ;;  %v4488_v58 = vpop.permute.xlu0 %4487 }
 0xa7f   : > { %4419 = vmatprep.mubr.bf16.mxu1 %v7320_v4 }
 0xa86   : > { %6616 = vmatmul.mubr.msk.bf16.gmra.mrb[44].mxu1 %vm1035_vm5, %v7194_v22 }
 0xa87   : > { %5271 = vmatprep.mubr.bf16.mxu1 %v7320_v4 }
 0xb41   : > { %v4391_v53 = vpop.f32.mrb[32].mxu1 }
 0xb42   : > { %v4495_v18 = vadd.f32 %v4458_v52, %v4391_v53  ;;  %v4393_v27 = vpop.f32.mrb[33].mxu1 }
 0xb43   : > { %v4496_v48 = vadd.f32 %v4458_v52, %v4393_v27  ;;  %v4395_v23 = vpop.f32.mrb[34].mxu1 }
 0xb44   : > { %v4511_v17 = vmul.f32 0.2, %v4495_v18  ;;  %v4497_v30 = vadd.f32 %v4463_v28, %v4395_v23  ;;  %v4397_v55 = vpop.f32.mrb[35].mxu1 }
 0xb45   : > { %v4512_v41 = vmul.f32 0.2, %v4496_v48  ;;  %v4498_v32 = vadd.f32 %v4463_v28, %v4397_v55 }
 0xb46   : > { %v4513_v33 = vmul.f32 0.2, %v4497_v30  ;;  %v4527_v42 = vmax.f32 %v4495_v18, %v4511_v17 }
 0xb47   : > { %v4514_v31 = vmul.f32 0.2, %v4498_v32  ;;  %v4528_v6 = vmax.f32 %v4496_v48, %v4512_v41  ;;  %v4493_v48 = vpop.permute.xlu1 %4492 }
 0xb48   : > { %v4529_v29 = vmax.f32 %v4497_v30, %v4513_v33 }
 0xb49   : > { %v4530_v9 = vmax.f32 %v4498_v32, %v4514_v31  ;;  %v4401_v49 = vpop.f32.mrb[36].mxu1 }
 0xb4a   : > { %v8382_v38 = vpack.c.bf16 %v4529_v29, %v4527_v42  ;;  %v4499_v59 = vadd.f32 %v4468_v50, %v4401_v49  ;;  %v4403_v11 = vpop.f32.mrb[37].mxu1 }
 0xb4b   : > { %v8384_v60 = vpack.c.bf16 %v4530_v9, %v4528_v6  ;;  %v4500_v44 = vadd.f32 %v4468_v50, %v4403_v11  ;;  %v4405_v62 = vpop.f32.mrb[38].mxu1 }
 0xb4c   : > { %v4515_v63 = vmul.f32 0.2, %v4499_v59  ;;  %v4501_v0 = vadd.f32 %v4473_v12, %v4405_v62  ;;  %4747 = vrot.lane.b32.xlu0 %v8382_v38, %s7334_s19  ;;  %v4407_v10 = vpop.f32.mrb[39].mxu1  ;;  %v7197_v62 = vld [vmem:[#allocation5 + $0x270] sm:$0xff]  }
 0xb4d   : > { %v4516_v36 = vmul.f32 0.2, %v4500_v44  ;;  %v4502_v61 = vadd.f32 %v4473_v12, %v4407_v10  ;;  %4749 = vrot.lane.b32.xlu1 %v8384_v60, %s7334_s19  ;;  %4640 = vmatprep.subr.bf16.mxu0 %v8384_v60  ;;  %v7195_v12 = vld [vmem:[#allocation5 + $0x260] sm:$0xff]   ;;  %v6652_v10 = vld [vmem:[%s8940_s4 + $0x198] sm:$0xff] }
 0xb4e   : > { %v4517_v1 = vmul.f32 0.2, %v4501_v0  ;;  %4641 = vmatpush1.bf16.msra.mxu0 %v8382_v38  ;;  %v4531_v7 = vmax.f32 %v4499_v59, %v4515_v63  ;;  %v6650_v63 = vld [vmem:[%s8940_s4 + $0x188] sm:$0xff] }
 0xb4f   : > { %v4518_v54 = vmul.f32 0.2, %v4502_v61  ;;  %v4532_v40 = vmax.f32 %v4500_v44, %v4516_v36  ;;  %v7196_v44 = vld [vmem:[#allocation5 + $0x268] sm:$0xff]   ;;  %v6653_v36 = vld [vmem:[%s8940_s4 + $0x1a0] sm:$0xff] }
 0xb50   : > { %v4533_v26 = vmax.f32 %v4501_v0, %v4517_v1  ;;  %v6651_v0 = vld [vmem:[%s8940_s4 + $0x190] sm:$0xff] }
 0xb51   : > { %v4534_v13 = vmax.f32 %v4502_v61, %v4518_v54  ;;  %v4411_v45 = vpop.f32.mrb[40].mxu1  ;;  %v6654_v61 = vld [vmem:[%s8940_s4 + $0x1a8] sm:$0xff]  ;;  %v6655_v1 = vld [vmem:[%s8940_s4 + $0x1b0] sm:$0xff]  ;;  %v6656_v54 = vld [vmem:[%s8940_s4 + $0x1b8] sm:$0xff] }
 0xb52   : > { %v4545_v14 = vpack.c.bf16 %v4533_v26, %v4531_v7  ;;  %v4503_v15 = vadd.f32 %v4478_v51, %v4411_v45  ;;  %v4413_v43 = vpop.f32.mrb[41].mxu1  ;;  %v7097_v7 = vpop.permute.xlu0 %7096 }
 0xb53   : > { %v4546_v16 = vpack.c.bf16 %v4534_v13, %v4532_v40  ;;  %v4504_v34 = vadd.f32 %v4478_v51, %v4413_v43  ;;  %v4415_v35 = vpop.f32.mrb[42].mxu1  ;;  %v4758_v26 = vpop.permute.xlu1 %4757  ;;  %v7098_v51 = vunpack.i.l.bf16 %v7097_v7 }
 0xb54   : > { %v4519_v19 = vmul.f32 0.2, %v4503_v15  ;;  %v4505_v37 = vadd.f32 %v4483_v56, %v4415_v35  ;;  %4753 = vrot.lane.b32.xlu1 %v4545_v14, %s7334_s19  ;;  %v4417_v46 = vpop.f32.mrb[43].mxu1 }
 0xb55   : > { %v4520_v20 = vmul.f32 0.2, %v4504_v34  ;;  %v4506_v21 = vadd.f32 %v4483_v56, %v4417_v46  ;;  %4755 = vrot.lane.b32.xlu0 %v4546_v16, %s7334_s19  ;;  %4642 = vmatprep.subr.bf16.mxu0 %v4546_v16 }
 0xb56   : > { %v4521_v39 = vmul.f32 0.2, %v4505_v37  ;;  %4643 = vmatpush1.bf16.msra.mxu0 %v4545_v14  ;;  %v4535_v57 = vmax.f32 %v4503_v15, %v4519_v19  ;;  %v7099_v15 = vunpack.i.h.bf16 %v7097_v7 }
 0xb57   : > { %v4522_v5 = vmul.f32 0.2, %v4506_v21  ;;  %v4536_v22 = vmax.f32 %v4504_v34, %v4520_v20 }
 0xb58   : > { %v4537_v47 = vmax.f32 %v4505_v37, %v4521_v39 }
 0xb59   : > { %v4538_v52 = vmax.f32 %v4506_v21, %v4522_v5  ;;  %v4421_v53 = vpop.f32.mrb[44].mxu1 }
 0xb5a   : > { %v4547_v18 = vpack.c.bf16 %v4537_v47, %v4535_v57  ;;  %v4507_v27 = vadd.f32 %v4488_v58, %v4421_v53  ;;  %v4423_v28 = vpop.f32.mrb[45].mxu1 }
 0xb5b   : > { %v4548_v23 = vpack.c.bf16 %v4538_v52, %v4536_v22  ;;  %v4508_v17 = vadd.f32 %v4488_v58, %v4423_v28  ;;  %v4425_v30 = vpop.f32.mrb[46].mxu1  ;;  %v7199_v58 = vld [vmem:[#allocation5 + $0x240] sm:$0xff]  }
 0xb5c   : > { %v4523_v55 = vmul.f32 0.2, %v4507_v27  ;;  %v4509_v41 = vadd.f32 %v4493_v48, %v4425_v30  ;;  %4759 = vrot.lane.b32.xlu1 %v4547_v18, %s7334_s19  ;;  %v4427_v32 = vpop.f32.mrb[47].mxu1  ;;  %v7200_v30 = vld [vmem:[#allocation5 + $0x248] sm:$0xff]  }
 0xb5d   : > { %v4524_v33 = vmul.f32 0.2, %v4508_v17  ;;  %v4510_v31 = vadd.f32 %v4493_v48, %v4427_v32  ;;  %4761 = vrot.lane.b32.xlu0 %v4548_v23, %s7334_s19  ;;  %4644 = vmatprep.subr.bf16.mxu0 %v4548_v23 }
 0xb5e   : > { %v4525_v42 = vmul.f32 0.2, %v4509_v41  ;;  %4645 = vmatpush1.bf16.msra.mxu0 %v4547_v18  ;;  %v4539_v50 = vmax.f32 %v4507_v27, %v4523_v55 }
 0xb5f   : > { %v4526_v29 = vmul.f32 0.2, %v4510_v31  ;;  %v4540_v9 = vmax.f32 %v4508_v17, %v4524_v33 }
 0xb60   : > { %v4541_v6 = vmax.f32 %v4509_v41, %v4525_v42 }
 0xb61   : > { %v4542_v49 = vmax.f32 %v4510_v31, %v4526_v29 }
 0xb62   : > { %v4549_v59 = vpack.c.bf16 %v4541_v6, %v4539_v50  ;;  %v7201_v50 = vld [vmem:[#allocation5 + $0x250] sm:$0xff]  }
 0xb63   : > { %v4550_v11 = vpack.c.bf16 %v4542_v49, %v4540_v9 }
 0xb64   : > { %4765 = vrot.lane.b32.xlu0 %v4549_v59, %s7334_s19 }
 0xb65   : > { %4767 = vrot.lane.b32.xlu1 %v4550_v11, %s7334_s19  ;;  %4646 = vmatprep.subr.bf16.mxu0 %v4550_v11 }
 0xb66   : > { %4647 = vmatpush1.bf16.msra.mxu0 %v4549_v59 }
 0xb68   : > { %4763 = vrot.lane.b32.xlu0 %v7320_v4, %s7334_s19  ;;  %s7253_s19 = scalar_lea.vmem %s7252_s18, 64 }
 0xb69   : > { %4905 = vrot.lane.b32.xlu1 %v8384_v60, %s7335_s20  ;;  %6629 = vmatmul.mubr.msk.bf16.vlgmr.msra.gmra.mrb[48].mxu0 %vm1035_vm5, %v7195_v12  ;;  %v7198_v60 = vld [vmem:[#allocation5 + $0x278] sm:$0xff]   ;;  %v7203_v12 = vld [vmem:[#allocation5 + $0x280] sm:$0xff]  }
 0xb6a   : > { %4682 = vmatprep.mubr.bf16.mxu0 %v7320_v4 }
 0xb6c   : > { %7101 = vrot.lane.b32.xlu0 %v7320_v4, %s7335_s20 }
 0xb6d   : > { %4903 = vrot.lane.b32.xlu1 %v8382_v38, %s7335_s20  ;;  %v6649_v38 = vld [vmem:[%s8940_s4 + $0x180] sm:$0xff] }
 0xb70   : > { %4911 = vrot.lane.b32.xlu0 %v4546_v16, %s7335_s20 }
 0xb71   : > { %4909 = vrot.lane.b32.xlu1 %v4545_v14, %s7335_s20  ;;  %6630 = vmatmul.mubr.msk.bf16.gmra.mrb[52].mxu0 %vm1035_vm5, %v7196_v44  ;;  %v7204_v44 = vld [vmem:[#allocation5 + $0x288] sm:$0xff]  }
 0xb72   : > { %4692 = vmatprep.mubr.bf16.mxu0 %v7320_v4 }
 0xb74   : > { %4917 = vrot.lane.b32.xlu0 %v4548_v23, %s7335_s20 }
 0xb75   : > { %4919 = vrot.lane.b32.xlu1 %v7320_v4, %s7335_s20 }
 0xb78   : > { %4915 = vrot.lane.b32.xlu0 %v4547_v18, %s7335_s20 }
 0xb79   : > { %4923 = vrot.lane.b32.xlu1 %v4550_v11, %s7335_s20  ;;  %6631 = vmatmul.mubr.msk.bf16.gmra.mrb[56].mxu0 %vm1035_vm5, %v7197_v62  ;;  %v7202_v11 = vld [vmem:[#allocation5 + $0x258] sm:$0xff]   ;;  %v7205_v62 = vld [vmem:[#allocation5 + $0x290] sm:$0xff]  }
 0xb7a   : > { %4702 = vmatprep.mubr.bf16.mxu0 %v7320_v4 }
 0xb7c   : > { %4925 = vrot.lane.b32.xlu0 %v7320_v4, %s7335_s20 }
 0xb7d   : > { %4921 = vrot.lane.b32.xlu1 %v4549_v59, %s7335_s20 }
 0xb80   : > { %5056 = vperm.xlu0 %7034, %v6649_v38   ;;  %v7206_v38 = vld [vmem:[#allocation5 + $0x298] sm:$0xff]  }
 0xb81   : > { %5061 = vperm.xlu1 %7033, %v6650_v63   ;;  %6632 = vmatmul.mubr.msk.bf16.gmra.mrb[60].mxu0 %vm1035_vm5, %v7198_v60 }
 0xb82   : > { %4830 = vmatprep.mubr.bf16.mxu0 %v7320_v4 }
 0xb84   : > { %5066 = vperm.xlu0 %7034, %v6651_v0  }
 0xb85   : > { %5071 = vperm.xlu1 %7033, %v6652_v10  }
 0xb88   : > { %5076 = vperm.xlu0 %7034, %v6653_v36  }
 0xb89   : > { %5081 = vperm.xlu1 %7033, %v6654_v61  }
 0xb8c   : > { %5086 = vperm.xlu0 %7034, %v6655_v1  }
 0xb8d   : > { %5091 = vperm.xlu1 %7033, %v6656_v54  }
 0xb90   : > { %7115 = vset.pattern.permute.xlu0 %v7318_v2 }
 0xb91   : > { %7106 = vrot.lane.b32.xlu0 %v7320_v4, %s7336_s10  ;;  %5356 = vrot.lane.b32.xlu1 %v7320_v4, %s7336_s10 }
 0xbbe   : > { %v4748_v40 = vpop.permute.xlu0 %4747 }
 0xbbf   : > { %v4750_v13 = vpop.permute.xlu1 %4749  ;;  %v4770_v14 = vsel %vm4769_vm15, %v7098_v51, %v4748_v40 }
 0xbc0   : > { %v4771_v45 = vsel %vm4769_vm15, %v4748_v40, %v4750_v13 }
 0xbc1   : > { %4798 = vmatprep.subr.bf16.mxu0 %v4771_v45 }
 0xbc2   : > { %4799 = vmatpush1.bf16.msra.mxu0 %v4770_v14 }
 0xbc6   : > { %v4754_v43 = vpop.permute.xlu1 %4753 }
 0xbc7   : > { %v4756_v56 = vpop.permute.xlu0 %4755  ;;  %v4772_v34 = vsel %vm4769_vm15, %v7099_v15, %v4754_v43 }
 0xbc8   : > { %v4773_v16 = vsel %vm4769_vm15, %v4754_v43, %v4756_v56 }
 0xbc9   : > { %4800 = vmatprep.subr.bf16.mxu0 %v4773_v16 }
 0xbca   : > { %4801 = vmatpush1.bf16.msra.mxu0 %v4772_v34 }
 0xbce   : > { %v4760_v35 = vpop.permute.xlu1 %4759 }
 0xbcf   : > { %v4762_v19 = vpop.permute.xlu0 %4761  ;;  %v4774_v46 = vsel %vm4769_vm15, %v4758_v26, %v4760_v35 }
 0xbd0   : > { %v4775_v37 = vsel %vm4769_vm15, %v4760_v35, %v4762_v19 }
 0xbd1   : > { %4802 = vmatprep.subr.bf16.mxu0 %v4775_v37 }
 0xbd2   : > { %4803 = vmatpush1.bf16.msra.mxu0 %v4774_v46 }
 0xbd6   : > { %v4766_v20 = vpop.permute.xlu0 %4765 }
 0xbd7   : > { %v4768_v21 = vpop.permute.xlu1 %4767 }
 0xbd8   : > { %v4777_v39 = vsel %vm4769_vm15, %v4766_v20, %v4768_v21 }
 0xbd9   : > { %4804 = vmatprep.subr.bf16.mxu0 %v4777_v39 }
 0xbda   : > { %v4764_v5 = vpop.permute.xlu0 %4763 }
 0xbdb   : > { %v4776_v57 = vsel %vm4769_vm15, %v4764_v5, %v4766_v20  ;;  %v4906_v47 = vpop.permute.xlu1 %4905 }
 0xbdc   : > { %4805 = vmatpush1.bf16.msra.mxu0 %v4776_v57 }
 0xbde   : > { %v7102_v22 = vpop.permute.xlu0 %7101 }
 0xbdf   : > { %v7104_v52 = vunpack.i.h.bf16 %v7102_v22  ;;  %v7103_v53 = vunpack.i.l.bf16 %v7102_v22  ;;  %v4904_v18 = vpop.permute.xlu1 %4903  ;;  %6637 = vmatmul.mubr.msk.bf16.vlgmr.msra.gmra.mrb[48].mxu0 %vm1035_vm5, %v7199_v58 }
 0xbe0   : > { %4840 = vmatprep.mubr.bf16.mxu0 %v7320_v4  ;;  %v4928_v28 = vsel %vm4927_vm0, %v4904_v18, %v4906_v47 }
 0xbe1   : > { %v4929_v27 = vsel %vm4927_vm0, %v4906_v47, %v7103_v53 }
 0xbe2   : > { %v4912_v48 = vpop.permute.xlu0 %4911  ;;  %4956 = vmatprep.subr.bf16.mxu0 %v4929_v27 }
 0xbe3   : > { %v4910_v23 = vpop.permute.xlu1 %4909  ;;  %4957 = vmatpush1.bf16.msra.mxu0 %v4928_v28  ;;  %v4931_v17 = vsel %vm4927_vm0, %v4912_v48, %v7104_v52 }
 0xbe4   : > { %4958 = vmatprep.subr.bf16.mxu0 %v4931_v17  ;;  %v4930_v41 = vsel %vm4927_vm0, %v4910_v23, %v4912_v48 }
 0xbe6   : > { %v4918_v55 = vpop.permute.xlu0 %4917 }
 0xbe7   : > { %v4920_v32 = vpop.permute.xlu1 %4919  ;;  %6638 = vmatmul.mubr.msk.bf16.gmra.mrb[52].mxu0 %vm1035_vm5, %v7200_v30 }
 0xbe8   : > { %4959 = vmatpush1.bf16.msra.mxu0 %v4930_v41  ;;  %v4933_v33 = vsel %vm4927_vm0, %v4918_v55, %v4920_v32  ;;  %4850 = vmatprep.mubr.bf16.mxu0 %v7320_v4 }
 0xbe9   : > { %4960 = vmatprep.subr.bf16.mxu0 %v4933_v33 }
 0xbea   : > { %v4916_v31 = vpop.permute.xlu0 %4915 }
 0xbeb   : > { %v4932_v42 = vsel %vm4927_vm0, %v4916_v31, %v4918_v55  ;;  %v4924_v29 = vpop.permute.xlu1 %4923 }
 0xbec   : > { %4961 = vmatpush1.bf16.msra.mxu0 %v4932_v42 }
 0xbee   : > { %v4926_v6 = vpop.permute.xlu0 %4925 }
 0xbef   : > { %v4922_v9 = vpop.permute.xlu1 %4921  ;;  %6639 = vmatmul.mubr.msk.bf16.gmra.mrb[56].mxu0 %vm1035_vm5, %v7201_v50  ;;  %v4935_v49 = vsel %vm4927_vm0, %v4924_v29, %v4926_v6 }
 0xbf0   : > { %v4934_v59 = vsel %vm4927_vm0, %v4922_v9, %v4924_v29  ;;  %4962 = vmatprep.subr.bf16.mxu0 %v4935_v49  ;;  %4860 = vmatprep.mubr.bf16.mxu0 %v7320_v4 }
 0xbf1   : > { %4963 = vmatpush1.bf16.msra.mxu0 %v4934_v59 }
 0xbf7   : > { %6640 = vmatmul.mubr.msk.bf16.gmra.mrb[60].mxu0 %vm1035_vm5, %v7202_v11 }
 0xbf8   : > { %4988 = vmatprep.mubr.bf16.mxu0 %v7320_v4 }
 0xbff   : > { %6645 = vmatmul.mubr.msk.bf16.vlgmr.msra.gmra.mrb[48].mxu0 %vm1035_vm5, %v7203_v12  ;;  %v5057_v60 = vpop.permute.xlu0 %5056 }
 0xc00   : > { %4998 = vmatprep.mubr.bf16.mxu0 %v7320_v4  ;;  %v5062_v36 = vpop.permute.xlu1 %5061 }
 0xc03   : > { %v5067_v43 = vpop.permute.xlu0 %5066 }
 0xc04   : > { %v5072_v46 = vpop.permute.xlu1 %5071 }
 0xc07   : > { %6646 = vmatmul.mubr.msk.bf16.gmra.mrb[52].mxu0 %vm1035_vm5, %v7204_v44  ;;  %v5077_v28 = vpop.permute.xlu0 %5076 }
 0xc08   : > { %5008 = vmatprep.mubr.bf16.mxu0 %v7320_v4  ;;  %v5082_v32 = vpop.permute.xlu1 %5081 }
 0xc0f   : > { %6647 = vmatmul.mubr.msk.bf16.gmra.mrb[56].mxu0 %vm1035_vm5, %v7205_v62  ;;  %v5087_v62 = vpop.permute.xlu0 %5086 }
 0xc10   : > { %5018 = vmatprep.mubr.bf16.mxu0 %v7320_v4 }
 0xc17   : > { %6648 = vmatmul.mubr.msk.bf16.gmra.mrb[60].mxu0 %vm1035_vm5, %v7206_v38 }
 0xcd2   : > { %v4990_v63 = vpop.f32.mrb[48].mxu0 }
 0xcd3   : > { %v5094_v0 = vadd.f32 %v5057_v60, %v4990_v63  ;;  %v4992_v10 = vpop.f32.mrb[49].mxu0 }
 0xcd4   : > { %v5095_v61 = vadd.f32 %v5057_v60, %v4992_v10  ;;  %v4994_v1 = vpop.f32.mrb[50].mxu0 }
 0xcd5   : > { %v5110_v54 = vmul.f32 0.2, %v5094_v0  ;;  %v5096_v7 = vadd.f32 %v5062_v36, %v4994_v1  ;;  %v4996_v26 = vpop.f32.mrb[51].mxu0 }
 0xcd6   : > { %v5111_v51 = vmul.f32 0.2, %v5095_v61  ;;  %v5097_v40 = vadd.f32 %v5062_v36, %v4996_v26 }
 0xcd7   : > { %v5112_v13 = vmul.f32 0.2, %v5096_v7  ;;  %v5126_v14 = vmax.f32 %v5094_v0, %v5110_v54 }
 0xcd8   : > { %v5113_v45 = vmul.f32 0.2, %v5097_v40  ;;  %v5127_v56 = vmax.f32 %v5095_v61, %v5111_v51  ;;  %v5092_v61 = vpop.permute.xlu1 %5091 }
 0xcd9   : > { %v5128_v15 = vmax.f32 %v5096_v7, %v5112_v13 }
 0xcda   : > { %v5129_v16 = vmax.f32 %v5097_v40, %v5113_v45  ;;  %v5000_v34 = vpop.f32.mrb[52].mxu0 }
 0xcdb   : > { %v8473_v35 = vpack.c.bf16 %v5128_v15, %v5126_v14  ;;  %v5098_v19 = vadd.f32 %v5067_v43, %v5000_v34  ;;  %v5002_v37 = vpop.f32.mrb[53].mxu0 }
 0xcdc   : > { %v8475_v20 = vpack.c.bf16 %v5129_v16, %v5127_v56  ;;  %v5099_v21 = vadd.f32 %v5067_v43, %v5002_v37  ;;  %v5004_v39 = vpop.f32.mrb[54].mxu0 }
 0xcdd   : > { %v5114_v5 = vmul.f32 0.2, %v5098_v19  ;;  %v5100_v57 = vadd.f32 %v5072_v46, %v5004_v39  ;;  %5346 = vrot.lane.b32.xlu0 %v8473_v35, %s7336_s10  ;;  %v5006_v47 = vpop.f32.mrb[55].mxu0  ;;  %v7209_v39 = vld [vmem:[#allocation5 + $0x2d0] sm:$0xff]  }
 0xcde   : > { %v5115_v58 = vmul.f32 0.2, %v5099_v21  ;;  %v5101_v22 = vadd.f32 %v5072_v46, %v5006_v47  ;;  %5348 = vrot.lane.b32.xlu1 %v8475_v20, %s7336_s10  ;;  %5239 = vmatprep.subr.bf16.mxu1 %v8475_v20  ;;  %v7207_v46 = vld [vmem:[#allocation5 + $0x2c0] sm:$0xff]   ;;  %v6688_v47 = vld [vmem:[%s8940_s4 + $0x1f8] sm:$0xff] }
 0xcdf   : > { %v5116_v52 = vmul.f32 0.2, %v5100_v57  ;;  %5240 = vmatpush1.bf16.msra.mxu1 %v8473_v35  ;;  %v5130_v18 = vmax.f32 %v5098_v19, %v5114_v5  ;;  %v6684_v5 = vld [vmem:[%s8940_s4 + $0x1d8] sm:$0xff] }
 0xce0   : > { %v5117_v53 = vmul.f32 0.2, %v5101_v22  ;;  %v5131_v48 = vmax.f32 %v5099_v21, %v5115_v58  ;;  %v7208_v21 = vld [vmem:[#allocation5 + $0x2c8] sm:$0xff]   ;;  %v5829_v58 = vld [vmem:[%s8941_s5] sm:$0xff] }
 0xce1   : > { %v5132_v27 = vmax.f32 %v5100_v57, %v5116_v52  ;;  %v6686_v57 = vld [vmem:[%s8940_s4 + $0x1e8] sm:$0xff]  ;;  %v5831_v52 = vld [vmem:[%s8941_s5 + $0x10] sm:$0xff] }
 0xce2   : > { %v5133_v23 = vmax.f32 %v5101_v22, %v5117_v53  ;;  %v5010_v17 = vpop.f32.mrb[56].mxu0  ;;  %v5830_v22 = vld [vmem:[%s8941_s5 + $0x8] sm:$0xff]  ;;  %v5832_v53 = vld [vmem:[%s8941_s5 + $0x18] sm:$0xff] }
 0xce3   : > { %v5144_v30 = vpack.c.bf16 %v5132_v27, %v5130_v18  ;;  %v5102_v55 = vadd.f32 %v5077_v28, %v5010_v17  ;;  %v5012_v41 = vpop.f32.mrb[57].mxu0  ;;  %v5833_v18 = vld [vmem:[%s8941_s5 + $0x20] sm:$0xff]  ;;  %v5834_v27 = vld [vmem:[%s8941_s5 + $0x28] sm:$0xff]  ;;  %v7107_v17 = vpop.permute.xlu0 %7106 }
 0xce4   : > { %v5145_v33 = vpack.c.bf16 %v5133_v23, %v5131_v48  ;;  %v5103_v31 = vadd.f32 %v5077_v28, %v5012_v41  ;;  %v5014_v42 = vpop.f32.mrb[58].mxu0  ;;  %v5835_v28 = vld [vmem:[%s8941_s5 + $0x30] sm:$0xff]  ;;  %v6681_v48 = vld [vmem:[%s8940_s4 + $0x1c0] sm:$0xff]  ;;  %v7108_v41 = vunpack.i.l.bf16 %v7107_v17 }
 0xce5   : > { %v5118_v29 = vmul.f32 0.2, %v5102_v55  ;;  %v5104_v50 = vadd.f32 %v5082_v32, %v5014_v42  ;;  %5352 = vrot.lane.b32.xlu1 %v5144_v30, %s7336_s10  ;;  %v5016_v6 = vpop.f32.mrb[59].mxu0  ;;  %v6683_v23 = vld [vmem:[%s8940_s4 + $0x1d0] sm:$0xff] }
 0xce6   : > { %v5119_v9 = vmul.f32 0.2, %v5103_v31  ;;  %v5105_v49 = vadd.f32 %v5082_v32, %v5016_v6  ;;  %5354 = vrot.lane.b32.xlu0 %v5145_v33, %s7336_s10  ;;  %5241 = vmatprep.subr.bf16.mxu1 %v5145_v33 }
 0xce7   : > { %v5120_v59 = vmul.f32 0.2, %v5104_v50  ;;  %5242 = vmatpush1.bf16.msra.mxu1 %v5144_v30  ;;  %v5134_v12 = vmax.f32 %v5102_v55, %v5118_v29  ;;  %v6685_v55 = vld [vmem:[%s8940_s4 + $0x1e0] sm:$0xff] }
 0xce8   : > { %v5121_v11 = vmul.f32 0.2, %v5105_v49  ;;  %v5135_v38 = vmax.f32 %v5103_v31, %v5119_v9  ;;  %v6687_v31 = vld [vmem:[%s8940_s4 + $0x1f0] sm:$0xff] }
 0xce9   : > { %v5136_v44 = vmax.f32 %v5104_v50, %v5120_v59 }
 0xcea   : > { %v5137_v60 = vmax.f32 %v5105_v49, %v5121_v11  ;;  %v5020_v63 = vpop.f32.mrb[60].mxu0 }
 0xceb   : > { %v5146_v0 = vpack.c.bf16 %v5136_v44, %v5134_v12  ;;  %v5106_v10 = vadd.f32 %v5087_v62, %v5020_v63  ;;  %v5022_v36 = vpop.f32.mrb[61].mxu0 }
 0xcec   : > { %v5147_v1 = vpack.c.bf16 %v5137_v60, %v5135_v38  ;;  %v5107_v54 = vadd.f32 %v5087_v62, %v5022_v36  ;;  %v5024_v7 = vpop.f32.mrb[62].mxu0  ;;  %v7211_v36 = vld [vmem:[#allocation5 + $0x2a0] sm:$0xff]  }
 0xced   : > { %v5122_v26 = vmul.f32 0.2, %v5106_v10  ;;  %v5108_v51 = vadd.f32 %v5092_v61, %v5024_v7  ;;  %5358 = vrot.lane.b32.xlu1 %v5146_v0, %s7336_s10  ;;  %v5026_v40 = vpop.f32.mrb[63].mxu0 }
 0xcee   : > { %v5123_v13 = vmul.f32 0.2, %v5107_v54  ;;  %v5109_v45 = vadd.f32 %v5092_v61, %v5026_v40  ;;  %5360 = vrot.lane.b32.xlu0 %v5147_v1, %s7336_s10  ;;  %5243 = vmatprep.subr.bf16.mxu1 %v5147_v1 }
 0xcef   : > { %v5124_v14 = vmul.f32 0.2, %v5108_v51  ;;  %5244 = vmatpush1.bf16.msra.mxu1 %v5146_v0  ;;  %v5138_v43 = vmax.f32 %v5106_v10, %v5122_v26 }
 0xcf0   : > { %v5125_v15 = vmul.f32 0.2, %v5109_v45  ;;  %v5139_v16 = vmax.f32 %v5107_v54, %v5123_v13 }
 0xcf1   : > { %v5140_v56 = vmax.f32 %v5108_v51, %v5124_v14  ;;  %v7212_v14 = vld [vmem:[#allocation5 + $0x2a8] sm:$0xff]  }
 0xcf2   : > { %v5141_v34 = vmax.f32 %v5109_v45, %v5125_v15 }
 0xcf3   : > { %v5148_v19 = vpack.c.bf16 %v5140_v56, %v5138_v43 }
 0xcf4   : > { %v5149_v37 = vpack.c.bf16 %v5141_v34, %v5139_v16 }
 0xcf5   : > { %5364 = vrot.lane.b32.xlu0 %v5148_v19, %s7336_s10 }
 0xcf6   : > { %5366 = vrot.lane.b32.xlu1 %v5149_v37, %s7336_s10  ;;  %5245 = vmatprep.subr.bf16.mxu1 %v5149_v37 }
 0xcf7   : > { %5246 = vmatpush1.bf16.msra.mxu1 %v5148_v19 }
 0xcf9   : > { %5362 = vrot.lane.b32.xlu0 %v7320_v4, %s7336_s10 }
 0xcfa   : > { %5504 = vrot.lane.b32.xlu1 %v8475_v20, %s7337_s15  ;;  %6661 = vmatmul.mubr.msk.bf16.vlgmr.msra.gmra.mrb[48].mxu1 %vm1035_vm5, %v7207_v46  ;;  %v6682_v20 = vld [vmem:[%s8940_s4 + $0x1c8] sm:$0xff]  ;;  %v7213_v46 = vld [vmem:[#allocation5 + $0x2b0] sm:$0xff]  }
 0xcfb   : > { %5281 = vmatprep.mubr.bf16.mxu1 %v7320_v4 }
 0xcfd   : > { %7111 = vrot.lane.b32.xlu0 %v7320_v4, %s7337_s15 }
 0xcfe   : > { %5502 = vrot.lane.b32.xlu1 %v8473_v35, %s7337_s15  ;;  %v7210_v35 = vld [vmem:[#allocation5 + $0x2d8] sm:$0xff]  }
 0xd01   : > { %5510 = vrot.lane.b32.xlu0 %v5145_v33, %s7337_s15 }
 0xd02   : > { %5508 = vrot.lane.b32.xlu1 %v5144_v30, %s7337_s15  ;;  %6662 = vmatmul.mubr.msk.bf16.gmra.mrb[52].mxu1 %vm1035_vm5, %v7208_v21  ;;  %v5357_v30 = vpop.permute.xlu1 %5356 }
 0xd03   : > { %5291 = vmatprep.mubr.bf16.mxu1 %v7320_v4 }
 0xd05   : > { %5516 = vrot.lane.b32.xlu0 %v5147_v1, %s7337_s15 }
 0xd06   : > { %5518 = vrot.lane.b32.xlu1 %v7320_v4, %s7337_s15 }
 0xd09   : > { %5514 = vrot.lane.b32.xlu0 %v5146_v0, %s7337_s15 }
 0xd0a   : > { %5522 = vrot.lane.b32.xlu1 %v5149_v37, %s7337_s15  ;;  %6663 = vmatmul.mubr.msk.bf16.gmra.mrb[56].mxu1 %vm1035_vm5, %v7209_v39 }
 0xd0b   : > { %5301 = vmatprep.mubr.bf16.mxu1 %v7320_v4 }
 0xd0d   : > { %5524 = vrot.lane.b32.xlu0 %v7320_v4, %s7337_s15 }
 0xd0e   : > { %5520 = vrot.lane.b32.xlu1 %v5148_v19, %s7337_s15 }
 0xd11   : > { %5902 = vperm.xlu0 %7115, %v5829_v58  }
 0xd12   : > { %5660 = vperm.xlu1 %7033, %v6682_v20   ;;  %6664 = vmatmul.mubr.msk.bf16.gmra.mrb[60].mxu1 %vm1035_vm5, %v7210_v35 }
 0xd13   : > { %5429 = vmatprep.mubr.bf16.mxu1 %v7320_v4 }
 0xd15   : > { %7117 = vset.pattern.permute.xlu0 %v7319_v3 }
 0xd16   : > { %5670 = vperm.xlu1 %7033, %v6684_v5   ;;  %6054 = vperm.xlu0 %7117, %v5829_v58   ;;  %v7214_v5 = vld [vmem:[#allocation5 + $0x2b8] sm:$0xff]  }
 0xd1a   : > { %5680 = vperm.xlu1 %7033, %v6686_v57   ;;  %6062 = vperm.xlu0 %7117, %v5831_v52   ;;  %v7215_v57 = vld [vmem:[#allocation5 + $0x2e0] sm:$0xff]  }
 0xd1e   : > { %5690 = vperm.xlu1 %7033, %v6688_v47   ;;  %6066 = vperm.xlu0 %7117, %v5832_v53  }
 0xd22   : > { %7116 = vset.pattern.permute.xlu1 %v7318_v2  ;;  %6070 = vperm.xlu0 %7117, %v5833_v18  }
 0xd23   : > { %5906 = vperm.xlu1 %7116, %v5830_v22  }
 0xd26   : > { %6074 = vperm.xlu0 %7117, %v5834_v27  }
 0xd27   : > { %5910 = vperm.xlu1 %7116, %v5831_v52  }
 0xd2a   : > { %6078 = vperm.xlu0 %7117, %v5835_v28  }
 0xd2b   : > { %7118 = vset.pattern.permute.xlu1 %v7319_v3 }
 0xd2c   : > { %6058 = vperm.xlu1 %7118, %v5830_v22  }
 0xd2e   : > { %7120 = vset.pattern.permute.xlu0 %v7320_v4 }
 0xd2f   : > { %5655 = vperm.xlu0 %7120, %v6681_v48  }
 0xd30   : > { %7119 = vset.pattern.permute.xlu1 %v7318_v2  ;;  %v5836_v2 = vld [vmem:[%s8941_s5 + $0x38] sm:$0xff] }
 0xd31   : > { %5914 = vperm.xlu1 %7119, %v5832_v53  }
 0xd33   : > { %5665 = vperm.xlu0 %7120, %v6683_v23  }
 0xd35   : > { %5918 = vperm.xlu1 %7119, %v5833_v18  }
 0xd37   : > { %5675 = vperm.xlu0 %7120, %v6685_v55   ;;  %v8610_v55 = vunpack.c.h.bf16 %v7320_v4 }
 0xd39   : > { %5922 = vperm.xlu1 %7119, %v5834_v27  }
 0xd3b   : > { %5685 = vperm.xlu0 %7120, %v6687_v31  }
 0xd3d   : > { %5926 = vperm.xlu1 %7119, %v5835_v28  }
 0xd3f   : > { %5839 = vperm.xlu0 %7120, %v5829_v58   ;;  %v7216_v58 = vld [vmem:[#allocation5 + $0x2e8] sm:$0xff]  }
 0xd41   : > { %5930 = vperm.xlu1 %7119, %v5836_v2  }
 0xd43   : > { %5854 = vperm.xlu0 %7120, %v5832_v53  }
 0xd45   : > { %7121 = vset.pattern.permute.xlu1 %v7319_v3  ;;  %v7109_v3 = vunpack.i.h.bf16 %v7107_v17 }
 0xd46   : > { %6082 = vperm.xlu1 %7121, %v5836_v2  }
 0xd47   : > { %5864 = vperm.xlu0 %7120, %v5834_v27  }
 0xd4a   : > { %7122 = vset.pattern.permute.xlu1 %v7320_v4 }
 0xd4b   : > { %5844 = vperm.xlu1 %7122, %v5830_v22   ;;  %5874 = vperm.xlu0 %7120, %v5836_v2   ;;  %v8601_v2 = vunpack.c.l.bf16 %v7320_v4 }
 0xd4f   : > { %v5347_v32 = vpop.permute.xlu0 %5346  ;;  %5849 = vperm.xlu1 %7122, %v5831_v52   ;;  %v7217_v52 = vld [vmem:[#allocation5 + $0x2f0] sm:$0xff]  }
 0xd50   : > { %v5349_v33 = vpop.permute.xlu1 %5348  ;;  %v5369_v29 = vsel %vm5368_vm6, %v7108_v41, %v5347_v32 }
 0xd51   : > { %v5370_v42 = vsel %vm5368_vm6, %v5347_v32, %v5349_v33 }
 0xd52   : > { %5397 = vmatprep.subr.bf16.mxu1 %v5370_v42 }
 0xd53   : > { %5398 = vmatpush1.bf16.msra.mxu1 %v5369_v29  ;;  %5859 = vperm.xlu1 %7122, %v5833_v18   ;;  %v7218_v18 = vld [vmem:[#allocation5 + $0x2f8] sm:$0xff]  }
 0xd57   : > { %v5353_v50 = vpop.permute.xlu1 %5352  ;;  %5869 = vperm.xlu1 %7122, %v5835_v28  }
 0xd58   : > { %v5355_v6 = vpop.permute.xlu0 %5354  ;;  %v5371_v49 = vsel %vm5368_vm6, %v7109_v3, %v5353_v50 }
 0xd59   : > { %v5372_v9 = vsel %vm5368_vm6, %v5353_v50, %v5355_v6 }
 0xd5a   : > { %5399 = vmatprep.subr.bf16.mxu1 %v5372_v9 }
 0xd5b   : > { %5400 = vmatpush1.bf16.msra.mxu1 %v5371_v49 }
 0xd5f   : > { %v5359_v59 = vpop.permute.xlu1 %5358 }
 0xd60   : > { %v5361_v11 = vpop.permute.xlu0 %5360  ;;  %v5373_v44 = vsel %vm5368_vm6, %v5357_v30, %v5359_v59 }
 0xd61   : > { %v5374_v12 = vsel %vm5368_vm6, %v5359_v59, %v5361_v11 }
 0xd62   : > { %5401 = vmatprep.subr.bf16.mxu1 %v5374_v12 }
 0xd63   : > { %5402 = vmatpush1.bf16.msra.mxu1 %v5373_v44 }
 0xd67   : > { %v5365_v62 = vpop.permute.xlu0 %5364 }
 0xd68   : > { %v5367_v38 = vpop.permute.xlu1 %5366 }
 0xd69   : > { %v5376_v60 = vsel %vm5368_vm6, %v5365_v62, %v5367_v38 }
 0xd6a   : > { %5403 = vmatprep.subr.bf16.mxu1 %v5376_v60 }
 0xd6b   : > { %v5363_v63 = vpop.permute.xlu0 %5362 }
 0xd6c   : > { %v5375_v0 = vsel %vm5368_vm6, %v5363_v63, %v5365_v62  ;;  %v5505_v10 = vpop.permute.xlu1 %5504 }
 0xd6d   : > { %5404 = vmatpush1.bf16.msra.mxu1 %v5375_v0 }
 0xd6f   : > { %v7112_v61 = vpop.permute.xlu0 %7111 }
 0xd70   : > { %v7114_v1 = vunpack.i.h.bf16 %v7112_v61  ;;  %v7113_v54 = vunpack.i.l.bf16 %v7112_v61  ;;  %v5503_v7 = vpop.permute.xlu1 %5502  ;;  %6669 = vmatmul.mubr.msk.bf16.vlgmr.msra.gmra.mrb[48].mxu1 %vm1035_vm5, %v7211_v36 }
 0xd71   : > { %5439 = vmatprep.mubr.bf16.mxu1 %v7320_v4  ;;  %v5527_v51 = vsel %vm5526_vm7, %v5503_v7, %v5505_v10 }
 0xd72   : > { %v5528_v26 = vsel %vm5526_vm7, %v5505_v10, %v7113_v54 }
 0xd73   : > { %v5511_v40 = vpop.permute.xlu0 %5510  ;;  %5555 = vmatprep.subr.bf16.mxu1 %v5528_v26 }
 0xd74   : > { %v5509_v13 = vpop.permute.xlu1 %5508  ;;  %5556 = vmatpush1.bf16.msra.mxu1 %v5527_v51  ;;  %v5530_v45 = vsel %vm5526_vm7, %v5511_v40, %v7114_v1 }
 0xd75   : > { %5557 = vmatprep.subr.bf16.mxu1 %v5530_v45  ;;  %v5529_v43 = vsel %vm5526_vm7, %v5509_v13, %v5511_v40 }
 0xd77   : > { %v5517_v15 = vpop.permute.xlu0 %5516 }
 0xd78   : > { %v5519_v56 = vpop.permute.xlu1 %5518  ;;  %6670 = vmatmul.mubr.msk.bf16.gmra.mrb[52].mxu1 %vm1035_vm5, %v7212_v14 }
 0xd79   : > { %5558 = vmatpush1.bf16.msra.mxu1 %v5529_v43  ;;  %v5532_v16 = vsel %vm5526_vm7, %v5517_v15, %v5519_v56  ;;  %5449 = vmatprep.mubr.bf16.mxu1 %v7320_v4 }
 0xd7a   : > { %5559 = vmatprep.subr.bf16.mxu1 %v5532_v16 }
 0xd7b   : > { %v5515_v34 = vpop.permute.xlu0 %5514 }
 0xd7c   : > { %v5531_v19 = vsel %vm5526_vm7, %v5515_v34, %v5517_v15  ;;  %v5523_v37 = vpop.permute.xlu1 %5522 }
 0xd7d   : > { %5560 = vmatpush1.bf16.msra.mxu1 %v5531_v19 }
 0xd7f   : > { %v5525_v21 = vpop.permute.xlu0 %5524 }
 0xd80   : > { %v5521_v39 = vpop.permute.xlu1 %5520  ;;  %6671 = vmatmul.mubr.msk.bf16.gmra.mrb[56].mxu1 %vm1035_vm5, %v7213_v46  ;;  %v5534_v35 = vsel %vm5526_vm7, %v5523_v37, %v5525_v21 }
 0xd81   : > { %v5533_v20 = vsel %vm5526_vm7, %v5521_v39, %v5523_v37  ;;  %5561 = vmatprep.subr.bf16.mxu1 %v5534_v35  ;;  %5459 = vmatprep.mubr.bf16.mxu1 %v7320_v4 }
 0xd82   : > { %5562 = vmatpush1.bf16.msra.mxu1 %v5533_v20 }
 0xd88   : > { %6672 = vmatmul.mubr.msk.bf16.gmra.mrb[60].mxu1 %vm1035_vm5, %v7214_v5 }
 0xd89   : > { %5587 = vmatprep.mubr.bf16.mxu1 %v7320_v4 }
 0xd90   : > { %6677 = vmatmul.mubr.msk.bf16.vlgmr.msra.gmra.mrb[48].mxu1 %vm1035_vm5, %v7215_v57  ;;  %v8596_v28 = vpop.permute.xlu0 %5902 }
 0xd91   : > { %5597 = vmatprep.mubr.bf16.mxu1 %v7320_v4  ;;  %v5661_v47 = vpop.permute.xlu1 %5660 }
 0xd95   : > { %v8586_v22 = vpop.permute.xlu1 %5670  ;;  %v8603_v23 = vpop.permute.xlu0 %6054 }
 0xd96   : > { %v6087_v30 = vmul.f32 %v8603_v23, %v8601_v2 }
 0xd98   : > { %6678 = vmatmul.mubr.msk.bf16.gmra.mrb[52].mxu1 %vm1035_vm5, %v7216_v58  ;;  %6137 = vrot.lane.b32.xlu1 %v6087_v30, %s7323_s23 }
 0xd99   : > { %5607 = vmatprep.mubr.bf16.mxu1 %v7320_v4  ;;  %v8589_v53 = vpop.permute.xlu1 %5680  ;;  %v8613_v41 = vpop.permute.xlu0 %6062 }
 0xd9a   : > { %v6093_v32 = vmul.f32 %v8613_v41, %v8601_v2 }
 0xd9c   : > { %6149 = vrot.lane.b32.xlu1 %v6093_v32, %s7323_s23 }
 0xd9d   : > { %v8593_v27 = vpop.permute.xlu1 %5690  ;;  %v8622_v42 = vpop.permute.xlu0 %6066 }
 0xda0   : > { %6679 = vmatmul.mubr.msk.bf16.gmra.mrb[56].mxu1 %vm1035_vm5, %v7217_v52 }
 0xda1   : > { %5617 = vmatprep.mubr.bf16.mxu1 %v7320_v4  ;;  %v6096_v4 = vmul.f32 %v8622_v42, %v8610_v55  ;;  %v8627_v29 = vpop.permute.xlu0 %6070 }
 0xda2   : > { %v8598_v48 = vpop.permute.xlu1 %5906  ;;  %v6099_v3 = vmul.f32 %v8627_v29, %v8601_v2 }
 0xda4   : > { %6161 = vrot.lane.b32.xlu1 %v6099_v3, %s7323_s23 }
 0xda5   : > { %v8633_v50 = vpop.permute.xlu0 %6074 }
 0xda6   : > { %v8605_v17 = vpop.permute.xlu1 %5910  ;;  %v6102_v6 = vmul.f32 %v8633_v50, %v8610_v55 }
 0xda8   : > { %6680 = vmatmul.mubr.msk.bf16.gmra.mrb[60].mxu1 %vm1035_vm5, %v7218_v18  ;;  %vm6245_vm5 = vcmask 1048568  }
 0xda9   : > { %v8638_v9 = vpop.permute.xlu0 %6078 }
 0xdaa   : > { %v6105_v49 = vmul.f32 %v8638_v9, %v8601_v2 }
 0xdab   : > { %v8617_v33 = vpop.permute.xlu1 %6058 }
 0xdac   : > { %v6090_v31 = vmul.f32 %v8617_v33, %v8610_v55  ;;  %6173 = vrot.lane.b32.xlu1 %v6105_v49, %s7323_s23 }
 0xdae   : > { %6143 = vrot.lane.b32.xlu0 %v6090_v31, %s7323_s23  ;;  %v5656_v59 = vpop.permute.xlu0 %5655 }
 0xdb2   : > { %6155 = vrot.lane.b32.xlu0 %v6096_v4, %s7323_s23  ;;  %v5666_v26 = vpop.permute.xlu0 %5665 }
 0xdb6   : > { %6167 = vrot.lane.b32.xlu0 %v6102_v6, %s7323_s23  ;;  %v5676_v18 = vpop.permute.xlu0 %5675 }
 0xe63   : > { %v5589_v11 = vpop.f32.mrb[48].mxu1 }
 0xe64   : > { %v5693_v12 = vadd.f32 %v5656_v59, %v5589_v11  ;;  %v5591_v44 = vpop.f32.mrb[49].mxu1 }
 0xe65   : > { %v5694_v62 = vadd.f32 %v5656_v59, %v5591_v44  ;;  %v5593_v38 = vpop.f32.mrb[50].mxu1 }
 0xe66   : > { %v5709_v60 = vmul.f32 0.2, %v5693_v12  ;;  %v5695_v63 = vadd.f32 %v5661_v47, %v5593_v38  ;;  %v5595_v0 = vpop.f32.mrb[51].mxu1 }
 0xe67   : > { %v5710_v10 = vmul.f32 0.2, %v5694_v62  ;;  %v5696_v36 = vadd.f32 %v5661_v47, %v5595_v0 }
 0xe68   : > { %v5711_v61 = vmul.f32 0.2, %v5695_v63  ;;  %v5725_v54 = vmax.f32 %v5693_v12, %v5709_v60 }
 0xe69   : > { %v5712_v1 = vmul.f32 0.2, %v5696_v36  ;;  %v5726_v51 = vmax.f32 %v5694_v62, %v5710_v10 }
 0xe6a   : > { %v5727_v7 = vmax.f32 %v5695_v63, %v5711_v61 }
 0xe6b   : > { %v5728_v40 = vmax.f32 %v5696_v36, %v5712_v1  ;;  %v5599_v13 = vpop.f32.mrb[52].mxu1 }
 0xe6c   : > { %v5741_v45 = vpack.c.bf16 %v5727_v7, %v5725_v54  ;;  %v5697_v14 = vadd.f32 %v5666_v26, %v5599_v13  ;;  %v5601_v15 = vpop.f32.mrb[53].mxu1 }
 0xe6d   : > { %v5742_v43 = vpack.c.bf16 %v5728_v40, %v5726_v51  ;;  %v5698_v56 = vadd.f32 %v5666_v26, %v5601_v15  ;;  %v5603_v16 = vpop.f32.mrb[54].mxu1  ;;  %v5686_v51 = vpop.permute.xlu0 %5685 }
 0xe6e   : > { %v8643_v34 = vunpack.c.l.bf16 %v5741_v45  ;;  %v5713_v19 = vmul.f32 0.2, %v5697_v14  ;;  %v5699_v37 = vadd.f32 %v8586_v22, %v5603_v16  ;;  %v5605_v46 = vpop.f32.mrb[55].mxu1  ;;  %v8647_v35 = vunpack.c.h.bf16 %v5741_v45 }
 0xe6f   : > { %v5714_v21 = vmul.f32 0.2, %v5698_v56  ;;  %v5700_v39 = vadd.f32 %v8586_v22, %v5605_v46  ;;  %v8655_v31 = vunpack.c.l.bf16 %v5742_v43  ;;  %v8665_v10 = vunpack.c.h.bf16 %v5742_v43 }
 0xe70   : > { %v5715_v20 = vmul.f32 0.2, %v5699_v37  ;;  %v6085_v5 = vmul.f32 %v8603_v23, %v8643_v34  ;;  %v5933_v47 = vmul.f32 %v8596_v28, %v8643_v34  ;;  %v5729_v58 = vmax.f32 %v5697_v14, %v5713_v19 }
 0xe71   : > { %v5716_v57 = vmul.f32 0.2, %v5700_v39  ;;  %v5730_v30 = vmax.f32 %v5698_v56, %v5714_v21  ;;  %v6088_v49 = vmul.f32 %v8617_v33, %v8647_v35  ;;  %v5935_v44 = vmul.f32 %v8598_v48, %v8647_v35 }
 0xe72   : > { %v5731_v52 = vmax.f32 %v5699_v37, %v5715_v20  ;;  %6133 = vrot.lane.b32.xlu0 %v6085_v5, %s7323_s23  ;;  %5965 = vrot.lane.b32.xlu1 %v5933_v47, %s7322_s22  ;;  %v5934_v61 = vmul.f32 %v8596_v28, %v8655_v31  ;;  %v6086_v54 = vmul.f32 %v8603_v23, %v8655_v31 }
 0xe73   : > { %v5732_v32 = vmax.f32 %v5700_v39, %v5716_v57  ;;  %v5609_v22 = vpop.f32.mrb[56].mxu1  ;;  %v5936_v28 = vmul.f32 %v8598_v48, %v8665_v10  ;;  %v6089_v37 = vmul.f32 %v8617_v33, %v8665_v10  ;;  %v5915_v48 = vpop.permute.xlu1 %5914 }
 0xe74   : > { %v5743_v4 = vpack.c.bf16 %v5731_v52, %v5729_v58  ;;  %v5701_v3 = vadd.f32 %v5676_v18, %v5609_v22  ;;  %v5611_v6 = vpop.f32.mrb[57].mxu1 }
 0xe75   : > { %v5744_v59 = vpack.c.bf16 %v5732_v32, %v5730_v30  ;;  %v5702_v11 = vadd.f32 %v5676_v18, %v5611_v6  ;;  %v5613_v12 = vpop.f32.mrb[58].mxu1 }
 0xe76   : > { %v5717_v62 = vmul.f32 0.2, %v5701_v3  ;;  %v5703_v38 = vadd.f32 %v8589_v53, %v5613_v12  ;;  %6139 = vrot.lane.b32.xlu0 %v6088_v49, %s7323_s23  ;;  %v5615_v60 = vpop.f32.mrb[59].mxu1  ;;  %5969 = vrot.lane.b32.xlu1 %v5935_v44, %s7322_s22  ;;  %v8673_v45 = vunpack.c.l.bf16 %v5743_v4  ;;  %v8677_v56 = vunpack.c.h.bf16 %v5743_v4 }
 0xe77   : > { %v5718_v63 = vmul.f32 0.2, %v5702_v11  ;;  %v5704_v0 = vadd.f32 %v8589_v53, %v5615_v60  ;;  %v8690_v22 = vunpack.c.h.bf16 %v5744_v59  ;;  %v5919_v44 = vpop.permute.xlu1 %5918 }
 0xe78   : > { %v5719_v36 = vmul.f32 0.2, %v5703_v38  ;;  %v5733_v7 = vmax.f32 %v5701_v3, %v5717_v62  ;;  %v5937_v47 = vmul.f32 %v8605_v17, %v8673_v45  ;;  %v5939_v52 = vmul.f32 %v5915_v48, %v8677_v56 }
 0xe79   : > { %v5720_v1 = vmul.f32 0.2, %v5704_v0  ;;  %v5734_v40 = vmax.f32 %v5702_v11, %v5718_v63  ;;  %v8694_v3 = vunpack.c.l.bf16 %v5744_v59  ;;  %v6091_v49 = vmul.f32 %v8613_v41, %v8673_v45 }
 0xe7a   : > { %v5735_v26 = vmax.f32 %v5703_v38, %v5719_v36  ;;  %5967 = vrot.lane.b32.xlu0 %v5934_v61, %s7322_s22  ;;  %6135 = vrot.lane.b32.xlu1 %v6086_v54, %s7323_s23  ;;  %v5940_v11 = vmul.f32 %v5915_v48, %v8690_v22  ;;  %v6095_v60 = vmul.f32 %v8622_v42, %v8690_v22 }
 0xe7b   : > { %v5736_v13 = vmax.f32 %v5704_v0, %v5720_v1  ;;  %v5619_v53 = vpop.f32.mrb[60].mxu1  ;;  %v5938_v12 = vmul.f32 %v8605_v17, %v8694_v3  ;;  %v6092_v62 = vmul.f32 %v8613_v41, %v8694_v3  ;;  %v5923_v17 = vpop.permute.xlu1 %5922 }
 0xe7c   : > { %v5745_v14 = vpack.c.bf16 %v5735_v26, %v5733_v7  ;;  %v5705_v15 = vadd.f32 %v5686_v51, %v5619_v53  ;;  %v5621_v43 = vpop.f32.mrb[61].mxu1 }
 0xe7d   : > { %v5746_v23 = vpack.c.bf16 %v5736_v13, %v5734_v40  ;;  %v5706_v16 = vadd.f32 %v5686_v51, %v5621_v43  ;;  %v5623_v19 = vpop.f32.mrb[62].mxu1 }
 0xe7e   : > { %v5721_v46 = vmul.f32 0.2, %v5705_v15  ;;  %v5707_v21 = vadd.f32 %v8593_v27, %v5623_v19  ;;  %5971 = vrot.lane.b32.xlu0 %v5936_v28, %s7322_s22  ;;  %v5625_v39 = vpop.f32.mrb[63].mxu1  ;;  %6141 = vrot.lane.b32.xlu1 %v6089_v37, %s7323_s23  ;;  %v8705_v59 = vunpack.c.l.bf16 %v5745_v14  ;;  %v8709_v38 = vunpack.c.h.bf16 %v5745_v14 }
 0xe7f   : > { %v5722_v20 = vmul.f32 0.2, %v5706_v16  ;;  %v5708_v5 = vadd.f32 %v8593_v27, %v5625_v39  ;;  %v6094_v27 = vmul.f32 %v8622_v42, %v8677_v56  ;;  %v8719_v36 = vunpack.c.h.bf16 %v5746_v23  ;;  %v5927_v1 = vpop.permute.xlu1 %5926  ;;  %v6301_v39 = vld [vmem:[#allocation4] sm:$0x1] }
 0xe80   : > { %v5723_v57 = vmul.f32 0.2, %v5707_v21  ;;  %v5737_v33 = vmax.f32 %v5705_v15, %v5721_v46  ;;  %v5941_v63 = vmul.f32 %v5919_v44, %v8705_v59  ;;  %v5943_v0 = vmul.f32 %v5923_v17, %v8709_v38 }
 0xe81   : > { %v5724_v58 = vmul.f32 0.2, %v5708_v5  ;;  %v5738_v30 = vmax.f32 %v5706_v16, %v5722_v20  ;;  %v6100_v41 = vmul.f32 %v8633_v50, %v8709_v38  ;;  %v8723_v61 = vunpack.c.l.bf16 %v5746_v23  ;;  %v8767_v20 = vpop.permute.xlu0 %5839 }
 0xe82   : > { %v5739_v18 = vmax.f32 %v5707_v21, %v5723_v57  ;;  %5973 = vrot.lane.b32.xlu0 %v5937_v47, %s7322_s22  ;;  %5977 = vrot.lane.b32.xlu1 %v5939_v52, %s7322_s22  ;;  %v6097_v42 = vmul.f32 %v8627_v29, %v8705_v59  ;;  %v5944_v54 = vmul.f32 %v5923_v17, %v8719_v36 }
 0xe83   : > { %v5740_v32 = vmax.f32 %v5708_v5, %v5724_v58  ;;  %v5942_v7 = vmul.f32 %v5919_v44, %v8723_v61  ;;  %v6098_v51 = vmul.f32 %v8627_v29, %v8723_v61  ;;  %v5931_v40 = vpop.permute.xlu1 %5930  ;;  %v6101_v53 = vmul.f32 %v8633_v50, %v8719_v36 }
 0xe84   : > { %v5747_v4 = vpack.c.bf16 %v5739_v18, %v5737_v33 }
 0xe85   : > { %v5748_v6 = vpack.c.bf16 %v5740_v32, %v5738_v30  ;;  %v8771_v57 = vpop.permute.xlu0 %5854 }
 0xe86   : > { %6151 = vrot.lane.b32.xlu0 %v6094_v27, %s7323_s23  ;;  %6145 = vrot.lane.b32.xlu1 %v6091_v49, %s7323_s23  ;;  %v8733_v26 = vunpack.c.l.bf16 %v5747_v4  ;;  %v8737_v13 = vunpack.c.h.bf16 %v5747_v4 }
 0xe87   : > { %v6083_v43 = vpop.permute.xlu1 %6082  ;;  %v8747_v29 = vunpack.c.h.bf16 %v5748_v6  ;;  %v8750_v23 = vunpack.c.l.bf16 %v5748_v6 }
 0xe88   : > { %v5945_v14 = vmul.f32 %v5927_v1, %v8733_v26  ;;  %v5947_v15 = vmul.f32 %v5931_v40, %v8737_v13  ;;  %v6106_v28 = vmul.f32 %v6083_v43, %v8737_v13  ;;  %v6103_v50 = vmul.f32 %v8638_v9, %v8733_v26 }
 0xe89   : > { %v5948_v16 = vmul.f32 %v5931_v40, %v8747_v29  ;;  %v5946_v19 = vmul.f32 %v5927_v1, %v8750_v23  ;;  %v6104_v37 = vmul.f32 %v8638_v9, %v8750_v23  ;;  %v6107_v46 = vmul.f32 %v6083_v43, %v8747_v29  ;;  %v8775_v47 = vpop.permute.xlu0 %5864 }
 0xe8a   : > { %5979 = vrot.lane.b32.xlu0 %v5940_v11, %s7322_s22  ;;  %5975 = vrot.lane.b32.xlu1 %v5938_v12, %s7322_s22  ;;  %v6108_v21 = vmul.f32 %v6083_v43, %v8610_v55 }
 0xe8b   : > { %v5845_v5 = vpop.permute.xlu1 %5844 }
 0xe8c   : > { %v5882_v1 = vmul.f32 %v5845_v5, %v8665_v10 }
 0xe8d   : > { %v8779_v33 = vpop.permute.xlu0 %5874 }
 0xe8e   : > { %6147 = vrot.lane.b32.xlu0 %v6092_v62, %s7323_s23  ;;  %6153 = vrot.lane.b32.xlu1 %v6095_v60, %s7323_s23  ;;  %v5879_v62 = vmul.f32 %v8767_v20, %v8655_v31 }
 0xe8f   : > { %v8769_v48 = vpop.permute.xlu1 %5849 }
 0xe91   : > { %v6144_v18 = vpop.permute.xlu0 %6143 }
 0xe92   : > { %5981 = vrot.lane.b32.xlu0 %v5941_v63, %s7322_s22  ;;  %5985 = vrot.lane.b32.xlu1 %v5943_v0, %s7322_s22 }
 0xe93   : > { %v8773_v9 = vpop.permute.xlu1 %5859 }
 0xe95   : > { %v6156_v32 = vpop.permute.xlu0 %6155 }
 0xe96   : > { %6163 = vrot.lane.b32.xlu0 %v6100_v41, %s7323_s23  ;;  %6157 = vrot.lane.b32.xlu1 %v6097_v42, %s7323_s23  ;;  %v5878_v42 = vmul.f32 %v8767_v20, %v8643_v34 }
 0xe97   : > { %v8777_v58 = vpop.permute.xlu1 %5869 }
 0xe99   : > { %v8783_v27 = vpop.permute.xlu0 %6167 }
 0xe9a   : > { %5987 = vrot.lane.b32.xlu0 %v5944_v54, %s7322_s22  ;;  %5983 = vrot.lane.b32.xlu1 %v5942_v7, %s7322_s22  ;;  %v5881_v7 = vmul.f32 %v5845_v5, %v8647_v35 }
 0xe9b   : > { %v6138_v52 = vpop.permute.xlu1 %6137 }
 0xe9e   : > { %6159 = vrot.lane.b32.xlu0 %v6098_v51, %s7323_s23  ;;  %6165 = vrot.lane.b32.xlu1 %v6101_v53, %s7323_s23 }
 0xe9f   : > { %v6150_v30 = vpop.permute.xlu1 %6149 }
 0xea2   : > { %5989 = vrot.lane.b32.xlu0 %v5945_v14, %s7322_s22  ;;  %5993 = vrot.lane.b32.xlu1 %v5947_v15, %s7322_s22 }
 0xea3   : > { %v8781_v4 = vpop.permute.xlu1 %6161 }
 0xea6   : > { %6175 = vrot.lane.b32.xlu0 %v6106_v28, %s7323_s23  ;;  %6169 = vrot.lane.b32.xlu1 %v6103_v50, %s7323_s23 }
 0xea7   : > { %v8785_v6 = vpop.permute.xlu1 %6173 }
 0xeaa   : > { %5995 = vrot.lane.b32.xlu0 %v5948_v16, %s7322_s22  ;;  %5991 = vrot.lane.b32.xlu1 %v5946_v19, %s7322_s22  ;;  %s284_s22 = sand.u32 1, %s7305_s27  }
 0xeab   : > { %s6348_s6 = scalar_lea.sflag [#allocation7], %s284_s22 }
 0xeae   : > { %6171 = vrot.lane.b32.xlu0 %v6104_v37, %s7323_s23  ;;  %6177 = vrot.lane.b32.xlu1 %v6107_v46, %s7323_s23 }
 0xeb2   : > { %6179 = vrot.lane.b32.xlu0 %v6108_v21, %s7323_s23  ;;  %6304 = vperm.xlu1 %7122, %v6301_v39   ;;  %s6439_s23 = sshll.u32 %s284_s22, 1 }
 0xeb3   : > { %s286_s9 = scalar_lea.vmem [#allocation8], %s6439_s23 }
 0xeb4   : > { %s6362_s10 = sshll.u32 %s286_s9, 4  ;;  %s8893_s10 = int_to_ptr.vmem [resolvable:$true] %s6362_s10 }
 0xeb5   : > { %p7254_p2 = scmp.lt.s32.totalorder %s8893_s10, %s7252_s18 }
 0xee4   : > { %v8787_v49 = vpop.permute.xlu0 %6133  ;;  %v5966_v11 = vpop.permute.xlu1 %5965 }
 0xee8   : > { %v8789_v12 = vpop.permute.xlu0 %6139  ;;  %v5970_v44 = vpop.permute.xlu1 %5969 }
 0xeec   : > { %v5968_v60 = vpop.permute.xlu0 %5967  ;;  %v6136_v17 = vpop.permute.xlu1 %6135 }
 0xeed   : > { %v5997_v63 = vsel %vm508_vm3, %v5966_v11, %v5968_v60  ;;  %v6031_v0 = vadd.f32 %v5968_v60, %v5879_v62  ;;  %v6182_v41 = vsel %vm709_vm2, %v6136_v17, %v6138_v52  ;;  %v6181_v28 = vsel %vm709_vm2, %v8787_v49, %v6136_v17 }
 0xeee   : > { %v6030_v51 = vadd.f32 %v5997_v63, %v5878_v42  ;;  %v5884_v17 = vmul.f32 %v8769_v48, %v8673_v45  ;;  %v5885_v63 = vmul.f32 %v8769_v48, %v8694_v3  ;;  %v5887_v42 = vmul.f32 %v8771_v57, %v8677_v56 }
 0xeef   : > { %v6223_v54 = vadd.f32 %v6182_v41, %v6031_v0 }
 0xef0   : > { %v5972_v40 = vpop.permute.xlu0 %5971  ;;  %v6142_v53 = vpop.permute.xlu1 %6141  ;;  %v6222_v10 = vadd.f32 %v6181_v28, %v6030_v51 }
 0xef1   : > { %v5998_v31 = vsel %vm508_vm3, %v5970_v44, %v5972_v40  ;;  %v6034_v14 = vadd.f32 %v5972_v40, %v5882_v1  ;;  %v6184_v15 = vsel %vm709_vm2, %v6142_v53, %v6144_v18  ;;  %v6183_v34 = vsel %vm709_vm2, %v8789_v12, %v6142_v53 }
 0xef2   : > { %v6033_v43 = vadd.f32 %v5998_v31, %v5881_v7  ;;  %v6280_v35 = vsel %vm508_vm3, %v6223_v54, 0.0  ;;  %v5888_v1 = vmul.f32 %v8771_v57, %v8690_v22  ;;  %v5880_v54 = vmul.f32 %v5845_v5, %v8610_v55 }
 0xef3   : > { %v6226_v50 = vadd.f32 %v6184_v15, %v6034_v14  ;;  %v5877_v22 = vmul.f32 %v8767_v20, %v8601_v2 }
 0xef4   : > { %v6225_v16 = vadd.f32 %v6183_v34, %v6033_v43  ;;  %v5974_v19 = vpop.permute.xlu0 %5973  ;;  %v5978_v46 = vpop.permute.xlu1 %5977  ;;  %v6032_v5 = vadd.f32 %v5970_v44, %v5880_v54 }
 0xef5   : > { %v6281_v37 = vsel %vm508_vm3, %v6226_v50, 0.0 }
 0xef6   : > { %v6282_v21 = vadd.f32 %v6281_v37, %v6280_v35  ;;  %v6267_v39 = vadd.f32 %v6225_v16, %v6222_v10  ;;  %v6029_v37 = vadd.f32 %v5966_v11, %v5877_v22  ;;  %v5889_v11 = vmul.f32 %v8773_v9, %v8601_v2 }
 0xef8   : > { %v6152_v52 = vpop.permute.xlu0 %6151  ;;  %v6146_v18 = vpop.permute.xlu1 %6145 }
 0xefc   : > { %v5980_v62 = vpop.permute.xlu0 %5979  ;;  %v5976_v60 = vpop.permute.xlu1 %5975 }
 0xefd   : > { %v6000_v0 = vsel %vm508_vm3, %v5978_v46, %v5980_v62  ;;  %v5999_v41 = vsel %vm508_vm3, %v5974_v19, %v5976_v60  ;;  %v6037_v51 = vadd.f32 %v5976_v60, %v5885_v63  ;;  %v6040_v45 = vadd.f32 %v5980_v62, %v5888_v1 }
 0xefe   : > { %v6036_v7 = vadd.f32 %v5999_v41, %v5884_v17  ;;  %v6039_v53 = vadd.f32 %v6000_v0, %v5887_v42  ;;  %v5886_v1 = vmul.f32 %v8771_v57, %v8610_v55 }
 0xf00   : > { %v6148_v40 = vpop.permute.xlu0 %6147  ;;  %v6154_v14 = vpop.permute.xlu1 %6153 }
 0xf01   : > { %v6185_v31 = vsel %vm709_vm2, %v6146_v18, %v6148_v40  ;;  %v6186_v3 = vsel %vm709_vm2, %v6148_v40, %v6150_v30  ;;  %v6187_v28 = vsel %vm709_vm2, %v6152_v52, %v6154_v14  ;;  %v6188_v56 = vsel %vm709_vm2, %v6154_v14, %v6156_v32 }
 0xf02   : > { %v6228_v15 = vadd.f32 %v6185_v31, %v6036_v7  ;;  %v6229_v43 = vadd.f32 %v6186_v3, %v6037_v51  ;;  %v6232_v34 = vadd.f32 %v6188_v56, %v6040_v45  ;;  %v6231_v16 = vadd.f32 %v6187_v28, %v6039_v53 }
 0xf03   : > { %v5883_v30 = vmul.f32 %v8769_v48, %v8601_v2  ;;  %v6224_v32 = vadd.f32 %v8789_v12, %v6032_v5  ;;  %v5892_v45 = vmul.f32 %v8775_v47, %v8610_v55  ;;  %v5893_v31 = vmul.f32 %v8775_v47, %v8709_v38 }
 0xf04   : > { %v6268_v50 = vadd.f32 %v6267_v39, %v6228_v15  ;;  %v6283_v10 = vsel %vm508_vm3, %v6229_v43, 0.0  ;;  %v5982_v35 = vpop.permute.xlu0 %5981  ;;  %v5986_v60 = vpop.permute.xlu1 %5985  ;;  %v6285_v63 = vsel %vm508_vm3, %v6232_v34, 0.0  ;;  %v6221_v39 = vadd.f32 %v8787_v49, %v6029_v37 }
 0xf05   : > { %v6284_v62 = vadd.f32 %v6283_v10, %v6282_v21  ;;  %v6035_v0 = vadd.f32 %v5974_v19, %v5883_v30  ;;  %v6247_v48 = vsel %vm6245_vm5, %v6224_v32, 0.0  ;;  %v5890_v21 = vmul.f32 %v8773_v9, %v8705_v59 }
 0xf06   : > { %v6269_v17 = vadd.f32 %v6268_v50, %v6231_v16  ;;  %v5891_v19 = vmul.f32 %v8773_v9, %v8723_v61  ;;  %v6246_v49 = vsel %vm6245_vm5, %v6221_v39, 0.0  ;;  %v6041_v57 = vadd.f32 %v5982_v35, %v5889_v11 }
 0xf07   : > { %v6286_v20 = vadd.f32 %v6285_v63, %v6284_v62  ;;  %v6227_v41 = vadd.f32 %v6146_v18, %v6035_v0  ;;  %v6038_v18 = vadd.f32 %v5978_v46, %v5886_v1  ;;  %v6248_v51 = vadd.f32 %v6247_v48, %v6246_v49 }
 0xf08   : > { %v6164_v44 = vpop.permute.xlu0 %6163  ;;  %v6158_v42 = vpop.permute.xlu1 %6157  ;;  %v5894_v61 = vmul.f32 %v8775_v47, %v8719_v36  ;;  %v6044_v50 = vadd.f32 %v5986_v60, %v5892_v45  ;;  %v5899_v45 = vmul.f32 %v8779_v33, %v8737_v13 }
 0xf09   : > { %v6249_v54 = vsel %vm6245_vm5, %v6227_v41, 0.0  ;;  %v6230_v59 = vadd.f32 %v6152_v52, %v6038_v18  ;;  %v6233_v46 = vadd.f32 %v6158_v42, %v6041_v57 }
 0xf0a   : > { %v6250_v9 = vadd.f32 %v6249_v54, %v6248_v51  ;;  %v6236_v39 = vadd.f32 %v6164_v44, %v6044_v50 }
 0xf0b   : > { %v6251_v47 = vsel %vm6245_vm5, %v6230_v59, 0.0  ;;  %v6253_v16 = vsel %vm6245_vm5, %v6233_v46, 0.0 }
 0xf0c   : > { %v5988_v12 = vpop.permute.xlu0 %5987  ;;  %v5984_v7 = vpop.permute.xlu1 %5983  ;;  %v6252_v63 = vadd.f32 %v6251_v47, %v6250_v9 }
 0xf0d   : > { %v6002_v40 = vsel %vm508_vm3, %v5986_v60, %v5988_v12  ;;  %v6001_v53 = vsel %vm508_vm3, %v5982_v35, %v5984_v7  ;;  %v6043_v14 = vadd.f32 %v5984_v7, %v5891_v19  ;;  %v6046_v28 = vadd.f32 %v5988_v12, %v5894_v61 }
 0xf0e   : > { %v6042_v3 = vadd.f32 %v6001_v53, %v5890_v21  ;;  %v6045_v43 = vadd.f32 %v6002_v40, %v5893_v31  ;;  %v6255_v12 = vsel %vm6245_vm5, %v6236_v39, 0.0  ;;  %v5897_v7 = vmul.f32 %v8777_v58, %v8750_v23 }
 0xf10   : > { %v6160_v15 = vpop.permute.xlu0 %6159  ;;  %v6166_v5 = vpop.permute.xlu1 %6165 }
 0xf11   : > { %v6189_v56 = vsel %vm709_vm2, %v6158_v42, %v6160_v15  ;;  %v6190_v22 = vsel %vm709_vm2, %v6160_v15, %v8781_v4  ;;  %v6191_v38 = vsel %vm709_vm2, %v6164_v44, %v6166_v5  ;;  %v6192_v36 = vsel %vm709_vm2, %v6166_v5, %v8783_v27 }
 0xf12   : > { %v6234_v52 = vadd.f32 %v6189_v56, %v6042_v3  ;;  %v6235_v34 = vadd.f32 %v6190_v22, %v6043_v14  ;;  %v6238_v10 = vadd.f32 %v6192_v36, %v6046_v28  ;;  %v6237_v37 = vadd.f32 %v6191_v38, %v6045_v43 }
 0xf13   : > { %v5898_v4 = vmul.f32 %v8779_v33, %v8610_v55  ;;  %v5895_v27 = vmul.f32 %v8777_v58, %v8601_v2  ;;  %v6254_v42 = vadd.f32 %v6253_v16, %v6252_v63  ;;  %v5896_v44 = vmul.f32 %v8777_v58, %v8733_v26 }
 0xf14   : > { %v6270_v35 = vadd.f32 %v6269_v17, %v6234_v52  ;;  %v6287_v30 = vsel %vm508_vm3, %v6235_v34, 0.0  ;;  %v5990_v62 = vpop.permute.xlu0 %5989  ;;  %v5994_v0 = vpop.permute.xlu1 %5993  ;;  %v6289_v60 = vsel %vm508_vm3, %v6238_v10, 0.0  ;;  %v5900_v26 = vmul.f32 %v8779_v33, %v8747_v29 }
 0xf15   : > { %v6288_v32 = vadd.f32 %v6287_v30, %v6286_v20  ;;  %v6050_v17 = vadd.f32 %v5994_v0, %v5898_v4  ;;  %v6047_v48 = vadd.f32 %v5990_v62, %v5895_v27  ;;  %v6256_v49 = vadd.f32 %v6255_v12, %v6254_v42 }
 0xf16   : > { %v6271_v41 = vadd.f32 %v6270_v35, %v6237_v37 }
 0xf17   : > { %v6290_v1 = vadd.f32 %v6289_v60, %v6288_v32 }
 0xf18   : > { %v6176_v11 = vpop.permute.xlu0 %6175  ;;  %v6170_v21 = vpop.permute.xlu1 %6169 }
 0xf19   : > { %v6239_v19 = vadd.f32 %v6170_v21, %v6047_v48  ;;  %v6242_v55 = vadd.f32 %v6176_v11, %v6050_v17 }
 0xf1b   : > { %v6257_v20 = vsel %vm6245_vm5, %v6239_v19, 0.0  ;;  %v6259_v51 = vsel %vm6245_vm5, %v6242_v55, 0.0 }
 0xf1c   : > { %v5996_v18 = vpop.permute.xlu0 %5995  ;;  %v6258_v54 = vadd.f32 %v6257_v20, %v6256_v49  ;;  %v5992_v2 = vpop.permute.xlu1 %5991 }
 0xf1d   : > { %v6003_v57 = vsel %vm508_vm3, %v5990_v62, %v5992_v2  ;;  %v6004_v53 = vsel %vm508_vm3, %v5994_v0, %v5996_v18  ;;  %v6049_v31 = vadd.f32 %v5992_v2, %v5897_v7  ;;  %v6052_v13 = vadd.f32 %v5996_v18, %v5900_v26 }
 0xf1e   : > { %v6260_v40 = vadd.f32 %v6259_v51, %v6258_v54  ;;  %v6048_v59 = vadd.f32 %v6003_v57, %v5896_v44  ;;  %v6051_v3 = vadd.f32 %v6004_v53, %v5899_v45  ;;  %v7338_v62 = vmov 1966171168  }
 0xf1f   : > { %v6319_v4 = vunpack.c.l.s4 %v7338_v62 }
 0xf20   : > { %v6172_v61 = vpop.permute.xlu0 %6171  ;;  %v6261_v9 = vrot.slane %v6260_v40, 4  ;;  %v6178_v58 = vpop.permute.xlu1 %6177 }
 0xf21   : > { %v6193_v46 = vsel %vm709_vm2, %v6170_v21, %v6172_v61  ;;  %v6194_v23 = vsel %vm709_vm2, %v6172_v61, %v8785_v6  ;;  %v6195_v43 = vsel %vm709_vm2, %v6176_v11, %v6178_v58  ;;  %v6320_v39 = vunpack.c.0.s8 %v6319_v4 }
 0xf22   : > { %v6240_v14 = vadd.f32 %v6193_v46, %v6048_v59  ;;  %v6241_v15 = vadd.f32 %v6194_v23, %v6049_v31  ;;  %v6262_v28 = vadd.f32 %v6261_v9, %v6260_v40  ;;  %v6243_v5 = vadd.f32 %v6195_v43, %v6051_v3 }
 0xf23   : > { %v6323_v11 = vsub.s32 %v6320_v39, %v7541_v24 }
 0xf24   : > { %v6272_v56 = vadd.f32 %v6271_v41, %v6240_v14  ;;  %v6291_v22 = vsel %vm508_vm3, %v6241_v15, 0.0  ;;  %v6180_v52 = vpop.permute.xlu0 %6179  ;;  %v6263_v36 = vrot.slane %v6262_v28, 2 }
 0xf25   : > { %v6292_v34 = vadd.f32 %v6291_v22, %v6290_v1  ;;  %v6196_v29 = vsel %vm709_vm2, %v6178_v58, %v6180_v52 }
 0xf26   : > { %v6273_v33 = vadd.f32 %v6272_v56, %v6243_v5  ;;  %v6244_v38 = vadd.f32 %v6196_v29, %v6052_v13  ;;  %v6264_v16 = vadd.f32 %v6263_v36, %v6262_v28 }
 0xf28   : > { %v6274_v6 = vrot.slane %v6273_v33, 4  ;;  %v6293_v47 = vsel %vm508_vm3, %v6244_v38, 0.0  ;;  %v6265_v0 = vrot.slane %v6264_v16, 1 }
 0xf29   : > { %v6294_v50 = vadd.f32 %v6293_v47, %v6292_v34 }
 0xf2a   : > { %v6275_v10 = vadd.f32 %v6274_v6, %v6273_v33  ;;  %v6266_v1 = vadd.f32 %v6265_v0, %v6264_v16 }
 0xf2b   : > { %v6295_v35 = vrot.slane %v6294_v50, 4 }
 0xf2c   : > { %v6276_v30 = vrot.slane %v6275_v10, 2 }
 0xf2d   : > { %v6296_v37 = vadd.f32 %v6295_v35, %v6294_v50 }
 0xf2e   : > { %v6277_v63 = vadd.f32 %v6276_v30, %v6275_v10 }
 0xf2f   : > { %v6297_v32 = vrot.slane %v6296_v37, 2 }
 0xf30   : > { %v6278_v27 = vrot.slane %v6277_v63, 1 }
 0xf31   : > { %v6298_v41 = vadd.f32 %v6297_v32, %v6296_v37  ;;  %v6305_v42 = vpop.permute.xlu1 %6304 }
 0xf32   : > { %v6279_v60 = vadd.f32 %v6278_v27, %v6277_v63  ;;  %v6310_v48 = vrot.slane %v6305_v42, %v7544_v25 }
 0xf33   : > { %v6299_v17 = vrot.slane %v6298_v41, 1 }
 0xf34   : > { %v6311_v12 = vadd.f32 %v6310_v48, %v6266_v1  ;;  %v6312_v19 = vadd.f32 %v6310_v48, %v6279_v60 }
 0xf35   : > { %v6300_v21 = vadd.f32 %v6299_v17, %v6298_v41 }
 0xf36   : > { %v6317_v49 = vcombine.low %v6311_v12, %v6312_v19 }
 0xf37   : > { %v6313_v55 = vadd.f32 %v6310_v48, %v6300_v21 }
 0xf38   : > { %v6324_v20 = vrot.slane %v6317_v49, %v6323_v11 }
 0xf39   : > { %v6331_v18 = vrot.slane %v6313_v55, %v6323_v11 }
 0xf3b   : > { %v6332_v54 = vcombine.low %v6324_v20, %v6331_v18 }
 0xf3d   : > { %v6339_v2 = vrot.slane %v6332_v54, %v6323_v11 }
 0xf3f   : > { %6340 = vrot.lane.b32.xlu0 %v6339_v2, %s7324_s24  ;;  %s7247_s24 = scalar_lea.vmem %s8893_s10, 32 }
 0xf40   : > { %p7248_p6 = scmp.ne.s32.totalorder %s8893_s10, %s7247_s24  ;;  %p7255_p3 = scmp.lt.s32.totalorder %s7253_s19, %s7247_s24 }
 0xf42   : > { %p7249_p10 = pnand %p7248_p6, %p8956_p9  ;;  %p7256_p4 = por %p7255_p3, %p7254_p2 }
 0xf44   : > { %p7250_p12 = pneg %p7249_p10 }
 0xf46   : > { %p7257_p7 = pnand %p7256_p4, %p7250_p12 }
 0xfb1   : > { %v6341_v25 = vpop.permute.xlu0 %6340 }
 0xfb2   : > { %v6342_v44 = vrot.slane %v6341_v25, 1 }
 0xfb4   : > { %v6344_v24 = vsel %vm942_vm4, %v6341_v25, %v6342_v44 }
 0xfb5   : > { %6346 = vst.msk [vmem:[%s286_s9] sm:$0x3] %vm7483_vm1, %v6344_v24 }
 0xfb6   : > { %7260 = shalt.err (!%p7257_p7)
}
 0xfb7   : > { %s7261_s20 = scalar_lea.hbm %s8891_s14, 32  ;;  %s7265_s22 = scalar_lea.hbm %s8943_s7, 64 }
 0xfb8   : > { %p7262_p8 = scmp.ne.s32.totalorder %s8891_s14, %s7261_s20  ;;  %p7266_p1 = scmp.lt.u32.totalorder %s8891_s14, %s8943_s7 }
 0xfb9   : > { %p7267_p0 = scmp.lt.u32.totalorder %s7265_s22, %s7261_s20  ;;  %p7269_p6 = scmp.lt.u32.totalorder %s7261_s20, %s8891_s14 }
 0xfba   : > { %p7263_p11 = pnand %p7262_p8, %p8956_p9 }
 0xfbb   : > { %p7268_p5 = por %p7267_p0, %p7266_p1 }
 0xfbc   : > { %p7264_p13 = pneg %p7263_p11 }
 0xfbd   : > { %p7270_p10 = por %p7269_p6, %p7268_p5 }
 0xfbf   : > { %p7271_p12 = pnand %p7270_p10, %p7264_p13 }
 0xfc1   : > { %7274 = shalt.err (!%p7271_p12)
}
 0xfc2   : > { %6955 = dma.vmem_to_hbm [thread:$0]  (%p8956_p9), %s8893_s10, 32, %s8891_s14, %s6348_s6  }
 0xfc3 PF: > { %p6967_p2 = scmp.ge.s32.totalorder %s7313_s29, 2  ;;  %s6374_s9 = sand.u32 1, %s7301_s26  }
 0xfc4   : > { %p8957_p3 = scmp.ne.s32.totalorder %s8948_s13, 0  ;;  %s6375_s15 = scalar_lea.sflag [#allocation7], %s6374_s9 }
 0xfc6   : > { %p6962_p4 = pnand %p6967_p2, %p8957_p3 }
 0xfc8   : > { %7296 = dma.done.wait (!%p6962_p4), %s6375_s15, 32  }
 0xfc9   : > { %7298 = vsyncadd (!%p6962_p4), %s6375_s15, 4294967264  ;;  %p20_p7 = scmp.ge.s32.totalorder %s7408_s8, 4   ;;  %s8958_s26 = smov %s7305_s27 }
 0xfca   : > { %s8959_s27 = smov %s7309_s28  ;;  %s8960_s28 = smov %s7419_s11 }
 0xfcb   : > { %s8961_s29 = smov %s7408_s8  ;;  %22 = sbr.rel (!%p20_p7) target bundleno = 7 (0x7), region = 102 }
 0xfd2   :  { %6380 = vsyncpa [#allocation6], 1 }
 0xfd3   :  { %6382 = vsyncpa [#allocation6 + $0x1], 1 }
 0xfd4   :  { %6383 = vsyncpa [#allocation7], 1 }
 0xfd5   :  { %6385 = vsyncpa [#allocation7 + $0x1], 1 }

</bundles_post_ra>
